<compile_context>
chip_gen: v5e
topology: v5e:2x2
jax: 0.10.0
libtpu: 0.0.40
codegen_flags: <defaults>
</compile_context>

<pallas_src>
import math
import jax
import jax.numpy as jnp
from jax.experimental import pallas as pl
from jax.experimental.pallas import tpu as pltpu

H1, H2, H3 = 1024, 512, 256
N_EMB = 10


def _disc_kernel(labels_ref, x_ref, w1a_ref, w1b_ref, b1_ref,
                 w2_ref, b2_ref, w3_ref, b3_ref, w4_ref, b4_ref, o_ref):
    tm = x_ref.shape[0]

    # Fused label-embedding gather, folded into layer 1:
    #   one_hot(labels) @ (emb @ w1b)  ==  emb[labels] @ w1b
    lbl = labels_ref[...]                                        # (tm, 1) int32
    iota = jax.lax.broadcasted_iota(jnp.int32, (tm, N_EMB), 1)   # (tm, 10)
    onehot = (lbl == iota).astype(jnp.bfloat16)

    # Layer 1: Linear(prod(n_input)+10 -> 1024) + LeakyReLU(0.2).
    # Split contraction keeps the big weight (8,128)-aligned; x is cast to
    # bf16 in-kernel (hidden under the MXU) instead of in the wrapper.
    h = (jnp.dot(x_ref[...].astype(jnp.bfloat16), w1a_ref[...],
                 preferred_element_type=jnp.float32)
         + jnp.dot(onehot, w1b_ref[...], preferred_element_type=jnp.float32)
         + b1_ref[...])
    h = jnp.where(h > 0, h, 0.2 * h)
    # Dropout(0.3): identity (eval mode)

    # Layer 2: Linear(1024 -> 512) + LeakyReLU(0.2)
    h = jnp.dot(h.astype(jnp.bfloat16), w2_ref[...],
                preferred_element_type=jnp.float32) + b2_ref[...]
    h = jnp.where(h > 0, h, 0.2 * h)

    # Layer 3: Linear(512 -> 256) + LeakyReLU(0.2)
    h = jnp.dot(h.astype(jnp.bfloat16), w3_ref[...],
                preferred_element_type=jnp.float32) + b3_ref[...]
    h = jnp.where(h > 0, h, 0.2 * h)

    # Layer 4: Linear(256 -> 1) + Sigmoid.
    # N=1 projection as VPU multiply + lane reduction (skip an MXU pass);
    # exact sigmoid — cost is per-row only.
    logits = jnp.sum(h * w4_ref[...], axis=-1, keepdims=True) + b4_ref[...]
    o_ref[...] = 1.0 / (1.0 + jnp.exp(-logits))


def prepare_params(raw, n_input):
    """One-time conversion of raw f32 parameters into the kernel layout.

    Call once at model-load time; the forward pass then launches only the
    Pallas kernel (no per-call slicing / casting / embedding matmul).
    """
    d_flat = math.prod(n_input)
    w1 = raw["w1"].astype(jnp.float32)
    emb = raw["emb"].astype(jnp.float32)
    return dict(
        w1a=w1[:d_flat].astype(jnp.bfloat16),                    # (d_flat, 1024)
        # Fold the embedding table into the label half of w1 (f32 product,
        # a single bf16 quantisation):  onehot @ w1b_eff == emb[labels] @ w1b.
        w1b_eff=jnp.dot(emb, w1[d_flat:]).astype(jnp.bfloat16),  # (10, 1024)
        b1=raw["b1"].reshape(1, H1).astype(jnp.float32),
        w2=raw["w2"].astype(jnp.bfloat16),
        b2=raw["b2"].reshape(1, H2).astype(jnp.float32),
        w3=raw["w3"].astype(jnp.bfloat16),
        b3=raw["b3"].reshape(1, H3).astype(jnp.float32),
        w4_row=raw["w4"].reshape(1, H3).astype(jnp.float32),     # tiny, keep f32
        b4=raw["b4"].reshape(1, 1).astype(jnp.float32),
    )


def _large_row_tile():
    # TM=256 matches the 256x256 MXU of v6e/v7x; v5e (4x 128x128) keeps 128.
    try:
        kind = jax.devices()[0].device_kind.lower()
    except Exception:
        return 128
    return 128 if "v5" in kind else 256


def _row_tiling(batch):
    """Pick the row-tile size and the padded batch for the grid."""
    if batch <= 64:
        tm = max(8, pl.cdiv(batch, 8) * 8)       # one tile, sublane-aligned
        return tm, tm
    if batch <= 128:
        tm = 64                                   # >=2 grid steps: both v7x TCs busy
    else:
        tm = _large_row_tile()
    return tm, pl.cdiv(batch, tm) * tm


def cgan_discriminator_forward(x, labels, params, n_input):
    """x: (B, *n_input) float32, labels: (B,) int.  `params` from prepare_params."""
    B = x.shape[0]
    d_flat = math.prod(n_input)

    x_flat = x.reshape(B, d_flat).astype(jnp.float32)    # bf16 cast happens in-kernel
    labels2d = labels.astype(jnp.int32).reshape(B, 1)

    tm, b_pad = _row_tiling(B)
    if b_pad != B:
        pad = b_pad - B
        x_flat = jnp.pad(x_flat, ((0, pad), (0, 0)))
        labels2d = jnp.pad(labels2d, ((0, pad), (0, 0)))  # label 0 is a valid index
    grid_m = b_pad // tm

    def row_spec(cols):
        return pl.BlockSpec((tm, cols), lambda i: (i, 0))

    def const_spec(shape):
        # Constant index_map -> block is DMA'd once and stays VMEM-resident.
        return pl.BlockSpec(shape, lambda i: (0, 0))

    w1a, w1b = params["w1a"], params["w1b_eff"]
    weight_bytes = ((w1a.size + w1b.size + params["w2"].size
                     + params["w3"].size) * 2
                    + (params["b1"].size + params["b2"].size + params["b3"].size
                       + params["w4_row"].size + params["b4"].size) * 4)
    cost = pl.CostEstimate(
        flops=2 * b_pad * (d_flat * H1 + N_EMB * H1 + H1 * H2 + H2 * H3 + H3),
        transcendentals=b_pad,
        bytes_accessed=weight_bytes + x_flat.size * 4 + b_pad * (4 + 4),
    )

    out = pl.pallas_call(
        _disc_kernel,
        out_shape=jax.ShapeDtypeStruct((b_pad, 1), jnp.float32),
        grid_spec=pltpu.PrefetchScalarGridSpec(
            num_scalar_prefetch=0,
            grid=(grid_m,),
            in_specs=[
                row_spec(1),                      # labels (int32)
                row_spec(d_flat),                 # x_flat (f32)
                const_spec((d_flat, H1)),         # w1a (bf16)
                const_spec((N_EMB, H1)),          # w1b_eff = emb @ w1b (bf16)
                const_spec((1, H1)),              # b1
                const_spec((H1, H2)),             # w2 (bf16)
                const_spec((1, H2)),              # b2
                const_spec((H2, H3)),             # w3 (bf16)
                const_spec((1, H3)),              # b3
                const_spec((1, H3)),              # w4 (row layout, f32)
                const_spec((1, 1)),               # b4
            ],
            out_specs=row_spec(1),
        ),
        compiler_params=pltpu.CompilerParams(
            dimension_semantics=("parallel",),
            vmem_limit_bytes=16 << 20,   # actual footprint ~4 MiB; fits v7x VMEM
        ),
        cost_estimate=cost,
    )(labels2d, x_flat, w1a, w1b, params["b1"], params["w2"], params["b2"],
      params["w3"], params["b3"], params["w4_row"], params["b4"])

    return out[:B].squeeze()   # matches .squeeze() in the PyTorch forward


def init_params(key, n_input):
    """Deterministic synthetic parameters matching the module's shapes."""
    d_flat = math.prod(n_input)
    d_in = d_flat + N_EMB
    ks = jax.random.split(key, 9)

    def linear(kw, kb, fan_in, fan_out):
        # PyTorch nn.Linear default init: U(-1/sqrt(fan_in), 1/sqrt(fan_in))
        lim = 1.0 / math.sqrt(fan_in)
        w = jax.random.uniform(kw, (fan_in, fan_out), jnp.float32, -lim, lim)
        b = jax.random.uniform(kb, (1, fan_out), jnp.float32, -lim, lim)
        return w, b

    emb = jax.random.normal(ks[0], (N_EMB, N_EMB), jnp.float32)  # nn.Embedding ~ N(0,1)
    w1, b1 = linear(ks[1], ks[2], d_in, H1)
    w2, b2 = linear(ks[3], ks[4], H1, H2)
    w3, b3 = linear(ks[5], ks[6], H2, H3)
    w4, b4 = linear(ks[7], ks[8], H3, 1)
    return dict(emb=emb, w1=w1, b1=b1, w2=w2, b2=b2,
                w3=w3, b3=b3, w4=w4, b4=b4)


if __name__ == "__main__":
    n_input = (1, 16, 16)   # prod = 256  ->  MLP input dim = 266
    B = 8

    key = jax.random.PRNGKey(0)
    kx, kl, kp = jax.random.split(key, 3)

    x = jax.random.normal(kx, (B, *n_input), jnp.float32)     # NCHW-style input
    labels = jax.random.randint(kl, (B,), 0, 10, jnp.int32)   # class labels
    raw = init_params(kp, n_input)
    params = prepare_params(raw, n_input)      # one-time, off the hot path

    out = cgan_discriminator_forward(x, labels, params, n_input)
    out = jax.block_until_ready(out)

    # Reference: PyTorch-faithful structure (gather + concat + MLP) using the
    # same bf16 weight quantization / f32 accumulation as the kernel.
    def ref(x, labels, p):
        xf = x.reshape(B, -1)
        c = p["emb"][labels]
        h = jnp.concatenate([xf, c], axis=1).astype(jnp.bfloat16)
        h = jnp.dot(h, p["w1"].astype(jnp.bfloat16),
                    preferred_element_type=jnp.float32) + p["b1"]
        h = jnp.where(h > 0, h, 0.2 * h)
        h = jnp.dot(h.astype(jnp.bfloat16), p["w2"].astype(jnp.bfloat16),
                    preferred_element_type=jnp.float32) + p["b2"]
        h = jnp.where(h > 0, h, 0.2 * h)
        h = jnp.dot(h.astype(jnp.bfloat16), p["w3"].astype(jnp.bfloat16),
                    preferred_element_type=jnp.float32) + p["b3"]
        h = jnp.where(h > 0, h, 0.2 * h)
        h = h @ p["w4"] + p["b4"]
        return jax.nn.sigmoid(h).squeeze()

    expected = ref(x, labels, raw)
    assert out.shape == (B,), out.shape
    assert jnp.allclose(out, expected, atol=5e-3, rtol=5e-3), (
        f"mismatch: {out} vs {expected}")

    print("KERNEL_OK")
</pallas_src>

<mosaic_0001>
module attributes {stable_mosaic.version = 11 : i64} {
  func.func @_disc_kernel(%arg0: i32, %arg1: memref<8x1xi32, #tpu.memory_space<vmem>>, %arg2: memref<8x256xf32, #tpu.memory_space<vmem>>, %arg3: memref<256x1024xbf16, #tpu.memory_space<vmem>>, %arg4: memref<10x1024xbf16, #tpu.memory_space<vmem>>, %arg5: memref<1x1024xf32, #tpu.memory_space<vmem>>, %arg6: memref<1024x512xbf16, #tpu.memory_space<vmem>>, %arg7: memref<1x512xf32, #tpu.memory_space<vmem>>, %arg8: memref<512x256xbf16, #tpu.memory_space<vmem>>, %arg9: memref<1x256xf32, #tpu.memory_space<vmem>>, %arg10: memref<1x256xf32, #tpu.memory_space<vmem>>, %arg11: memref<1x1xf32, #tpu.memory_space<vmem>>, %arg12: memref<8x1xf32, #tpu.memory_space<vmem>>) attributes {dimension_semantics = [#tpu.dimension_semantics<parallel>], iteration_bounds = array<i64: 1>, scalar_prefetch = 0 : i64, scratch_operands = 0 : i64, tpu.core_type = #tpu.core_type<tc>, window_params = [{transform_indices = @transform_0, window_bounds = array<i64: 8, 1>}, {transform_indices = @transform_1, window_bounds = array<i64: 8, 256>}, {pipeline_mode = #tpu.pipeline_mode<synchronous>, transform_indices = @transform_2, window_bounds = array<i64: 256, 1024>}, {pipeline_mode = #tpu.pipeline_mode<synchronous>, transform_indices = @transform_3, window_bounds = array<i64: 10, 1024>}, {pipeline_mode = #tpu.pipeline_mode<synchronous>, transform_indices = @transform_4, window_bounds = array<i64: 1, 1024>}, {pipeline_mode = #tpu.pipeline_mode<synchronous>, transform_indices = @transform_5, window_bounds = array<i64: 1024, 512>}, {pipeline_mode = #tpu.pipeline_mode<synchronous>, transform_indices = @transform_6, window_bounds = array<i64: 1, 512>}, {pipeline_mode = #tpu.pipeline_mode<synchronous>, transform_indices = @transform_7, window_bounds = array<i64: 512, 256>}, {pipeline_mode = #tpu.pipeline_mode<synchronous>, transform_indices = @transform_8, window_bounds = array<i64: 1, 256>}, {pipeline_mode = #tpu.pipeline_mode<synchronous>, transform_indices = @transform_9, window_bounds = array<i64: 1, 256>}, {pipeline_mode = #tpu.pipeline_mode<synchronous>, transform_indices = @transform_10, window_bounds = array<i64: 1, 1>}, {transform_indices = @transform_11, window_bounds = array<i64: 8, 1>}]} {
    %c0 = arith.constant 0 : index
    %c0_0 = arith.constant 0 : index
    %0 = vector.load %arg1[%c0, %c0_0] : memref<8x1xi32, #tpu.memory_space<vmem>>, vector<8x1xi32>
    %1 = tpu.iota {dimensions = array<i32: 1>} : vector<8x10xi32>
    %2 = vector.broadcast %0 : vector<8x1xi32> to vector<8x10xi32>
    %3 = arith.cmpi eq, %2, %1 : vector<8x10xi32>
    %4 = arith.extui %3 : vector<8x10xi1> to vector<8x10xi32>
    %5 = arith.sitofp %4 : vector<8x10xi32> to vector<8x10xf32>
    %6 = arith.truncf %5 : vector<8x10xf32> to vector<8x10xbf16>
    %c0_1 = arith.constant 0 : index
    %c0_2 = arith.constant 0 : index
    %7 = vector.load %arg2[%c0_1, %c0_2] : memref<8x256xf32, #tpu.memory_space<vmem>>, vector<8x256xf32>
    %8 = arith.truncf %7 : vector<8x256xf32> to vector<8x256xbf16>
    %c0_3 = arith.constant 0 : index
    %c0_4 = arith.constant 0 : index
    %9 = vector.load %arg3[%c0_3, %c0_4] : memref<256x1024xbf16, #tpu.memory_space<vmem>>, vector<256x1024xbf16>
    %cst = arith.constant dense<0.000000e+00> : vector<8x1024xf32>
    %10 = tpu.matmul %8, %9, %cst {dimension_numbers = #tpu.dot_dimension_numbers<[1], [0], [0], [1], [0, 0, 1, 1], [], []>} : vector<8x256xbf16>, vector<256x1024xbf16>, vector<8x1024xf32> -> vector<8x1024xf32>
    %c0_5 = arith.constant 0 : index
    %c0_6 = arith.constant 0 : index
    %11 = vector.load %arg4[%c0_5, %c0_6] : memref<10x1024xbf16, #tpu.memory_space<vmem>>, vector<10x1024xbf16>
    %cst_7 = arith.constant dense<0.000000e+00> : vector<8x1024xf32>
    %12 = tpu.matmul %6, %11, %cst_7 {dimension_numbers = #tpu.dot_dimension_numbers<[1], [0], [0], [1], [0, 0, 1, 1], [], []>} : vector<8x10xbf16>, vector<10x1024xbf16>, vector<8x1024xf32> -> vector<8x1024xf32>
    %13 = arith.addf %10, %12 : vector<8x1024xf32>
    %c0_8 = arith.constant 0 : index
    %c0_9 = arith.constant 0 : index
    %14 = vector.load %arg5[%c0_8, %c0_9] : memref<1x1024xf32, #tpu.memory_space<vmem>>, vector<1x1024xf32>
    %15 = vector.broadcast %14 : vector<1x1024xf32> to vector<8x1024xf32>
    %16 = arith.addf %13, %15 : vector<8x1024xf32>
    %cst_10 = arith.constant 0.000000e+00 : f32
    %17 = vector.broadcast %cst_10 : f32 to vector<8x1024xf32>
    %18 = arith.cmpf ogt, %16, %17 : vector<8x1024xf32>
    %cst_11 = arith.constant 2.000000e-01 : f32
    %19 = vector.broadcast %cst_11 : f32 to vector<8x1024xf32>
    %20 = arith.mulf %19, %16 : vector<8x1024xf32>
    %21 = arith.select %18, %16, %20 : vector<8x1024xi1>, vector<8x1024xf32>
    %22 = arith.truncf %21 : vector<8x1024xf32> to vector<8x1024xbf16>
    %c0_12 = arith.constant 0 : index
    %c0_13 = arith.constant 0 : index
    %23 = vector.load %arg6[%c0_12, %c0_13] : memref<1024x512xbf16, #tpu.memory_space<vmem>>, vector<1024x512xbf16>
    %cst_14 = arith.constant dense<0.000000e+00> : vector<8x512xf32>
    %24 = tpu.matmul %22, %23, %cst_14 {dimension_numbers = #tpu.dot_dimension_numbers<[1], [0], [0], [1], [0, 0, 1, 1], [], []>} : vector<8x1024xbf16>, vector<1024x512xbf16>, vector<8x512xf32> -> vector<8x512xf32>
    %c0_15 = arith.constant 0 : index
    %c0_16 = arith.constant 0 : index
    %25 = vector.load %arg7[%c0_15, %c0_16] : memref<1x512xf32, #tpu.memory_space<vmem>>, vector<1x512xf32>
    %26 = vector.broadcast %25 : vector<1x512xf32> to vector<8x512xf32>
    %27 = arith.addf %24, %26 : vector<8x512xf32>
    %cst_17 = arith.constant 0.000000e+00 : f32
    %28 = vector.broadcast %cst_17 : f32 to vector<8x512xf32>
    %29 = arith.cmpf ogt, %27, %28 : vector<8x512xf32>
    %cst_18 = arith.constant 2.000000e-01 : f32
    %30 = vector.broadcast %cst_18 : f32 to vector<8x512xf32>
    %31 = arith.mulf %30, %27 : vector<8x512xf32>
    %32 = arith.select %29, %27, %31 : vector<8x512xi1>, vector<8x512xf32>
    %33 = arith.truncf %32 : vector<8x512xf32> to vector<8x512xbf16>
    %c0_19 = arith.constant 0 : index
    %c0_20 = arith.constant 0 : index
    %34 = vector.load %arg8[%c0_19, %c0_20] : memref<512x256xbf16, #tpu.memory_space<vmem>>, vector<512x256xbf16>
    %cst_21 = arith.constant dense<0.000000e+00> : vector<8x256xf32>
    %35 = tpu.matmul %33, %34, %cst_21 {dimension_numbers = #tpu.dot_dimension_numbers<[1], [0], [0], [1], [0, 0, 1, 1], [], []>} : vector<8x512xbf16>, vector<512x256xbf16>, vector<8x256xf32> -> vector<8x256xf32>
    %c0_22 = arith.constant 0 : index
    %c0_23 = arith.constant 0 : index
    %36 = vector.load %arg9[%c0_22, %c0_23] : memref<1x256xf32, #tpu.memory_space<vmem>>, vector<1x256xf32>
    %37 = vector.broadcast %36 : vector<1x256xf32> to vector<8x256xf32>
    %38 = arith.addf %35, %37 : vector<8x256xf32>
    %cst_24 = arith.constant 0.000000e+00 : f32
    %39 = vector.broadcast %cst_24 : f32 to vector<8x256xf32>
    %40 = arith.cmpf ogt, %38, %39 : vector<8x256xf32>
    %cst_25 = arith.constant 2.000000e-01 : f32
    %41 = vector.broadcast %cst_25 : f32 to vector<8x256xf32>
    %42 = arith.mulf %41, %38 : vector<8x256xf32>
    %43 = arith.select %40, %38, %42 : vector<8x256xi1>, vector<8x256xf32>
    %c0_26 = arith.constant 0 : index
    %c0_27 = arith.constant 0 : index
    %44 = vector.load %arg10[%c0_26, %c0_27] : memref<1x256xf32, #tpu.memory_space<vmem>>, vector<1x256xf32>
    %45 = vector.broadcast %44 : vector<1x256xf32> to vector<8x256xf32>
    %46 = arith.mulf %43, %45 : vector<8x256xf32>
    %cst_28 = arith.constant dense<0.000000e+00> : vector<8xf32>
    %47 = vector.multi_reduction <add>, %46, %cst_28 [1] : vector<8x256xf32> to vector<8xf32>
    %48 = vector.shape_cast %47 : vector<8xf32> to vector<8x1xf32>
    %c0_29 = arith.constant 0 : index
    %c0_30 = arith.constant 0 : index
    %49 = vector.load %arg11[%c0_29, %c0_30] : memref<1x1xf32, #tpu.memory_space<vmem>>, vector<1x1xf32>
    %50 = vector.broadcast %49 : vector<1x1xf32> to vector<8x1xf32>
    %51 = arith.addf %48, %50 : vector<8x1xf32>
    %cst_31 = arith.constant 0.000000e+00 : f32
    %52 = vector.broadcast %cst_31 : f32 to vector<8x1xf32>
    %53 = arith.subf %52, %51 : vector<8x1xf32>
    %54 = math.exp %53 : vector<8x1xf32>
    %cst_32 = arith.constant 1.000000e+00 : f32
    %55 = vector.broadcast %cst_32 : f32 to vector<8x1xf32>
    %56 = arith.addf %55, %54 : vector<8x1xf32>
    %cst_33 = arith.constant 1.000000e+00 : f32
    %57 = vector.broadcast %cst_33 : f32 to vector<8x1xf32>
    %58 = arith.divf %57, %56 : vector<8x1xf32>
    %c0_34 = arith.constant 0 : index
    %c0_35 = arith.constant 0 : index
    %59 = vector.load %arg12[%c0_34, %c0_35] : memref<8x1xf32, #tpu.memory_space<vmem>>, vector<8x1xf32>
    tpu.vector_store %arg12[%c0_34, %c0_35], %58 {strides = array<i32>} : memref<8x1xf32, #tpu.memory_space<vmem>>, vector<8x1xf32>,
    return
  }
  func.func @transform_0(%arg0: i32) -> (i32, i32) {
    %c0_i32 = arith.constant 0 : i32
    %c0_i32_0 = arith.constant 0 : i32
    return %arg0, %c0_i32 : i32, i32
  }
  func.func @transform_1(%arg0: i32) -> (i32, i32) {
    %c0_i32 = arith.constant 0 : i32
    %c0_i32_0 = arith.constant 0 : i32
    return %arg0, %c0_i32 : i32, i32
  }
  func.func @transform_2(%arg0: i32) -> (i32, i32) {
    %c0_i32 = arith.constant 0 : i32
    %c0_i32_0 = arith.constant 0 : i32
    %c0_i32_1 = arith.constant 0 : i32
    return %c0_i32, %c0_i32_0 : i32, i32
  }
  func.func @transform_3(%arg0: i32) -> (i32, i32) {
    %c0_i32 = arith.constant 0 : i32
    %c0_i32_0 = arith.constant 0 : i32
    %c0_i32_1 = arith.constant 0 : i32
    return %c0_i32, %c0_i32_0 : i32, i32
  }
  func.func @transform_4(%arg0: i32) -> (i32, i32) {
    %c0_i32 = arith.constant 0 : i32
    %c0_i32_0 = arith.constant 0 : i32
    %c0_i32_1 = arith.constant 0 : i32
    return %c0_i32, %c0_i32_0 : i32, i32
  }
  func.func @transform_5(%arg0: i32) -> (i32, i32) {
    %c0_i32 = arith.constant 0 : i32
    %c0_i32_0 = arith.constant 0 : i32
    %c0_i32_1 = arith.constant 0 : i32
    return %c0_i32, %c0_i32_0 : i32, i32
  }
  func.func @transform_6(%arg0: i32) -> (i32, i32) {
    %c0_i32 = arith.constant 0 : i32
    %c0_i32_0 = arith.constant 0 : i32
    %c0_i32_1 = arith.constant 0 : i32
    return %c0_i32, %c0_i32_0 : i32, i32
  }
  func.func @transform_7(%arg0: i32) -> (i32, i32) {
    %c0_i32 = arith.constant 0 : i32
    %c0_i32_0 = arith.constant 0 : i32
    %c0_i32_1 = arith.constant 0 : i32
    return %c0_i32, %c0_i32_0 : i32, i32
  }
  func.func @transform_8(%arg0: i32) -> (i32, i32) {
    %c0_i32 = arith.constant 0 : i32
    %c0_i32_0 = arith.constant 0 : i32
    %c0_i32_1 = arith.constant 0 : i32
    return %c0_i32, %c0_i32_0 : i32, i32
  }
  func.func @transform_9(%arg0: i32) -> (i32, i32) {
    %c0_i32 = arith.constant 0 : i32
    %c0_i32_0 = arith.constant 0 : i32
    %c0_i32_1 = arith.constant 0 : i32
    return %c0_i32, %c0_i32_0 : i32, i32
  }
  func.func @transform_10(%arg0: i32) -> (i32, i32) {
    %c0_i32 = arith.constant 0 : i32
    %c0_i32_0 = arith.constant 0 : i32
    %c0_i32_1 = arith.constant 0 : i32
    return %c0_i32, %c0_i32_0 : i32, i32
  }
  func.func @transform_11(%arg0: i32) -> (i32, i32) {
    %c0_i32 = arith.constant 0 : i32
    %c0_i32_0 = arith.constant 0 : i32
    return %arg0, %c0_i32 : i32, i32
  }
}

</mosaic_0001>

<bundles_post_ra>
// kernel: tpu_custom_call.1
= control target key start
LH: loop header
LB: loop body
LE: loop exit
PB: predicated region body
PF: predicated region fallthrough
CT: control target
= control target key end

     0   :  { %s6583_s0 = inlined_call_operand.vmem [shape: s32[8,1], index: 0, kind: input, shape index: {}]   ;;  %s6584_s1 = inlined_call_operand.hbm [shape: f32[8,256], index: 1, kind: input, shape index: {}]   ;;  %s6585_s2 = inlined_call_operand.hbm [shape: bf16[256,1024], index: 2, kind: input, shape index: {}]   ;;  %s6586_s3 = inlined_call_operand.hbm [shape: bf16[10,1024], index: 3, kind: input, shape index: {}]   ;;  %s6587_s4 = inlined_call_operand.vmem [shape: f32[1,1024], index: 4, kind: input, shape index: {}]   ;;  %s6588_s5 = inlined_call_operand.hbm [shape: bf16[1024,512], index: 5, kind: input, shape index: {}]   ;;  %s6589_s6 = inlined_call_operand.vmem [shape: f32[1,512], index: 6, kind: input, shape index: {}]   ;;  %s6590_s7 = inlined_call_operand.hbm [shape: bf16[512,256], index: 7, kind: input, shape index: {}]   ;;  %s6591_s8 = inlined_call_operand.vmem [shape: f32[1,256], index: 8, kind: input, shape index: {}]   ;;  %s6592_s9 = inlined_call_operand.vmem [shape: f32[1,256], index: 9, kind: input, shape index: {}]   ;;  %s6593_s10 = inlined_call_operand.<no memory space> [shape: f32[1,1], index: 10, kind: input, shape index: {}]   ;;  %s6594_s11 = inlined_call_operand.vmem [shape: f32[8,1], index: 11, kind: output, shape index: {}]  }
   0x1   :  { %v16_v0 = vstv %s6593_s10 }
   0x2   :  { %17 = vst [vmem:[#allocation2] sm:$0x1] %v16_v0 }
   0x3   :  { %18 = vsyncpa [#allocation4], 0 }
   0x4   :  { %19 = vsyncpa [#allocation6], 0  ;;  %s38_s21 = sshll.u32 %s6585_s2, 4  ;;  %s39_s21 = int_to_ptr.hbm [resolvable:$true] %s38_s21 }
   0x5   :  { %20 = vsyncpa [#allocation9], 0  ;;  %s6295_s22 = smov [#allocation5]   ;;  %s66_s26 = sshll.u32 %s6588_s5, 4  ;;  %s67_s26 = int_to_ptr.hbm [resolvable:$true] %s66_s26 }
   0x6   :  { %s40_s23 = sshll.u32 %s6295_s22, 4  ;;  %s6296_s27 = smov 512   ;;  %s41_s23 = int_to_ptr.vmem [resolvable:$true] %s40_s23 }
   0x7   :  { %s6297_s28 = smov 32   ;;  %s6298_s10 = smov [#allocation8]  }
   0x8   :  { %46 = dma.hbm_to_vmem [thread:$0]  %s39_s21, 16384, %s41_s23, [#allocation6], %s6296_s27, %s6296_s27, %s6297_s28  }
   0x9   :  { %s68_s29 = sshll.u32 %s6298_s10, 4  ;;  %s6299_s30 = smov 256   ;;  %s69_s29 = int_to_ptr.vmem [resolvable:$true] %s68_s29 }
   0xa   :  { %s6300_s12 = smov 16   ;;  %s28_s14 = sshll.u32 %s6584_s1, 4  ;;  %s29_s14 = int_to_ptr.hbm [resolvable:$true] %s28_s14 }
   0xb   :  { %74 = dma.hbm_to_vmem [thread:$0]  %s67_s26, 32768, %s69_s29, [#allocation9], %s6299_s30, %s6299_s30, %s6300_s12  }
   0xc   :  { %s6301_s15 = smov [#allocation3]   ;;  %s51_s18 = sshll.u32 %s6586_s3, 4  ;;  %s52_s18 = int_to_ptr.hbm [resolvable:$true] %s51_s18 }
   0xd   :  { %s30_s16 = sshll.u32 %s6301_s15, 4  ;;  %s6302_s19 = smov [#allocation7]   ;;  %s31_s16 = int_to_ptr.vmem [resolvable:$true] %s30_s16 }
   0xe   :  { %33 = dma.hbm_to_vmem [thread:$0]  %s29_s14, 256, %s31_s16, [#allocation4]  }
   0xf   :  { %s53_s20 = sshll.u32 %s6302_s19, 4  ;;  %s81_s23 = sshll.u32 %s6590_s7, 4  ;;  %s54_s20 = int_to_ptr.vmem [resolvable:$true] %s53_s20  ;;  %s82_s23 = int_to_ptr.hbm [resolvable:$true] %s81_s23 }
  0x10   :  { %59 = dma.hbm_to_vmem [thread:$0]  %s52_s18, 1024, %s54_s20, [#allocation6], %s6296_s27, %s6296_s27, %s6297_s28  }
  0x11   :  { %s6303_s1 = smov [#allocation10]   ;;  %s6304_s25 = smov 128  }
  0x12   :  { %s83_s24 = sshll.u32 %s6303_s1, 4  ;;  %s6305_s26 = smov 8   ;;  %s84_s24 = int_to_ptr.vmem [resolvable:$true] %s83_s24 }
  0x13   :  { %89 = dma.hbm_to_vmem [thread:$0]  %s82_s23, 8192, %s84_s24, [#allocation9], %s6304_s25, %s6304_s25, %s6305_s26  }
  0x14   :  { %6289 = dma.done.wait [#allocation4], 256  }
  0x15   :  { %6290 = vsyncadd [#allocation4], 4294967040 }
  0x16   :  { %6291 = dma.done.wait [#allocation6], 17408  }
  0x17   :  { %6292 = vsyncadd [#allocation6], 4294949888 }
  0x18   :  { %6293 = dma.done.wait [#allocation9], 40960  }
  0x19   :  { %6294 = vsyncadd [#allocation9], 4294926336  ;;  %v6306_v1 = vmov 0   ;;  %v117_v2 = vld [vmem:[%s6583_s0] sm:$0xff]  ;;  %v3863_v3 = vld [vmem:[#allocation7] sm:$0xf]  ;;  %v118_v35 = vlaneseq }
  0x1a   :  { %6162 = vset.pattern.permute.xlu0 %v6306_v1  ;;  %v5825_v4 = vld [vmem:[#allocation7 + $0x1c] sm:$0x10]  ;;  %v5821_v5 = vld [vmem:[#allocation7 + $0x4] sm:$0xf]  ;;  %v3871_v8 = vld [vmem:[#allocation7 + $0x8] sm:$0xf] }
  0x1b   :  { %121 = vperm.xlu0 %6162, %v117_v2   ;;  %v3864_v6 = vor.u32 %v5825_v4, %v3863_v3  ;;  %v3865_v7 = vld [vmem:[#allocation7 + $0x20] sm:$0x10]  ;;  %v5826_v9 = vld [vmem:[#allocation7 + $0x24] sm:$0x10]  ;;  %vm303_vm0 = vcmask 1044480   ;;  %v119_v36 = vand.u32 127, %v118_v35 }
  0x1c   :  { %v3868_v10 = vor.u32 %v5821_v5, %v3865_v7  ;;  %v3872_v11 = vor.u32 %v5826_v9, %v3871_v8  ;;  %v5822_v12 = vld [vmem:[#allocation7 + $0xc] sm:$0xf]  ;;  %v3879_v16 = vld [vmem:[#allocation7 + $0x10] sm:$0xf]  ;;  %v5823_v21 = vld [vmem:[#allocation7 + $0x14] sm:$0xf] }
  0x1d   :  { %v3873_v13 = vld [vmem:[#allocation7 + $0x28] sm:$0x10]  ;;  %v305_v14 = vsel %vm303_vm0, %v3864_v6, 0  ;;  %v5827_v17 = vld [vmem:[#allocation7 + $0x2c] sm:$0x10]  ;;  %v6307_v46 = vmov 0.0  }
  0x1e   :  { %v3876_v15 = vor.u32 %v5822_v12, %v3873_v13  ;;  %335 = vmatpush.bf16.msra.mxu0 %v305_v14  ;;  %v308_v18 = vsel %vm303_vm0, %v3868_v10, 0  ;;  %v311_v19 = vsel %vm303_vm0, %v3872_v11, 0  ;;  %v3880_v20 = vor.u32 %v5827_v17, %v3879_v16  ;;  %v3881_v22 = vld [vmem:[#allocation7 + $0x30] sm:$0x10]  ;;  %v3887_v25 = vld [vmem:[#allocation7 + $0x18] sm:$0xf] }
  0x1f   :  { %348 = vmatpush.bf16.msra.mxu1 %v308_v18  ;;  %361 = vmatpush.bf16.msra.mxu2 %v311_v19  ;;  %v3884_v24 = vor.u32 %v5823_v21, %v3881_v22  ;;  %v5828_v26 = vld [vmem:[#allocation7 + $0x34] sm:$0x10]  ;;  %v5824_v29 = vld [vmem:[#allocation7 + $0x1c] sm:$0xf]  ;;  %v4127_v37 = vld [vmem:[#allocation5 + $0x1c0] sm:$0xf] }
  0x20   :  { %v314_v23 = vsel %vm303_vm0, %v3876_v15, 0  ;;  %v317_v27 = vsel %vm303_vm0, %v3880_v20, 0  ;;  %v3888_v28 = vor.u32 %v5828_v26, %v3887_v25  ;;  %v3889_v30 = vld [vmem:[#allocation7 + $0x38] sm:$0x10]  ;;  %v5753_v38 = vld [vmem:[#allocation5 + $0x1dc] sm:$0xf0] }
  0x21   :  { %374 = vmatpush.bf16.msra.mxu3 %v314_v23  ;;  %v320_v31 = vsel %vm303_vm0, %v3884_v24, 0  ;;  %v3892_v32 = vor.u32 %v5824_v29, %v3889_v30  ;;  %v4383_v40 = vld [vmem:[#allocation5 + $0x3c0] sm:$0xf]  ;;  %v5749_v42 = vld [vmem:[#allocation5 + $0x1c4] sm:$0xf]  ;;  %vm299_vm2 = vcmask 80896   ;;  %v4128_v49 = vor.u32 %v5753_v38, %v4127_v37 }
  0x22   :  { %387 = vmatpush.bf16.msrb.mxu0 %v317_v27  ;;  %v323_v33 = vsel %vm303_vm0, %v3888_v28, 0  ;;  %v5817_v41 = vld [vmem:[#allocation5 + $0x3dc] sm:$0xf0]  ;;  %v4129_v43 = vld [vmem:[#allocation5 + $0x1e0] sm:$0xf0] }
  0x23   :  { %400 = vmatpush.bf16.msrb.mxu1 %v320_v31  ;;  %413 = vmatpush.bf16.msrb.mxu2 %v323_v33  ;;  %v326_v34 = vsel %vm303_vm0, %v3892_v32, 0  ;;  %v5813_v44 = vld [vmem:[#allocation5 + $0x3c4] sm:$0xf]  ;;  %v4384_v50 = vor.u32 %v5817_v41, %v4383_v40  ;;  %v4095_v51 = vld [vmem:[#allocation5 + $0x180] sm:$0xf]  ;;  %v4132_v53 = vor.u32 %v5749_v42, %v4129_v43 }
  0x24   :  { %v4385_v45 = vld [vmem:[#allocation5 + $0x3e0] sm:$0xf0]  ;;  %v5745_v52 = vld [vmem:[#allocation5 + $0x19c] sm:$0xf0] }
  0x25   :  { %426 = vmatpush.bf16.msrb.mxu3 %v326_v34  ;;  %v4388_v54 = vor.u32 %v5813_v44, %v4385_v45  ;;  %v4351_v55 = vld [vmem:[#allocation5 + $0x380] sm:$0xf]  ;;  %v5741_v57 = vld [vmem:[#allocation5 + $0x184] sm:$0xf]  ;;  %v4096_v61 = vor.u32 %v5745_v52, %v4095_v51 }
  0x26   :  { %v5809_v56 = vld [vmem:[#allocation5 + $0x39c] sm:$0xf0]  ;;  %v4097_v58 = vld [vmem:[#allocation5 + $0x1a0] sm:$0xf0] }
  0x27   :  { %v5805_v59 = vld [vmem:[#allocation5 + $0x384] sm:$0xf]  ;;  %v4352_v62 = vor.u32 %v5809_v56, %v4351_v55  ;;  %v4063_v63 = vld [vmem:[#allocation5 + $0x140] sm:$0xf]  ;;  %v4100_v1 = vor.u32 %v5741_v57, %v4097_v58 }
  0x28   :  { %v4353_v60 = vld [vmem:[#allocation5 + $0x3a0] sm:$0xf0]  ;;  %v5737_v0 = vld [vmem:[#allocation5 + $0x15c] sm:$0xf0] }
  0x29   :  { %v4356_v2 = vor.u32 %v5805_v59, %v4353_v60  ;;  %v4319_v3 = vld [vmem:[#allocation5 + $0x340] sm:$0xf]  ;;  %v5733_v5 = vld [vmem:[#allocation5 + $0x144] sm:$0xf]  ;;  %v4064_v9 = vor.u32 %v5737_v0, %v4063_v63 }
  0x2a   :  { %v5801_v4 = vld [vmem:[#allocation5 + $0x35c] sm:$0xf0]  ;;  %v4065_v6 = vld [vmem:[#allocation5 + $0x160] sm:$0xf0] }
  0x2b   :  { %v5797_v7 = vld [vmem:[#allocation5 + $0x344] sm:$0xf]  ;;  %v4320_v10 = vor.u32 %v5801_v4, %v4319_v3  ;;  %v4031_v11 = vld [vmem:[#allocation5 + $0x100] sm:$0xf]  ;;  %v4068_v13 = vor.u32 %v5733_v5, %v4065_v6  ;;  %v4135_v5 = vld [vmem:[#allocation5 + $0x1c8] sm:$0xf] }
  0x2c   :  { %v4321_v8 = vld [vmem:[#allocation5 + $0x360] sm:$0xf0]  ;;  %v5729_v12 = vld [vmem:[#allocation5 + $0x11c] sm:$0xf0]  ;;  %v5754_v6 = vld [vmem:[#allocation5 + $0x1e4] sm:$0xf0] }
  0x2d   :  { %v4324_v14 = vor.u32 %v5797_v7, %v4321_v8  ;;  %v4287_v15 = vld [vmem:[#allocation5 + $0x300] sm:$0xf]  ;;  %v5725_v17 = vld [vmem:[#allocation5 + $0x104] sm:$0xf]  ;;  %v4032_v21 = vor.u32 %v5729_v12, %v4031_v11  ;;  %v4391_v7 = vld [vmem:[#allocation5 + $0x3c8] sm:$0xf] }
  0x2e   :  { %v5793_v16 = vld [vmem:[#allocation5 + $0x31c] sm:$0xf0]  ;;  %v4033_v18 = vld [vmem:[#allocation5 + $0x120] sm:$0xf0]  ;;  %v5818_v8 = vld [vmem:[#allocation5 + $0x3e4] sm:$0xf0] }
  0x2f   :  { %v5789_v19 = vld [vmem:[#allocation5 + $0x304] sm:$0xf]  ;;  %v4288_v22 = vor.u32 %v5793_v16, %v4287_v15  ;;  %v3999_v23 = vld [vmem:[#allocation5 + $0xc0] sm:$0xf]  ;;  %v4036_v25 = vor.u32 %v5725_v17, %v4033_v18  ;;  %v4137_v12 = vld [vmem:[#allocation5 + $0x1e8] sm:$0xf0]  ;;  %v4136_v18 = vor.u32 %v5754_v6, %v4135_v5 }
  0x30   :  { %v4289_v20 = vld [vmem:[#allocation5 + $0x320] sm:$0xf0]  ;;  %v5721_v24 = vld [vmem:[#allocation5 + $0xdc] sm:$0xf0]  ;;  %v127_v17 = vld [vmem:[#allocation3] sm:$0xff] }
  0x31   :  { %v4292_v26 = vor.u32 %v5789_v19, %v4289_v20  ;;  %v4255_v27 = vld [vmem:[#allocation5 + $0x2c0] sm:$0xf]  ;;  %v5717_v29 = vld [vmem:[#allocation5 + $0xc4] sm:$0xf]  ;;  %v4000_v33 = vor.u32 %v5721_v24, %v3999_v23  ;;  %v4392_v19 = vor.u32 %v5818_v8, %v4391_v7  ;;  %v4103_v20 = vld [vmem:[#allocation5 + $0x188] sm:$0xf] }
  0x32   :  { %v5785_v28 = vld [vmem:[#allocation5 + $0x2dc] sm:$0xf0]  ;;  %v4001_v30 = vld [vmem:[#allocation5 + $0xe0] sm:$0xf0]  ;;  %v3975_v7 = vld [vmem:[#allocation5 + $0x88] sm:$0xf] }
  0x33   :  { %v5781_v31 = vld [vmem:[#allocation5 + $0x2c4] sm:$0xf]  ;;  %v4256_v34 = vor.u32 %v5785_v28, %v4255_v27  ;;  %v3967_v35 = vld [vmem:[#allocation5 + $0x80] sm:$0xf]  ;;  %v4004_v37 = vor.u32 %v5717_v29, %v4001_v30  ;;  %v5742_v27 = vld [vmem:[#allocation5 + $0x18c] sm:$0xf]  ;;  %v6415_v28 = vpack.c.bf16 %v127_v17, %v127_v17 }
  0x34   :  { %v4257_v32 = vld [vmem:[#allocation5 + $0x2e0] sm:$0xf0]  ;;  %v5777_v40 = vld [vmem:[#allocation5 + $0x29c] sm:$0xf0]  ;;  %v4105_v29 = vld [vmem:[#allocation5 + $0x1a8] sm:$0xf0] }
  0x35   :  { %v4260_v38 = vor.u32 %v5781_v31, %v4257_v32  ;;  %v5709_v41 = vld [vmem:[#allocation5 + $0x84] sm:$0xf]  ;;  %v4191_v52 = vld [vmem:[#allocation5 + $0x240] sm:$0xf]  ;;  %v5806_v30 = vld [vmem:[#allocation5 + $0x38c] sm:$0xf] }
  0x36   :  { %v3969_v42 = vld [vmem:[#allocation5 + $0xa0] sm:$0xf0]  ;;  %v3903_v58 = vld [vmem:[#allocation5] sm:$0xf]  ;;  %v4361_v31 = vld [vmem:[#allocation5 + $0x3a8] sm:$0xf0] }
  0x37   :  { %v5773_v43 = vld [vmem:[#allocation5 + $0x284] sm:$0xf]  ;;  %v5697_v60 = vld [vmem:[#allocation5 + $0x1c] sm:$0xf0]  ;;  %v5714_v8 = vld [vmem:[#allocation5 + $0xa4] sm:$0xf0] }
  0x38   :  { %v4225_v44 = vld [vmem:[#allocation5 + $0x2a0] sm:$0xf0]  ;;  %v3976_v17 = vor.u32 %v5714_v8, %v3975_v7 }
  0x39   :  { %v4228_v51 = vor.u32 %v5773_v43, %v4225_v44  ;;  %v3937_v55 = vld [vmem:[#allocation5 + $0x60] sm:$0xf0]  ;;  %v5798_v43 = vld [vmem:[#allocation5 + $0x34c] sm:$0xf] }
  0x3a   :  { %v5765_v56 = vld [vmem:[#allocation5 + $0x244] sm:$0xf]  ;;  %v4329_v44 = vld [vmem:[#allocation5 + $0x368] sm:$0xf0] }
  0x3b   :  { %v4193_v57 = vld [vmem:[#allocation5 + $0x260] sm:$0xf0] }
  0x3c   :  { %v4196_v0 = vor.u32 %v5765_v56, %v4193_v57  ;;  %v5757_v3 = vld [vmem:[#allocation5 + $0x204] sm:$0xf]  ;;  %v5790_v56 = vld [vmem:[#allocation5 + $0x30c] sm:$0xf] }
  0x3d   :  { %v4161_v4 = vld [vmem:[#allocation5 + $0x220] sm:$0xf0]  ;;  %v4297_v57 = vld [vmem:[#allocation5 + $0x328] sm:$0xf0] }
  0x3e   :  { %v4164_v16 = vor.u32 %v5757_v3, %v4161_v4  ;;  %v5782_v3 = vld [vmem:[#allocation5 + $0x2cc] sm:$0xf] }
  0x3f   :  { %v4265_v4 = vld [vmem:[#allocation5 + $0x2e8] sm:$0xf0] }
  0x8d   :  { %v122_v39 = vpop.permute.xlu0 %121 }
  0x8e   :  { %vm123_vm1 = vcmp.eq.s32.totalorder %v122_v39, %v119_v36  ;;  %v5713_v36 = vld [vmem:[#allocation5 + $0x9c] sm:$0xf0] }
  0x8f   :  { %v3860_v47 = vsel %vm123_vm1, 1.0, %v6307_v46  ;;  %v4223_v39 = vld [vmem:[#allocation5 + $0x280] sm:$0xf]  ;;  %v3968_v45 = vor.u32 %v5713_v36, %v3967_v35  ;;  %v4071_v35 = vld [vmem:[#allocation5 + $0x148] sm:$0xf] }
  0x90   :  { %v6397_v48 = vpack.c.bf16 %v3860_v47, %v3860_v47  ;;  %v4224_v46 = vor.u32 %v5777_v40, %v4223_v39  ;;  %v3935_v47 = vld [vmem:[#allocation5 + $0x40] sm:$0xf]  ;;  %v5738_v36 = vld [vmem:[#allocation5 + $0x164] sm:$0xf0] }
  0x91   :  { %v4327_v39 = vld [vmem:[#allocation5 + $0x348] sm:$0xf] }
  0x92   :  { %3893 = vmatmul.msk.bf16.vlgmr.msra.gmra.mxu0 %vm299_vm2, %v6397_v48  ;;  %3894 = vmatmul.msk.bf16.vlgmr.msra.gmra.mxu1 %vm299_vm2, %v6397_v48  ;;  %v5802_v40 = vld [vmem:[#allocation5 + $0x364] sm:$0xf0] }
  0x93   :  { %3895 = vmatmul.msk.bf16.vlgmr.msra.gmra.mxu2 %vm299_vm2, %v6397_v48  ;;  %3896 = vmatmul.msk.bf16.vlgmr.msra.gmra.mxu3 %vm299_vm2, %v6397_v48 }
  0x94   :  { %1072 = vmatpush.bf16.msra.mxu0 %v4128_v49  ;;  %1085 = vmatpush.bf16.msra.mxu1 %v4384_v50  ;;  %v5705_v49 = vld [vmem:[#allocation5 + $0x5c] sm:$0xf0]  ;;  %v3972_v50 = vor.u32 %v5709_v41, %v3969_v42  ;;  %v5734_v41 = vld [vmem:[#allocation5 + $0x14c] sm:$0xf] }
  0x95   :  { %1098 = vmatpush.bf16.msra.mxu2 %v4132_v53  ;;  %1111 = vmatpush.bf16.msra.mxu3 %v4388_v54  ;;  %v5769_v53 = vld [vmem:[#allocation5 + $0x25c] sm:$0xf0]  ;;  %v5701_v54 = vld [vmem:[#allocation5 + $0x44] sm:$0xf]  ;;  %v4073_v42 = vld [vmem:[#allocation5 + $0x168] sm:$0xf0] }
  0x96   :  { %v4192_v59 = vor.u32 %v5769_v53, %v4191_v52  ;;  %v3940_v63 = vor.u32 %v5701_v54, %v3937_v55  ;;  %v4295_v52 = vld [vmem:[#allocation5 + $0x308] sm:$0xf]  ;;  %v5726_v54 = vld [vmem:[#allocation5 + $0x10c] sm:$0xf] }
  0x97   :  { %v5794_v53 = vld [vmem:[#allocation5 + $0x324] sm:$0xf0]  ;;  %v4041_v55 = vld [vmem:[#allocation5 + $0x128] sm:$0xf0] }
  0x98   :  { %1073 = vmatpush.bf16.msra.mxu0 %v4096_v61  ;;  %1086 = vmatpush.bf16.msra.mxu1 %v4352_v62  ;;  %v4159_v61 = vld [vmem:[#allocation5 + $0x200] sm:$0xf] }
  0x99   :  { %1099 = vmatpush.bf16.msra.mxu2 %v4100_v1  ;;  %1112 = vmatpush.bf16.msra.mxu3 %v4356_v2  ;;  %v5761_v62 = vld [vmem:[#allocation5 + $0x21c] sm:$0xf0]  ;;  %v5693_v1 = vld [vmem:[#allocation5 + $0x4] sm:$0xf] }
  0x9a   :  { %v3905_v2 = vld [vmem:[#allocation5 + $0x20] sm:$0xf0]  ;;  %v4160_v11 = vor.u32 %v5761_v62, %v4159_v61  ;;  %v4044_v61 = vor.u32 %v5726_v54, %v4041_v55  ;;  %v4300_v62 = vor.u32 %v5790_v56, %v4297_v57 }
  0x9b   :  { %v3908_v15 = vor.u32 %v5693_v1, %v3905_v2  ;;  %v5718_v1 = vld [vmem:[#allocation5 + $0xcc] sm:$0xf] }
  0x9c   :  { %1074 = vmatpush.bf16.msra.mxu0 %v4064_v9  ;;  %1087 = vmatpush.bf16.msra.mxu1 %v4320_v10  ;;  %v5750_v9 = vld [vmem:[#allocation5 + $0x1cc] sm:$0xf]  ;;  %v3904_v10 = vor.u32 %v5697_v60, %v3903_v58  ;;  %v5722_v60 = vld [vmem:[#allocation5 + $0xe4] sm:$0xf0] }
  0x9d   :  { %1100 = vmatpush.bf16.msra.mxu2 %v4068_v13  ;;  %1113 = vmatpush.bf16.msra.mxu3 %v4324_v14  ;;  %v5814_v13 = vld [vmem:[#allocation5 + $0x3cc] sm:$0xf]  ;;  %v4140_v23 = vor.u32 %v5750_v9, %v4137_v12  ;;  %v5778_v12 = vld [vmem:[#allocation5 + $0x2a4] sm:$0xf0] }
  0x9e   :  { %v4393_v14 = vld [vmem:[#allocation5 + $0x3e8] sm:$0xf0] }
  0x9f   :  { %v4396_v24 = vor.u32 %v5814_v13, %v4393_v14  ;;  %v4009_v2 = vld [vmem:[#allocation5 + $0xe8] sm:$0xf0] }
  0xa0   :  { %1075 = vmatpush.bf16.msra.mxu0 %v4032_v21  ;;  %1088 = vmatpush.bf16.msra.mxu1 %v4288_v22  ;;  %v5746_v21 = vld [vmem:[#allocation5 + $0x1a4] sm:$0xf0]  ;;  %v128_v22 = vld [vmem:[#allocation3 + $0x8] sm:$0xff]  ;;  %v4012_v9 = vor.u32 %v5718_v1, %v4009_v2  ;;  %v5710_v13 = vld [vmem:[#allocation5 + $0x8c] sm:$0xf] }
  0xa1   :  { %1101 = vmatpush.bf16.msra.mxu2 %v4036_v25  ;;  %1114 = vmatpush.bf16.msra.mxu3 %v4292_v26  ;;  %v4359_v25 = vld [vmem:[#allocation5 + $0x388] sm:$0xf]  ;;  %v6417_v32 = vpack.c.bf16 %v128_v22, %v128_v22  ;;  %v3977_v14 = vld [vmem:[#allocation5 + $0xa8] sm:$0xf0]  ;;  %v5807_v1 = vld [vmem:[#allocation5 + $0x394] sm:$0xf] }
  0xa2   :  { %3897 = vmatmul.msk.bf16.vlgmr.msrb.gmra.mxu0 %vm299_vm2, %v6397_v48  ;;  %3898 = vmatmul.msk.bf16.vlgmr.msrb.gmra.mxu1 %vm299_vm2, %v6397_v48  ;;  %v5810_v26 = vld [vmem:[#allocation5 + $0x3a4] sm:$0xf0]  ;;  %v4369_v2 = vld [vmem:[#allocation5 + $0x3b0] sm:$0xf0] }
  0xa3   :  { %3899 = vmatmul.msk.bf16.vlgmr.msrb.gmra.mxu2 %vm299_vm2, %v6397_v48  ;;  %3900 = vmatmul.msk.bf16.vlgmr.msrb.gmra.mxu3 %vm299_vm2, %v6397_v48  ;;  %v3936_v48 = vor.u32 %v5705_v49, %v3935_v47  ;;  %v4039_v47 = vld [vmem:[#allocation5 + $0x108] sm:$0xf]  ;;  %v4372_v8 = vor.u32 %v5807_v1, %v4369_v2  ;;  %v3919_v1 = vld [vmem:[#allocation5 + $0x10] sm:$0xf] }
  0xa4   :  { %1076 = vmatpush.bf16.msra.mxu0 %v4000_v33  ;;  %1089 = vmatpush.bf16.msra.mxu1 %v4256_v34  ;;  %v4104_v33 = vor.u32 %v5746_v21, %v4103_v20  ;;  %v4360_v34 = vor.u32 %v5810_v26, %v4359_v25  ;;  %v5730_v49 = vld [vmem:[#allocation5 + $0x124] sm:$0xf0]  ;;  %v3980_v21 = vor.u32 %v5710_v13, %v3977_v14  ;;  %v5702_v25 = vld [vmem:[#allocation5 + $0x4c] sm:$0xf]  ;;  %v5799_v13 = vld [vmem:[#allocation5 + $0x354] sm:$0xf] }
  0xa5   :  { %1102 = vmatpush.bf16.msra.mxu2 %v4004_v37  ;;  %1115 = vmatpush.bf16.msra.mxu3 %v4260_v38  ;;  %v4108_v37 = vor.u32 %v5742_v27, %v4105_v29  ;;  %v4364_v38 = vor.u32 %v5806_v30, %v4361_v31  ;;  %v4040_v58 = vor.u32 %v5730_v49, %v4039_v47  ;;  %v5706_v20 = vld [vmem:[#allocation5 + $0x64] sm:$0xf0]  ;;  %v3945_v26 = vld [vmem:[#allocation5 + $0x68] sm:$0xf0]  ;;  %v5751_v47 = vld [vmem:[#allocation5 + $0x1d4] sm:$0xf] }
  0xa6   :  { %v5766_v27 = vld [vmem:[#allocation5 + $0x24c] sm:$0xf]  ;;  %v3911_v30 = vld [vmem:[#allocation5 + $0x8] sm:$0xf]  ;;  %v4337_v14 = vld [vmem:[#allocation5 + $0x370] sm:$0xf0] }
  0xa7   :  { %v4201_v29 = vld [vmem:[#allocation5 + $0x268] sm:$0xf0] }
  0xa8   :  { %1077 = vmatpush.bf16.msra.mxu0 %v3968_v45  ;;  %1090 = vmatpush.bf16.msra.mxu1 %v4224_v46  ;;  %v4072_v45 = vor.u32 %v5738_v36, %v4071_v35  ;;  %v4328_v46 = vor.u32 %v5802_v40, %v4327_v39  ;;  %v4167_v35 = vld [vmem:[#allocation5 + $0x208] sm:$0xf]  ;;  %v5694_v39 = vld [vmem:[#allocation5 + $0xc] sm:$0xf] }
  0xa9   :  { %1103 = vmatpush.bf16.msra.mxu2 %v3972_v50  ;;  %1116 = vmatpush.bf16.msra.mxu3 %v4228_v51  ;;  %v4076_v50 = vor.u32 %v5734_v41, %v4073_v42  ;;  %v4332_v51 = vor.u32 %v5798_v43, %v4329_v44  ;;  %v5762_v36 = vld [vmem:[#allocation5 + $0x224] sm:$0xf0]  ;;  %v3913_v40 = vld [vmem:[#allocation5 + $0x28] sm:$0xf0]  ;;  %v4143_v43 = vld [vmem:[#allocation5 + $0x1d0] sm:$0xf] }
  0xaa   :  { %v5758_v41 = vld [vmem:[#allocation5 + $0x20c] sm:$0xf]  ;;  %v5755_v44 = vld [vmem:[#allocation5 + $0x1ec] sm:$0xf0]  ;;  %v3916_v54 = vor.u32 %v5694_v39, %v3913_v40  ;;  %v5783_v39 = vld [vmem:[#allocation5 + $0x2d4] sm:$0xf] }
  0xab   :  { %v4169_v42 = vld [vmem:[#allocation5 + $0x228] sm:$0xf0]  ;;  %v4144_v56 = vor.u32 %v5755_v44, %v4143_v43  ;;  %v4273_v40 = vld [vmem:[#allocation5 + $0x2f0] sm:$0xf0]  ;;  %v3983_v43 = vld [vmem:[#allocation5 + $0x90] sm:$0xf] }
  0xac   :  { %1078 = vmatpush.bf16.msra.mxu0 %v3936_v48  ;;  %1091 = vmatpush.bf16.msra.mxu1 %v4192_v59  ;;  %v4296_v48 = vor.u32 %v5794_v53, %v4295_v52  ;;  %v4007_v59 = vld [vmem:[#allocation5 + $0xc8] sm:$0xf]  ;;  %v5815_v52 = vld [vmem:[#allocation5 + $0x3d4] sm:$0xf]  ;;  %v4172_v55 = vor.u32 %v5758_v41, %v4169_v42  ;;  %v5715_v44 = vld [vmem:[#allocation5 + $0xac] sm:$0xf0] }
  0xad   :  { %1104 = vmatpush.bf16.msra.mxu2 %v3940_v63  ;;  %1117 = vmatpush.bf16.msra.mxu3 %v4196_v0  ;;  %v4263_v63 = vld [vmem:[#allocation5 + $0x2c8] sm:$0xf]  ;;  %v4008_v5 = vor.u32 %v5722_v60, %v4007_v59  ;;  %v4401_v53 = vld [vmem:[#allocation5 + $0x3f0] sm:$0xf0] }
  0xae   :  { %v5786_v0 = vld [vmem:[#allocation5 + $0x2e4] sm:$0xf0]  ;;  %v4404_v60 = vor.u32 %v5815_v52, %v4401_v53  ;;  %v5775_v52 = vld [vmem:[#allocation5 + $0x294] sm:$0xf] }
  0xaf   :  { %v4264_v6 = vor.u32 %v5786_v0, %v4263_v63  ;;  %v5743_v63 = vld [vmem:[#allocation5 + $0x194] sm:$0xf] }
  0xb0   :  { %1079 = vmatpush.bf16.msra.mxu0 %v3904_v10  ;;  %1092 = vmatpush.bf16.msra.mxu1 %v4160_v11  ;;  %v4268_v10 = vor.u32 %v5782_v3, %v4265_v4  ;;  %v4231_v11 = vld [vmem:[#allocation5 + $0x288] sm:$0xf]  ;;  %v4113_v0 = vld [vmem:[#allocation5 + $0x1b0] sm:$0xf0] }
  0xb1   :  { %1105 = vmatpush.bf16.msra.mxu2 %v3908_v15  ;;  %1118 = vmatpush.bf16.msra.mxu3 %v4164_v16  ;;  %v5774_v15 = vld [vmem:[#allocation5 + $0x28c] sm:$0xf]  ;;  %v4116_v7 = vor.u32 %v5743_v63, %v4113_v0  ;;  %v4241_v53 = vld [vmem:[#allocation5 + $0x2b0] sm:$0xf0] }
  0xb2   :  { %v4233_v16 = vld [vmem:[#allocation5 + $0x2a8] sm:$0xf0]  ;;  %v5767_v63 = vld [vmem:[#allocation5 + $0x254] sm:$0xf] }
  0xb3   :  { %1080 = vmatmul.bf16.vlgmr.msra.gmra.mxu0 %v6415_v28  ;;  %1093 = vmatmul.bf16.vlgmr.msra.gmra.mxu1 %v6417_v32  ;;  %v4236_v22 = vor.u32 %v5774_v15, %v4233_v16  ;;  %v4209_v0 = vld [vmem:[#allocation5 + $0x270] sm:$0xf0] }
  0xb4   :  { %1124 = vmatpush.bf16.msrb.mxu0 %v4136_v18  ;;  %1137 = vmatpush.bf16.msrb.mxu1 %v4392_v19  ;;  %v4232_v18 = vor.u32 %v5778_v12, %v4231_v11  ;;  %v3943_v19 = vld [vmem:[#allocation5 + $0x48] sm:$0xf]  ;;  %v5735_v11 = vld [vmem:[#allocation5 + $0x154] sm:$0xf] }
  0xb5   :  { %1150 = vmatpush.bf16.msrb.mxu2 %v4140_v23  ;;  %1163 = vmatpush.bf16.msrb.mxu3 %v4396_v24  ;;  %v4199_v23 = vld [vmem:[#allocation5 + $0x248] sm:$0xf]  ;;  %v3944_v31 = vor.u32 %v5706_v20, %v3943_v19  ;;  %v4081_v12 = vld [vmem:[#allocation5 + $0x170] sm:$0xf0]  ;;  %v4340_v20 = vor.u32 %v5799_v13, %v4337_v14  ;;  %v4151_v13 = vld [vmem:[#allocation5 + $0x1d8] sm:$0xf] }
  0xb6   :  { %1106 = vmatmul.bf16.vlgmr.msra.gmra.mxu2 %v6415_v28  ;;  %1119 = vmatmul.bf16.vlgmr.msra.gmra.mxu3 %v6417_v32  ;;  %v5770_v24 = vld [vmem:[#allocation5 + $0x264] sm:$0xf0]  ;;  %v4084_v19 = vor.u32 %v5735_v11, %v4081_v12  ;;  %v5759_v11 = vld [vmem:[#allocation5 + $0x214] sm:$0xf]  ;;  %v5756_v14 = vld [vmem:[#allocation5 + $0x1f4] sm:$0xf0] }
  0xb7   :  { %v4177_v12 = vld [vmem:[#allocation5 + $0x230] sm:$0xf0] }
  0xb8   :  { %1125 = vmatpush.bf16.msrb.mxu0 %v4104_v33  ;;  %1138 = vmatpush.bf16.msrb.mxu1 %v4360_v34  ;;  %v4200_v33 = vor.u32 %v5770_v24, %v4199_v23  ;;  %v5698_v34 = vld [vmem:[#allocation5 + $0x24] sm:$0xf0]  ;;  %v5727_v23 = vld [vmem:[#allocation5 + $0x114] sm:$0xf] }
  0xb9   :  { %1151 = vmatpush.bf16.msrb.mxu2 %v4108_v37  ;;  %1164 = vmatpush.bf16.msrb.mxu3 %v4364_v38  ;;  %v3948_v37 = vor.u32 %v5702_v25, %v3945_v26  ;;  %v4204_v38 = vor.u32 %v5766_v27, %v4201_v29  ;;  %v3912_v49 = vor.u32 %v5698_v34, %v3911_v30  ;;  %v4049_v24 = vld [vmem:[#allocation5 + $0x130] sm:$0xf0]  ;;  %v4015_v30 = vld [vmem:[#allocation5 + $0xd0] sm:$0xf] }
  0xba   :  { %v5791_v25 = vld [vmem:[#allocation5 + $0x314] sm:$0xf] }
  0xbb   :  { %v4305_v26 = vld [vmem:[#allocation5 + $0x330] sm:$0xf0] }
  0xbc   :  { %1126 = vmatpush.bf16.msrb.mxu0 %v4072_v45  ;;  %1139 = vmatpush.bf16.msrb.mxu1 %v4328_v46  ;;  %v4399_v45 = vld [vmem:[#allocation5 + $0x3d0] sm:$0xf]  ;;  %v4308_v34 = vor.u32 %v5791_v25, %v4305_v26  ;;  %v4152_v25 = vor.u32 %v5756_v14, %v4151_v13  ;;  %v3991_v13 = vld [vmem:[#allocation5 + $0x98] sm:$0xf] }
  0xbd   :  { %1152 = vmatpush.bf16.msrb.mxu2 %v4076_v50  ;;  %1165 = vmatpush.bf16.msrb.mxu3 %v4332_v51  ;;  %v5819_v46 = vld [vmem:[#allocation5 + $0x3ec] sm:$0xf0]  ;;  %v4168_v50 = vor.u32 %v5762_v36, %v4167_v35  ;;  %v4145_v51 = vld [vmem:[#allocation5 + $0x1f0] sm:$0xf0]  ;;  %v5716_v14 = vld [vmem:[#allocation5 + $0xb4] sm:$0xf0] }
  0xbe   :  { %v4400_v57 = vor.u32 %v5819_v46, %v4399_v45  ;;  %v4148_v59 = vor.u32 %v5751_v47, %v4145_v51  ;;  %v4271_v35 = vld [vmem:[#allocation5 + $0x2d0] sm:$0xf]  ;;  %v4276_v46 = vor.u32 %v5783_v39, %v4273_v40  ;;  %v3985_v51 = vld [vmem:[#allocation5 + $0xb0] sm:$0xf0] }
  0xbf   :  { %v5787_v36 = vld [vmem:[#allocation5 + $0x2ec] sm:$0xf0] }
  0xc0   :  { %1127 = vmatpush.bf16.msrb.mxu0 %v4040_v58  ;;  %1140 = vmatpush.bf16.msrb.mxu1 %v4296_v48  ;;  %v4111_v58 = vld [vmem:[#allocation5 + $0x190] sm:$0xf]  ;;  %v4272_v42 = vor.u32 %v5787_v36, %v4271_v35  ;;  %v5744_v35 = vld [vmem:[#allocation5 + $0x19c] sm:$0xf] }
  0xc1   :  { %1153 = vmatpush.bf16.msrb.mxu2 %v4044_v61  ;;  %1166 = vmatpush.bf16.msrb.mxu3 %v4300_v62  ;;  %v5747_v48 = vld [vmem:[#allocation5 + $0x1ac] sm:$0xf0]  ;;  %v4121_v36 = vld [vmem:[#allocation5 + $0x1b8] sm:$0xf0] }
  0xc2   :  { %v4367_v61 = vld [vmem:[#allocation5 + $0x390] sm:$0xf]  ;;  %v4112_v3 = vor.u32 %v5747_v48, %v4111_v58  ;;  %v4244_v48 = vor.u32 %v5775_v52, %v4241_v53 }
  0xc3   :  { %v5811_v62 = vld [vmem:[#allocation5 + $0x3ac] sm:$0xf0] }
  0xc4   :  { %1128 = vmatpush.bf16.msrb.mxu0 %v4008_v5  ;;  %1141 = vmatpush.bf16.msrb.mxu1 %v4264_v6  ;;  %v4368_v4 = vor.u32 %v5811_v62, %v4367_v61  ;;  %v4079_v5 = vld [vmem:[#allocation5 + $0x150] sm:$0xf]  ;;  %v5703_v61 = vld [vmem:[#allocation5 + $0x54] sm:$0xf] }
  0xc5   :  { %1154 = vmatpush.bf16.msrb.mxu2 %v4012_v9  ;;  %1167 = vmatpush.bf16.msrb.mxu3 %v4268_v10  ;;  %v5739_v6 = vld [vmem:[#allocation5 + $0x16c] sm:$0xf0]  ;;  %v3953_v62 = vld [vmem:[#allocation5 + $0x70] sm:$0xf0] }
  0xc6   :  { %v4335_v9 = vld [vmem:[#allocation5 + $0x350] sm:$0xf]  ;;  %v4080_v15 = vor.u32 %v5739_v6, %v4079_v5 }
  0xc7   :  { %v5803_v10 = vld [vmem:[#allocation5 + $0x36c] sm:$0xf0] }
  0xc8   :  { %1129 = vmatpush.bf16.msrb.mxu0 %v3976_v17  ;;  %1142 = vmatpush.bf16.msrb.mxu1 %v4232_v18  ;;  %v4336_v16 = vor.u32 %v5803_v10, %v4335_v9  ;;  %v4047_v17 = vld [vmem:[#allocation5 + $0x110] sm:$0xf]  ;;  %v5695_v9 = vld [vmem:[#allocation5 + $0x14] sm:$0xf] }
  0xc9   :  { %1155 = vmatpush.bf16.msrb.mxu2 %v3980_v21  ;;  %1168 = vmatpush.bf16.msrb.mxu3 %v4236_v22  ;;  %v5731_v18 = vld [vmem:[#allocation5 + $0x12c] sm:$0xf0]  ;;  %v3921_v10 = vld [vmem:[#allocation5 + $0x30] sm:$0xf0] }
  0xca   :  { %v4303_v21 = vld [vmem:[#allocation5 + $0x310] sm:$0xf]  ;;  %v4048_v27 = vor.u32 %v5731_v18, %v4047_v17  ;;  %v5752_v17 = vld [vmem:[#allocation5 + $0x1dc] sm:$0xf] }
  0xcb   :  { %v5795_v22 = vld [vmem:[#allocation5 + $0x32c] sm:$0xf0] }
  0xcc   :  { %1130 = vmatpush.bf16.msrb.mxu0 %v3944_v31  ;;  %1143 = vmatpush.bf16.msrb.mxu1 %v4200_v33  ;;  %v4304_v29 = vor.u32 %v5795_v22, %v4303_v21  ;;  %v5723_v31 = vld [vmem:[#allocation5 + $0xec] sm:$0xf0]  ;;  %v4052_v33 = vor.u32 %v5727_v23, %v4049_v24  ;;  %v5816_v21 = vld [vmem:[#allocation5 + $0x3dc] sm:$0xf]  ;;  %v3924_v23 = vor.u32 %v5695_v9, %v3921_v10 }
  0xcd   :  { %1156 = vmatpush.bf16.msrb.mxu2 %v3948_v37  ;;  %1169 = vmatpush.bf16.msrb.mxu3 %v4204_v38  ;;  %v5719_v37 = vld [vmem:[#allocation5 + $0xd4] sm:$0xf]  ;;  %v4016_v41 = vor.u32 %v5723_v31, %v4015_v30  ;;  %v4239_v47 = vld [vmem:[#allocation5 + $0x290] sm:$0xf]  ;;  %v4409_v22 = vld [vmem:[#allocation5 + $0x3f8] sm:$0xf0]  ;;  %v4180_v24 = vor.u32 %v5759_v11, %v4177_v12 }
  0xce   :  { %v4017_v38 = vld [vmem:[#allocation5 + $0xf0] sm:$0xf0]  ;;  %v4175_v5 = vld [vmem:[#allocation5 + $0x210] sm:$0xf]  ;;  %v4412_v31 = vor.u32 %v5816_v21, %v4409_v22  ;;  %v5784_v9 = vld [vmem:[#allocation5 + $0x2dc] sm:$0xf] }
  0xcf   :  { %v4020_v45 = vor.u32 %v5719_v37, %v4017_v38  ;;  %v5763_v6 = vld [vmem:[#allocation5 + $0x22c] sm:$0xf0]  ;;  %v5808_v37 = vld [vmem:[#allocation5 + $0x39c] sm:$0xf] }
  0xd0   :  { %1131 = vmatpush.bf16.msrb.mxu0 %v3912_v49  ;;  %1144 = vmatpush.bf16.msrb.mxu1 %v4168_v50  ;;  %v5779_v49 = vld [vmem:[#allocation5 + $0x2ac] sm:$0xf0]  ;;  %v5711_v50 = vld [vmem:[#allocation5 + $0x94] sm:$0xf]  ;;  %v4377_v38 = vld [vmem:[#allocation5 + $0x3b8] sm:$0xf0] }
  0xd1   :  { %1157 = vmatpush.bf16.msrb.mxu2 %v3916_v54  ;;  %1170 = vmatpush.bf16.msrb.mxu3 %v4172_v55  ;;  %v3984_v54 = vor.u32 %v5715_v44, %v3983_v43  ;;  %v4240_v55 = vor.u32 %v5779_v49, %v4239_v47  ;;  %v3988_v58 = vor.u32 %v5711_v50, %v3985_v51  ;;  %v5736_v47 = vld [vmem:[#allocation5 + $0x15c] sm:$0xf] }
  0xd2   :  { %v4124_v43 = vor.u32 %v5744_v35, %v4121_v36  ;;  %v4380_v44 = vor.u32 %v5808_v37, %v4377_v38  ;;  %v4089_v49 = vld [vmem:[#allocation5 + $0x178] sm:$0xf0] }
  0xd3   :  { %1132 = vmatmul.bf16.vlgmr.msrb.gmra.mxu0 %v6415_v28  ;;  %1145 = vmatmul.bf16.vlgmr.msrb.gmra.mxu1 %v6417_v32  ;;  %v5800_v50 = vld [vmem:[#allocation5 + $0x35c] sm:$0xf] }
  0xd4   :  { %1176 = vmatpush.bf16.msra.mxu0 %v4144_v56  ;;  %1189 = vmatpush.bf16.msra.mxu1 %v4400_v57  ;;  %v3951_v56 = vld [vmem:[#allocation5 + $0x50] sm:$0xf]  ;;  %v4345_v51 = vld [vmem:[#allocation5 + $0x378] sm:$0xf0] }
  0xd5   :  { %1202 = vmatpush.bf16.msra.mxu2 %v4148_v59  ;;  %1215 = vmatpush.bf16.msra.mxu3 %v4404_v60  ;;  %v5707_v57 = vld [vmem:[#allocation5 + $0x6c] sm:$0xf0]  ;;  %v4281_v10 = vld [vmem:[#allocation5 + $0x2f8] sm:$0xf0] }
  0xd6   :  { %1158 = vmatmul.bf16.vlgmr.msrb.gmra.mxu2 %v6415_v28  ;;  %1171 = vmatmul.bf16.vlgmr.msrb.gmra.mxu3 %v6417_v32  ;;  %v4207_v59 = vld [vmem:[#allocation5 + $0x250] sm:$0xf]  ;;  %v3952_v2 = vor.u32 %v5707_v57, %v3951_v56  ;;  %v4092_v56 = vor.u32 %v5736_v47, %v4089_v49  ;;  %v4348_v57 = vor.u32 %v5800_v50, %v4345_v51  ;;  %v5776_v21 = vld [vmem:[#allocation5 + $0x29c] sm:$0xf]  ;;  %v4527_v50 = vld [vmem:[#allocation8 + $0xe0] sm:$0xf] }
  0xd7   :  { %v5771_v60 = vld [vmem:[#allocation5 + $0x26c] sm:$0xf0]  ;;  %v4249_v22 = vld [vmem:[#allocation5 + $0x2b8] sm:$0xf0] }
  0xd8   :  { %1177 = vmatpush.bf16.msra.mxu0 %v4112_v3  ;;  %1190 = vmatpush.bf16.msra.mxu1 %v4368_v4  ;;  %v4208_v3 = vor.u32 %v5771_v60, %v4207_v59  ;;  %v5699_v4 = vld [vmem:[#allocation5 + $0x2c] sm:$0xf0]  ;;  %v5728_v59 = vld [vmem:[#allocation5 + $0x11c] sm:$0xf] }
  0xd9   :  { %1203 = vmatpush.bf16.msra.mxu2 %v4116_v7  ;;  %1216 = vmatpush.bf16.msra.mxu3 %v4372_v8  ;;  %v3956_v7 = vor.u32 %v5703_v61, %v3953_v62  ;;  %v4212_v8 = vor.u32 %v5767_v63, %v4209_v0  ;;  %v3920_v18 = vor.u32 %v5699_v4, %v3919_v1  ;;  %v4057_v60 = vld [vmem:[#allocation5 + $0x138] sm:$0xf0]  ;;  %v4023_v1 = vld [vmem:[#allocation5 + $0xd8] sm:$0xf]  ;;  %v5859_v51 = vld [vmem:[#allocation8 + $0xec] sm:$0xf0] }
  0xda   :  { %v5792_v61 = vld [vmem:[#allocation5 + $0x31c] sm:$0xf] }
  0xdb   :  { %v4313_v62 = vld [vmem:[#allocation5 + $0x338] sm:$0xf0] }
  0xdc   :  { %1178 = vmatpush.bf16.msra.mxu0 %v4080_v15  ;;  %1191 = vmatpush.bf16.msra.mxu1 %v4336_v16  ;;  %v4407_v15 = vld [vmem:[#allocation5 + $0x3d8] sm:$0xf]  ;;  %v4316_v4 = vor.u32 %v5792_v61, %v4313_v62  ;;  %v5768_v35 = vld [vmem:[#allocation5 + $0x25c] sm:$0xf]  ;;  %v4639_v61 = vld [vmem:[#allocation8 + $0x1c0] sm:$0xf] }
  0xdd   :  { %1204 = vmatpush.bf16.msra.mxu2 %v4084_v19  ;;  %1217 = vmatpush.bf16.msra.mxu3 %v4340_v20  ;;  %v5820_v16 = vld [vmem:[#allocation5 + $0x3f4] sm:$0xf0]  ;;  %v4176_v19 = vor.u32 %v5763_v6, %v4175_v5  ;;  %v4153_v20 = vld [vmem:[#allocation5 + $0x1f8] sm:$0xf0]  ;;  %v5887_v62 = vld [vmem:[#allocation8 + $0x1cc] sm:$0xf0] }
  0xde   :  { %v4408_v26 = vor.u32 %v5820_v16, %v4407_v15  ;;  %v4156_v30 = vor.u32 %v5752_v17, %v4153_v20  ;;  %v4279_v5 = vld [vmem:[#allocation5 + $0x2d8] sm:$0xf]  ;;  %v4284_v16 = vor.u32 %v5784_v9, %v4281_v10  ;;  %v3993_v20 = vld [vmem:[#allocation5 + $0xb8] sm:$0xf0]  ;;  %v5847_v10 = vld [vmem:[#allocation8 + $0x8c] sm:$0xf0] }
  0xdf   :  { %v5788_v6 = vld [vmem:[#allocation5 + $0x2f4] sm:$0xf0]  ;;  %v4217_v36 = vld [vmem:[#allocation5 + $0x278] sm:$0xf0] }
  0xe0   :  { %1179 = vmatpush.bf16.msra.mxu0 %v4048_v27  ;;  %1192 = vmatpush.bf16.msra.mxu1 %v4304_v29  ;;  %v4119_v27 = vld [vmem:[#allocation5 + $0x198] sm:$0xf]  ;;  %v4280_v12 = vor.u32 %v5788_v6, %v4279_v5  ;;  %v5760_v47 = vld [vmem:[#allocation5 + $0x21c] sm:$0xf] }
  0xe1   :  { %1205 = vmatpush.bf16.msra.mxu2 %v4052_v33  ;;  %1218 = vmatpush.bf16.msra.mxu3 %v4308_v34  ;;  %v5748_v29 = vld [vmem:[#allocation5 + $0x1b4] sm:$0xf0]  ;;  %v4185_v49 = vld [vmem:[#allocation5 + $0x238] sm:$0xf0] }
  0xe2   :  { %v4375_v33 = vld [vmem:[#allocation5 + $0x398] sm:$0xf]  ;;  %v4120_v39 = vor.u32 %v5748_v29, %v4119_v27  ;;  %v4252_v29 = vor.u32 %v5776_v21, %v4249_v22  ;;  %v4447_v22 = vld [vmem:[#allocation8 + $0x40] sm:$0xf] }
  0xe3   :  { %v5812_v34 = vld [vmem:[#allocation5 + $0x3b4] sm:$0xf0] }
  0xe4   :  { %1180 = vmatpush.bf16.msra.mxu0 %v4016_v41  ;;  %1193 = vmatpush.bf16.msra.mxu1 %v4272_v42  ;;  %v4376_v40 = vor.u32 %v5812_v34, %v4375_v33  ;;  %v4087_v41 = vld [vmem:[#allocation5 + $0x158] sm:$0xf]  ;;  %v5704_v33 = vld [vmem:[#allocation5 + $0x5c] sm:$0xf] }
  0xe5   :  { %1206 = vmatpush.bf16.msra.mxu2 %v4020_v45  ;;  %1219 = vmatpush.bf16.msra.mxu3 %v4276_v46  ;;  %v5740_v42 = vld [vmem:[#allocation5 + $0x174] sm:$0xf0]  ;;  %v3961_v34 = vld [vmem:[#allocation5 + $0x78] sm:$0xf0] }
  0xe6   :  { %v4343_v45 = vld [vmem:[#allocation5 + $0x358] sm:$0xf]  ;;  %v4088_v52 = vor.u32 %v5740_v42, %v4087_v41  ;;  %v3964_v42 = vor.u32 %v5704_v33, %v3961_v34  ;;  %v5923_v33 = vld [vmem:[#allocation8 + $0x2ec] sm:$0xf0] }
  0xe7   :  { %v5804_v46 = vld [vmem:[#allocation5 + $0x374] sm:$0xf0]  ;;  %v5835_v34 = vld [vmem:[#allocation8 + $0x2c] sm:$0xf0] }
  0xe8   :  { %1181 = vmatpush.bf16.msra.mxu0 %v3984_v54  ;;  %1194 = vmatpush.bf16.msra.mxu1 %v4240_v55  ;;  %v4344_v53 = vor.u32 %v5804_v46, %v4343_v45  ;;  %v4055_v54 = vld [vmem:[#allocation5 + $0x118] sm:$0xf]  ;;  %v5696_v45 = vld [vmem:[#allocation5 + $0x1c] sm:$0xf] }
  0xe9   :  { %1207 = vmatpush.bf16.msra.mxu2 %v3988_v58  ;;  %1220 = vmatpush.bf16.msra.mxu3 %v4244_v48  ;;  %v5732_v55 = vld [vmem:[#allocation5 + $0x134] sm:$0xf0]  ;;  %v3929_v46 = vld [vmem:[#allocation5 + $0x38] sm:$0xf0] }
  0xea   :  { %v4311_v58 = vld [vmem:[#allocation5 + $0x318] sm:$0xf]  ;;  %v4056_v63 = vor.u32 %v5732_v55, %v4055_v54 }
  0xeb   :  { %v5796_v48 = vld [vmem:[#allocation5 + $0x334] sm:$0xf0] }
  0xec   :  { %1182 = vmatpush.bf16.msra.mxu0 %v3952_v2  ;;  %1195 = vmatpush.bf16.msra.mxu1 %v4208_v3  ;;  %v4312_v0 = vor.u32 %v5796_v48, %v4311_v58  ;;  %v5724_v2 = vld [vmem:[#allocation5 + $0xf4] sm:$0xf0]  ;;  %v4060_v3 = vor.u32 %v5728_v59, %v4057_v60  ;;  %v4528_v58 = vor.u32 %v5859_v51, %v4527_v50  ;;  %v4511_v48 = vld [vmem:[#allocation8 + $0xc0] sm:$0xf]  ;;  %v5855_v60 = vld [vmem:[#allocation8 + $0xcc] sm:$0xf0] }
  0xed   :  { %1208 = vmatpush.bf16.msra.mxu2 %v3956_v7  ;;  %1221 = vmatpush.bf16.msra.mxu3 %v4212_v8  ;;  %v5720_v7 = vld [vmem:[#allocation5 + $0xdc] sm:$0xf]  ;;  %v4024_v11 = vor.u32 %v5724_v2, %v4023_v1  ;;  %v4247_v17 = vld [vmem:[#allocation5 + $0x298] sm:$0xf]  ;;  %v4640_v1 = vor.u32 %v5887_v62, %v4639_v61  ;;  %v5851_v2 = vld [vmem:[#allocation8 + $0xac] sm:$0xf0] }
  0xee   :  { %v4025_v8 = vld [vmem:[#allocation5 + $0xf8] sm:$0xf0]  ;;  %v4183_v41 = vld [vmem:[#allocation5 + $0x218] sm:$0xf]  ;;  %v4543_v50 = vld [vmem:[#allocation8 + $0x100] sm:$0xf] }
  0xef   :  { %v4028_v15 = vor.u32 %v5720_v7, %v4025_v8  ;;  %v4479_v8 = vld [vmem:[#allocation8 + $0x80] sm:$0xf]  ;;  %v5863_v51 = vld [vmem:[#allocation8 + $0x10c] sm:$0xf0] }
  0xf0   :  { %1183 = vmatpush.bf16.msra.mxu0 %v3920_v18  ;;  %1196 = vmatpush.bf16.msra.mxu1 %v4176_v19  ;;  %v5780_v18 = vld [vmem:[#allocation5 + $0x2b4] sm:$0xf0]  ;;  %v5712_v19 = vld [vmem:[#allocation5 + $0x9c] sm:$0xf]  ;;  %v6019_v62 = vld [vmem:[#allocation8 + $0x5ec] sm:$0xf0] }
  0xf1   :  { %1209 = vmatpush.bf16.msra.mxu2 %v3924_v23  ;;  %1222 = vmatpush.bf16.msra.mxu3 %v4180_v24  ;;  %v3992_v23 = vor.u32 %v5716_v14, %v3991_v13  ;;  %v4248_v24 = vor.u32 %v5780_v18, %v4247_v17  ;;  %v3996_v27 = vor.u32 %v5712_v19, %v3993_v20  ;;  %v4463_v14 = vld [vmem:[#allocation8 + $0x60] sm:$0xf] }
  0xf2   :  { %v4480_v13 = vor.u32 %v5847_v10, %v4479_v8 }
  0xf3   :  { %1184 = vmatmul.bf16.vlgmr.msra.gmra.mxu0 %v6415_v28  ;;  %1197 = vmatmul.bf16.vlgmr.msra.gmra.mxu1 %v6417_v32 }
  0xf4   :  { %1228 = vmatpush.bf16.msrb.mxu0 %v4152_v25  ;;  %1241 = vmatpush.bf16.msrb.mxu1 %v4408_v26  ;;  %v3959_v25 = vld [vmem:[#allocation5 + $0x58] sm:$0xf] }
  0xf5   :  { %1254 = vmatpush.bf16.msrb.mxu2 %v4156_v30  ;;  %1267 = vmatpush.bf16.msrb.mxu3 %v4412_v31  ;;  %v5708_v26 = vld [vmem:[#allocation5 + $0x74] sm:$0xf0] }
  0xf6   :  { %1210 = vmatmul.bf16.vlgmr.msra.gmra.mxu2 %v6415_v28  ;;  %1223 = vmatmul.bf16.vlgmr.msra.gmra.mxu3 %v6417_v32  ;;  %v4215_v30 = vld [vmem:[#allocation5 + $0x258] sm:$0xf]  ;;  %v3960_v37 = vor.u32 %v5708_v26, %v3959_v25  ;;  %v4575_v25 = vld [vmem:[#allocation8 + $0x140] sm:$0xf]  ;;  %v5871_v26 = vld [vmem:[#allocation8 + $0x14c] sm:$0xf0] }
  0xf7   :  { %v5772_v31 = vld [vmem:[#allocation5 + $0x274] sm:$0xf0] }
  0xf8   :  { %1229 = vmatpush.bf16.msrb.mxu0 %v4120_v39  ;;  %1242 = vmatpush.bf16.msrb.mxu1 %v4376_v40  ;;  %v4216_v38 = vor.u32 %v5772_v31, %v4215_v30  ;;  %v3927_v39 = vld [vmem:[#allocation5 + $0x18] sm:$0xf]  ;;  %v4576_v30 = vor.u32 %v5871_v26, %v4575_v25  ;;  %v4783_v31 = vld [vmem:[#allocation8 + $0x2e0] sm:$0xf] }
  0xf9   :  { %1255 = vmatpush.bf16.msrb.mxu2 %v4124_v43  ;;  %1268 = vmatpush.bf16.msrb.mxu3 %v4380_v44  ;;  %v5700_v40 = vld [vmem:[#allocation5 + $0x34] sm:$0xf0]  ;;  %v4220_v43 = vor.u32 %v5768_v35, %v4217_v36  ;;  %v4784_v35 = vor.u32 %v5923_v33, %v4783_v31  ;;  %v4559_v36 = vld [vmem:[#allocation8 + $0x120] sm:$0xf]  ;;  %v5943_v31 = vld [vmem:[#allocation8 + $0x38c] sm:$0xf0] }
  0xfa   :  { %v5764_v44 = vld [vmem:[#allocation5 + $0x234] sm:$0xf0]  ;;  %v3928_v54 = vor.u32 %v5700_v40, %v3927_v39  ;;  %v5135_v26 = vld [vmem:[#allocation8 + $0x5a0] sm:$0xf] }
  0xfb   :  { %v4184_v55 = vor.u32 %v5764_v44, %v4183_v41 }
  0xfc   :  { %1230 = vmatpush.bf16.msrb.mxu0 %v4088_v52  ;;  %1243 = vmatpush.bf16.msrb.mxu1 %v4344_v53  ;;  %v4655_v52 = vld [vmem:[#allocation8 + $0x1e0] sm:$0xf]  ;;  %v5891_v53 = vld [vmem:[#allocation8 + $0x1ec] sm:$0xf0] }
  0xfd   :  { %1256 = vmatpush.bf16.msrb.mxu2 %v4092_v56  ;;  %1269 = vmatpush.bf16.msrb.mxu3 %v4348_v57  ;;  %v3932_v56 = vor.u32 %v5696_v45, %v3929_v46  ;;  %v4188_v57 = vor.u32 %v5760_v47, %v4185_v49  ;;  %v4656_v59 = vor.u32 %v5891_v53, %v4655_v52  ;;  %v4415_v45 = vld [vmem:[#allocation8] sm:$0xf]  ;;  %v5831_v46 = vld [vmem:[#allocation8 + $0xc] sm:$0xf0] }
  0xfe   :  { %v4911_v52 = vld [vmem:[#allocation8 + $0x3e0] sm:$0xf] }
  0xff   :  { %v5039_v53 = vld [vmem:[#allocation8 + $0x4e0] sm:$0xf] }
 0x100   :  { %1231 = vmatpush.bf16.msrb.mxu0 %v4056_v63  ;;  %1244 = vmatpush.bf16.msrb.mxu1 %v4312_v0  ;;  %v4512_v63 = vor.u32 %v5855_v60, %v4511_v48  ;;  %v4495_v0 = vld [vmem:[#allocation8 + $0xa0] sm:$0xf]  ;;  %v4544_v60 = vor.u32 %v5863_v51, %v4543_v50 }
 0x101   :  { %1257 = vmatpush.bf16.msrb.mxu2 %v4060_v3  ;;  %1270 = vmatpush.bf16.msrb.mxu3 %v4316_v4  ;;  %v4623_v3 = vld [vmem:[#allocation8 + $0x1a0] sm:$0xf]  ;;  %v5883_v4 = vld [vmem:[#allocation8 + $0x1ac] sm:$0xf0]  ;;  %v4496_v7 = vor.u32 %v5851_v2, %v4495_v0 }
 0x102   :  { %v4624_v9 = vor.u32 %v5883_v4, %v4623_v3  ;;  %v5167_v48 = vld [vmem:[#allocation8 + $0x5e0] sm:$0xf]  ;;  %v5951_v0 = vld [vmem:[#allocation8 + $0x3cc] sm:$0xf0] }
 0x103   :  { %v5023_v2 = vld [vmem:[#allocation8 + $0x4c0] sm:$0xf]  ;;  %v5983_v3 = vld [vmem:[#allocation8 + $0x4cc] sm:$0xf0]  ;;  %v5168_v4 = vor.u32 %v6019_v62, %v5167_v48 }
 0x104   :  { %1232 = vmatpush.bf16.msrb.mxu0 %v4024_v11  ;;  %1245 = vmatpush.bf16.msrb.mxu1 %v4280_v12  ;;  %v4607_v11 = vld [vmem:[#allocation8 + $0x180] sm:$0xf]  ;;  %v5879_v12 = vld [vmem:[#allocation8 + $0x18c] sm:$0xf0] }
 0x105   :  { %1258 = vmatpush.bf16.msrb.mxu2 %v4028_v15  ;;  %1271 = vmatpush.bf16.msrb.mxu3 %v4284_v16  ;;  %v4608_v15 = vor.u32 %v5879_v12, %v4607_v11  ;;  %v4591_v16 = vld [vmem:[#allocation8 + $0x160] sm:$0xf]  ;;  %v5911_v11 = vld [vmem:[#allocation8 + $0x28c] sm:$0xf0] }
 0x106   :  { %v5151_v12 = vld [vmem:[#allocation8 + $0x5c0] sm:$0xf] }
 0x108   :  { %1233 = vmatpush.bf16.msrb.mxu0 %v3992_v23  ;;  %1246 = vmatpush.bf16.msrb.mxu1 %v4248_v24  ;;  %v5839_v24 = vld [vmem:[#allocation8 + $0x4c] sm:$0xf0] }
 0x109   :  { %1259 = vmatpush.bf16.msrb.mxu2 %v3996_v27  ;;  %1272 = vmatpush.bf16.msrb.mxu3 %v4252_v29  ;;  %v4448_v27 = vor.u32 %v5839_v24, %v4447_v22  ;;  %v4431_v29 = vld [vmem:[#allocation8 + $0x20] sm:$0xf]  ;;  %v5979_v24 = vld [vmem:[#allocation8 + $0x4ac] sm:$0xf0] }
 0x10a   :  { %v4432_v44 = vor.u32 %v5835_v34, %v4431_v29  ;;  %v5007_v22 = vld [vmem:[#allocation8 + $0x4a0] sm:$0xf] }
 0x10b   :  { %v5008_v33 = vor.u32 %v5979_v24, %v5007_v22  ;;  %v4815_v24 = vld [vmem:[#allocation8 + $0x320] sm:$0xf] }
 0x10c   :  { %1234 = vmatpush.bf16.msrb.mxu0 %v3960_v37  ;;  %1247 = vmatpush.bf16.msrb.mxu1 %v4216_v38  ;;  %v5867_v37 = vld [vmem:[#allocation8 + $0x12c] sm:$0xf0] }
 0x10d   :  { %1260 = vmatpush.bf16.msrb.mxu2 %v3964_v42  ;;  %1273 = vmatpush.bf16.msrb.mxu3 %v4220_v43  ;;  %v4767_v42 = vld [vmem:[#allocation8 + $0x2c0] sm:$0xf]  ;;  %v5919_v43 = vld [vmem:[#allocation8 + $0x2cc] sm:$0xf0]  ;;  %v4560_v47 = vor.u32 %v5867_v37, %v4559_v36 }
 0x10e   :  { %v4768_v49 = vor.u32 %v5919_v43, %v4767_v42  ;;  %v6454_v37 = vld [vmem:[%s6587_s4] sm:$0xff]  ;;  %v4703_v43 = vld [vmem:[#allocation8 + $0x240] sm:$0xf] }
 0x10f   :  { %v6435_v5 = vpop.f32.mrf.mxu0  ;;  %v6437_v6 = vpop.f32.mrf.mxu1 }
 0x110   :  { %1235 = vmatpush.bf16.msrb.mxu0 %v3928_v54  ;;  %1248 = vmatpush.bf16.msrb.mxu1 %v4184_v55  ;;  %v5987_v54 = vld [vmem:[#allocation8 + $0x4ec] sm:$0xf0] }
 0x111   :  { %1261 = vmatpush.bf16.msrb.mxu2 %v3932_v56  ;;  %1274 = vmatpush.bf16.msrb.mxu3 %v4188_v57  ;;  %v5955_v55 = vld [vmem:[#allocation8 + $0x3ec] sm:$0xf0]  ;;  %v4751_v57 = vld [vmem:[#allocation8 + $0x2a0] sm:$0xf] }
 0x112   :  { %v4912_v56 = vor.u32 %v5955_v55, %v4911_v52  ;;  %v4847_v52 = vld [vmem:[#allocation8 + $0x360] sm:$0xf] }
 0x113   :  { %1236 = vmatmul.bf16.vlgmr.msrb.gmra.mxu0 %v6415_v28  ;;  %1249 = vmatmul.bf16.vlgmr.msrb.gmra.mxu1 %v6417_v32 }
 0x114   :  { %2884 = vmatpush.bf16.msra.mxu0 %v4528_v58  ;;  %2897 = vmatpush.bf16.msra.mxu1 %v4656_v59  ;;  %v5915_v58 = vld [vmem:[#allocation8 + $0x2ac] sm:$0xf0]  ;;  %v4416_v59 = vor.u32 %v5831_v46, %v4415_v45  ;;  %v5119_v45 = vld [vmem:[#allocation8 + $0x580] sm:$0xf] }
 0x115   :  { %1262 = vmatmul.bf16.vlgmr.msrb.gmra.mxu2 %v6415_v28  ;;  %1275 = vmatmul.bf16.vlgmr.msrb.gmra.mxu3 %v6417_v32  ;;  %v5843_v28 = vld [vmem:[#allocation8 + $0x6c] sm:$0xf0]  ;;  %v4752_v61 = vor.u32 %v5915_v58, %v4751_v57  ;;  %v4975_v57 = vld [vmem:[#allocation8 + $0x460] sm:$0xf] }
 0x116   :  { %v5875_v32 = vld [vmem:[#allocation8 + $0x16c] sm:$0xf0]  ;;  %v6439_v17 = vpop.f32.mrf.mxu2  ;;  %v6441_v18 = vpop.f32.mrf.mxu3  ;;  %v4464_v21 = vor.u32 %v5843_v28, %v4463_v14  ;;  %2910 = vmatpush.bf16.msra.mxu2 %v4784_v35  ;;  %2923 = vmatpush.bf16.msra.mxu3 %v4912_v56  ;;  %v1282_v56 = vperm.slane %v6454_v37, 0 }
 0x117   :  { %v339_v19 = vpop.f32.mrf.mxu0  ;;  %v352_v20 = vpop.f32.mrf.mxu1  ;;  %v4592_v23 = vor.u32 %v5875_v32, %v4591_v16  ;;  %v4879_v16 = vld [vmem:[#allocation8 + $0x3a0] sm:$0xf]  ;;  %v5947_v32 = vld [vmem:[#allocation8 + $0x3ac] sm:$0xf0] }
 0x118   :  { %2885 = vmatpush.bf16.msra.mxu0 %v4512_v63  ;;  %2898 = vmatpush.bf16.msra.mxu1 %v4640_v1  ;;  %v4895_v63 = vld [vmem:[#allocation8 + $0x3c0] sm:$0xf]  ;;  %v5040_v1 = vor.u32 %v5987_v54, %v5039_v53  ;;  %v5907_v20 = vld [vmem:[#allocation8 + $0x26c] sm:$0xf0]  ;;  %v4880_v25 = vor.u32 %v5947_v32, %v4879_v16 }
 0x119   :  { %v4896_v10 = vor.u32 %v5951_v0, %v4895_v63  ;;  %v4719_v19 = vld [vmem:[#allocation8 + $0x260] sm:$0xf]  ;;  %v5939_v53 = vld [vmem:[#allocation8 + $0x36c] sm:$0xf0] }
 0x11a   :  { %2911 = vmatpush.bf16.msra.mxu2 %v4768_v49  ;;  %v4720_v29 = vor.u32 %v5907_v20, %v4719_v19  ;;  %v5971_v58 = vld [vmem:[#allocation8 + $0x46c] sm:$0xf0]  ;;  %v4848_v48 = vor.u32 %v5939_v53, %v4847_v52  ;;  %v5279_v53 = vld [vmem:[#allocation8 + $0x6c0] sm:$0xf] }
 0x11b   :  { %2924 = vmatpush.bf16.msra.mxu3 %v4896_v10  ;;  %v6003_v0 = vld [vmem:[#allocation8 + $0x56c] sm:$0xf0]  ;;  %v4959_v10 = vld [vmem:[#allocation8 + $0x440] sm:$0xf] }
 0x11c   :  { %2886 = vmatpush.bf16.msra.mxu0 %v4496_v7  ;;  %2899 = vmatpush.bf16.msra.mxu1 %v4624_v9  ;;  %v4735_v7 = vld [vmem:[#allocation8 + $0x280] sm:$0xf] }
 0x11d   :  { %v4736_v28 = vor.u32 %v5911_v11, %v4735_v7  ;;  %v1283_v7 = vperm.slane %v6454_v37, 1  ;;  %v5967_v11 = vld [vmem:[#allocation8 + $0x44c] sm:$0xf0] }
 0x11e   :  { %v365_v38 = vpop.f32.mrf.mxu2  ;;  %v378_v39 = vpop.f32.mrf.mxu3  ;;  %2912 = vmatpush.bf16.msra.mxu2 %v4752_v61  ;;  %v5103_v61 = vld [vmem:[#allocation8 + $0x560] sm:$0xf] }
 0x11f   :  { %v6443_v40 = vpop.f32.mrf.mxu0  ;;  %v6445_v41 = vpop.f32.mrf.mxu1  ;;  %2925 = vmatpush.bf16.msra.mxu3 %v4880_v25  ;;  %v4991_v38 = vld [vmem:[#allocation8 + $0x480] sm:$0xf]  ;;  %v5975_v39 = vld [vmem:[#allocation8 + $0x48c] sm:$0xf0] }
 0x120   :  { %2887 = vmatpush.bf16.msra.mxu0 %v4480_v13  ;;  %2900 = vmatpush.bf16.msra.mxu1 %v4608_v15  ;;  %v6015_v13 = vld [vmem:[#allocation8 + $0x5cc] sm:$0xf0]  ;;  %v4992_v50 = vor.u32 %v5975_v39, %v4991_v38 }
 0x121   :  { %v5931_v25 = vld [vmem:[#allocation8 + $0x32c] sm:$0xf0] }
 0x122   :  { %2913 = vmatpush.bf16.msra.mxu2 %v4736_v28  ;;  %v5087_v28 = vld [vmem:[#allocation8 + $0x540] sm:$0xf] }
 0x124   :  { %2888 = vmatpush.bf16.msra.mxu0 %v4464_v21  ;;  %2901 = vmatpush.bf16.msra.mxu1 %v4592_v23  ;;  %v5024_v21 = vor.u32 %v5983_v3, %v5023_v2  ;;  %v5152_v23 = vor.u32 %v6015_v13, %v5151_v12  ;;  %v5104_v2 = vor.u32 %v6003_v0, %v5103_v61  ;;  %v4831_v3 = vld [vmem:[#allocation8 + $0x340] sm:$0xf]  ;;  %v5991_v61 = vld [vmem:[#allocation8 + $0x50c] sm:$0xf0] }
 0x126   :  { %v6447_v8 = vpop.f32.mrf.mxu2  ;;  %v6449_v9 = vpop.f32.mrf.mxu3  ;;  %2914 = vmatpush.bf16.msra.mxu2 %v4720_v29 }
 0x127   :  { %v391_v14 = vpop.f32.mrf.mxu0  ;;  %v404_v15 = vpop.f32.mrf.mxu1 }
 0x128   :  { %2889 = vmatpush.bf16.msra.mxu0 %v4448_v27  ;;  %2902 = vmatpush.bf16.msra.mxu1 %v4576_v30  ;;  %v6011_v27 = vld [vmem:[#allocation8 + $0x5ac] sm:$0xf0]  ;;  %v4863_v30 = vld [vmem:[#allocation8 + $0x380] sm:$0xf] }
 0x129   :  { %v5136_v34 = vor.u32 %v6011_v27, %v5135_v26  ;;  %v4864_v42 = vor.u32 %v5943_v31, %v4863_v30  ;;  %v4671_v14 = vld [vmem:[#allocation8 + $0x200] sm:$0xf]  ;;  %v5895_v15 = vld [vmem:[#allocation8 + $0x20c] sm:$0xf0]  ;;  %v4960_v30 = vor.u32 %v5967_v11, %v4959_v10  ;;  %v4816_v31 = vor.u32 %v5931_v25, %v4815_v24 }
 0x12a   :  { %v4672_v20 = vor.u32 %v5895_v15, %v4671_v14  ;;  %v5263_v11 = vld [vmem:[#allocation8 + $0x6a0] sm:$0xf]  ;;  %v4513_v14 = vld [vmem:[#allocation8 + $0xd0] sm:$0xf0]  ;;  %v6075_v25 = vld [vmem:[#allocation8 + $0x7ac] sm:$0xf0] }
 0x12b   :  { %2926 = vmatpush.bf16.msra.mxu3 %v4864_v42  ;;  %v5071_v42 = vld [vmem:[#allocation8 + $0x520] sm:$0xf] }
 0x12c   :  { %2890 = vmatpush.bf16.msra.mxu0 %v4432_v44  ;;  %2903 = vmatpush.bf16.msra.mxu1 %v4560_v47  ;;  %v5903_v44 = vld [vmem:[#allocation8 + $0x24c] sm:$0xf0]  ;;  %v5391_v24 = vld [vmem:[#allocation8 + $0x7a0] sm:$0xf] }
 0x12d   :  { %v4704_v46 = vor.u32 %v5903_v44, %v4703_v43  ;;  %v6007_v47 = vld [vmem:[#allocation8 + $0x58c] sm:$0xf0]  ;;  %v4927_v44 = vld [vmem:[#allocation8 + $0x400] sm:$0xf] }
 0x12e   :  { %v417_v35 = vpop.f32.mrf.mxu2  ;;  %v430_v36 = vpop.f32.mrf.mxu3  ;;  %v5120_v51 = vor.u32 %v6007_v47, %v5119_v45  ;;  %v5995_v43 = vld [vmem:[#allocation8 + $0x52c] sm:$0xf0]  ;;  %v4799_v47 = vld [vmem:[#allocation8 + $0x300] sm:$0xf] }
 0x12f   :  { %2915 = vmatpush.bf16.msra.mxu2 %v4704_v46  ;;  %2927 = vmatpush.bf16.msra.mxu3 %v4848_v48  ;;  %v4943_v35 = vld [vmem:[#allocation8 + $0x420] sm:$0xf]  ;;  %v6051_v36 = vld [vmem:[#allocation8 + $0x6ec] sm:$0xf0]  ;;  %v5072_v46 = vor.u32 %v5995_v43, %v5071_v42  ;;  %v5845_v42 = vld [vmem:[#allocation8 + $0x84] sm:$0xf] }
 0x130   :  { %2891 = vmatpush.bf16.msra.mxu0 %v4416_v59  ;;  %2904 = vmatpush.bf16.msra.mxu1 %v4544_v60  ;;  %v1081_v49 = vpop.f32.mrf.mxu0  ;;  %v1094_v55 = vpop.f32.mrf.mxu1  ;;  %v4687_v59 = vld [vmem:[#allocation8 + $0x220] sm:$0xf]  ;;  %v5899_v60 = vld [vmem:[#allocation8 + $0x22c] sm:$0xf0]  ;;  %v4481_v43 = vld [vmem:[#allocation8 + $0x90] sm:$0xf0] }
 0x131   :  { %v1082_v54 = vadd.f32 %v1081_v49, %v6435_v5  ;;  %v4688_v63 = vor.u32 %v5899_v60, %v4687_v59  ;;  %v5935_v5 = vld [vmem:[#allocation8 + $0x34c] sm:$0xf0]  ;;  %v5055_v60 = vld [vmem:[#allocation8 + $0x500] sm:$0xf] }
 0x132   :  { %v4832_v12 = vor.u32 %v5935_v5, %v4831_v3  ;;  %v5959_v45 = vld [vmem:[#allocation8 + $0x40c] sm:$0xf0]  ;;  %v5056_v0 = vor.u32 %v5991_v61, %v5055_v60  ;;  %v4657_v3 = vld [vmem:[#allocation8 + $0x1f0] sm:$0xf0]  ;;  %v5359_v61 = vld [vmem:[#allocation8 + $0x760] sm:$0xf] }
 0x133   :  { %v1095_v62 = vadd.f32 %v1094_v55, %v1082_v54  ;;  %2916 = vmatpush.bf16.msra.mxu2 %v4688_v63  ;;  %v5927_v49 = vld [vmem:[#allocation8 + $0x30c] sm:$0xf0]  ;;  %v5857_v55 = vld [vmem:[#allocation8 + $0xe4] sm:$0xf]  ;;  %v4928_v5 = vor.u32 %v5959_v45, %v4927_v44  ;;  %v5375_v45 = vld [vmem:[#allocation8 + $0x780] sm:$0xf] }
 0x134   :  { %2936 = vmatpush.bf16.msrb.mxu0 %v5040_v1  ;;  %2949 = vmatpush.bf16.msrb.mxu1 %v5168_v4  ;;  %v4976_v1 = vor.u32 %v5971_v58, %v4975_v57  ;;  %v4800_v52 = vor.u32 %v5927_v49, %v4799_v47  ;;  %v6047_v57 = vld [vmem:[#allocation8 + $0x6cc] sm:$0xf0]  ;;  %v5877_v47 = vld [vmem:[#allocation8 + $0x184] sm:$0xf]  ;;  %v4465_v60 = vld [vmem:[#allocation8 + $0x70] sm:$0xf0] }
 0x135   :  { %v1298_v4 = vadd.f32 %v1282_v56, %v1095_v62  ;;  %2928 = vmatpush.bf16.msra.mxu3 %v4832_v12  ;;  %v4529_v56 = vld [vmem:[#allocation8 + $0xf0] sm:$0xf0]  ;;  %v5280_v59 = vor.u32 %v6047_v57, %v5279_v53  ;;  %v5423_v62 = vld [vmem:[#allocation8 + $0x7e0] sm:$0xf]  ;;  %v6043_v12 = vld [vmem:[#allocation8 + $0x6ac] sm:$0xf0] }
 0x136   :  { %v5264_v15 = vor.u32 %v6043_v12, %v5263_v11  ;;  %v6031_v53 = vld [vmem:[#allocation8 + $0x64c] sm:$0xf0]  ;;  %v5841_v57 = vld [vmem:[#allocation8 + $0x64] sm:$0xf]  ;;  %v4449_v12 = vld [vmem:[#allocation8 + $0x50] sm:$0xf0] }
 0x137   :  { %vm1306_vm3 = vcmp.gt.f32.partialorder %v1298_v4, 0.0  ;;  %v1314_v16 = vmul.f32 0.2, %v1298_v4  ;;  %2917 = vmatpush.bf16.msra.mxu2 %v4672_v20  ;;  %v4641_v20 = vld [vmem:[#allocation8 + $0x1d0] sm:$0xf0] }
 0x138   :  { %2937 = vmatpush.bf16.msrb.mxu0 %v5024_v21  ;;  %2950 = vmatpush.bf16.msrb.mxu1 %v5152_v23  ;;  %v5999_v21 = vld [vmem:[#allocation8 + $0x54c] sm:$0xf0]  ;;  %v1083_v22 = vpop.f32.mrf.mxu0  ;;  %v1096_v29 = vpop.f32.mrf.mxu1  ;;  %v5837_v11 = vld [vmem:[#allocation8 + $0x44] sm:$0xf] }
 0x139   :  { %v1107_v13 = vpop.f32.mrf.mxu2  ;;  %v1120_v19 = vpop.f32.mrf.mxu3  ;;  %v5088_v23 = vor.u32 %v5999_v21, %v5087_v28  ;;  %v1322_v26 = vsel %vm1306_vm3, %v1298_v4, %v1314_v16  ;;  %2929 = vmatpush.bf16.msra.mxu3 %v4816_v31  ;;  %v5853_v4 = vld [vmem:[#allocation8 + $0xc4] sm:$0xf]  ;;  %v5407_v28 = vld [vmem:[#allocation8 + $0x7c0] sm:$0xf]  ;;  %v6079_v16 = vld [vmem:[#allocation8 + $0x7cc] sm:$0xf0] }
 0x13a   :  { %v1108_v32 = vadd.f32 %v1107_v13, %v6437_v6  ;;  %v5963_v6 = vld [vmem:[#allocation8 + $0x42c] sm:$0xf0]  ;;  %v4532_v13 = vor.u32 %v5857_v55, %v4529_v56  ;;  %v5247_v21 = vld [vmem:[#allocation8 + $0x680] sm:$0xf]  ;;  %v4625_v31 = vld [vmem:[#allocation8 + $0x1b0] sm:$0xf0]  ;;  %v4484_v56 = vor.u32 %v5845_v42, %v4481_v43 }
 0x13b   :  { %v6039_v22 = vld [vmem:[#allocation8 + $0x68c] sm:$0xf0]  ;;  %v1284_v55 = vperm.slane %v6454_v37, 2  ;;  %v5327_v43 = vld [vmem:[#allocation8 + $0x720] sm:$0xf]  ;;  %vm3851_vm3 = vcmask 7168  }
 0x13c   :  { %2938 = vmatpush.bf16.msrb.mxu0 %v5008_v33  ;;  %2951 = vmatpush.bf16.msrb.mxu1 %v5136_v34  ;;  %v1121_v27 = vadd.f32 %v1120_v19, %v1108_v32  ;;  %v5295_v33 = vld [vmem:[#allocation8 + $0x6e0] sm:$0xf]  ;;  %v6460_v34 = vpack.c.bf16 %v1322_v26, %v1322_v26  ;;  %v5408_v32 = vor.u32 %v6079_v16, %v5407_v28  ;;  %v5885_v19 = vld [vmem:[#allocation8 + $0x1c4] sm:$0xf] }
 0x13d   :  { %v5296_v39 = vor.u32 %v6051_v36, %v5295_v33  ;;  %2930 = vmatpush.bf16.msra.mxu3 %v4800_v52  ;;  %v4516_v26 = vor.u32 %v5853_v4, %v4513_v14  ;;  %v5248_v29 = vor.u32 %v6039_v22, %v5247_v21  ;;  %v4497_v33 = vld [vmem:[#allocation8 + $0xb0] sm:$0xf0]  ;;  %v6035_v36 = vld [vmem:[#allocation8 + $0x66c] sm:$0xf0]  ;;  %v5215_v52 = vld [vmem:[#allocation8 + $0x640] sm:$0xf] }
 0x13e   :  { %v1299_v38 = vadd.f32 %v1283_v7, %v1121_v27  ;;  %2892 = vmatmul.bf16.vlgmr.msra.gmra.mxu0 %v6460_v34  ;;  %v5849_v27 = vld [vmem:[#allocation8 + $0xa4] sm:$0xf]  ;;  %v5199_v4 = vld [vmem:[#allocation8 + $0x620] sm:$0xf] }
 0x13f   :  { %2962 = vmatpush.bf16.msrb.mxu2 %v5296_v39  ;;  %v4500_v39 = vor.u32 %v5849_v27, %v4497_v33  ;;  %v5343_v14 = vld [vmem:[#allocation8 + $0x740] sm:$0xf]  ;;  %v5869_v28 = vld [vmem:[#allocation8 + $0x144] sm:$0xf]  ;;  %v4452_v27 = vor.u32 %v5837_v11, %v4449_v12  ;;  %v4753_v12 = vld [vmem:[#allocation8 + $0x2b0] sm:$0xf0] }
 0x140   :  { %2939 = vmatpush.bf16.msrb.mxu0 %v4992_v50  ;;  %2952 = vmatpush.bf16.msrb.mxu1 %v5120_v51  ;;  %vm1307_vm4 = vcmp.gt.f32.partialorder %v1299_v38, 0.0  ;;  %v1315_v50 = vmul.f32 0.2, %v1299_v38  ;;  %v4944_v51 = vor.u32 %v5963_v6, %v4943_v35  ;;  %v5392_v35 = vor.u32 %v6075_v25, %v5391_v24  ;;  %v5231_v6 = vld [vmem:[#allocation8 + $0x660] sm:$0xf] }
 0x141   :  { %v1109_v54 = vpop.f32.mrf.mxu2  ;;  %v1122_v48 = vpop.f32.mrf.mxu3  ;;  %v5232_v44 = vor.u32 %v6035_v36, %v5231_v6  ;;  %v5183_v25 = vld [vmem:[#allocation8 + $0x600] sm:$0xf]  ;;  %v4433_v6 = vld [vmem:[#allocation8 + $0x30] sm:$0xf0]  ;;  %v5913_v11 = vld [vmem:[#allocation8 + $0x2a4] sm:$0xf] }
 0x142   :  { %v1323_v58 = vsel %vm1307_vm4, %v1299_v38, %v1315_v50  ;;  %v4609_v50 = vld [vmem:[#allocation8 + $0x190] sm:$0xf0] }
 0x143   :  { %v6463_v63 = vpack.c.bf16 %v1323_v58, %v1323_v58  ;;  %2963 = vmatpush.bf16.msrb.mxu2 %v5280_v59  ;;  %v5216_v58 = vor.u32 %v6031_v53, %v5215_v52  ;;  %v5917_v53 = vld [vmem:[#allocation8 + $0x2c4] sm:$0xf] }
 0x144   :  { %2940 = vmatpush.bf16.msrb.mxu0 %v4976_v1  ;;  %2953 = vmatpush.bf16.msrb.mxu1 %v5104_v2  ;;  %v6083_v1 = vld [vmem:[#allocation8 + $0x7ec] sm:$0xf0]  ;;  %v5889_v2 = vld [vmem:[#allocation8 + $0x1e4] sm:$0xf] }
 0x145   :  { %v5424_v7 = vor.u32 %v6083_v1, %v5423_v62  ;;  %v4660_v10 = vor.u32 %v5889_v2, %v4657_v3  ;;  %2905 = vmatmul.bf16.vlgmr.msra.gmra.mxu1 %v6463_v63  ;;  %v6067_v62 = vld [vmem:[#allocation8 + $0x76c] sm:$0xf0]  ;;  %v5873_v1 = vld [vmem:[#allocation8 + $0x164] sm:$0xf]  ;;  %v4593_v2 = vld [vmem:[#allocation8 + $0x170] sm:$0xf0] }
 0x147   :  { %2975 = vmatpush.bf16.msrb.mxu3 %v5424_v7  ;;  %2964 = vmatpush.bf16.msrb.mxu2 %v5264_v15  ;;  %v6027_v7 = vld [vmem:[#allocation8 + $0x62c] sm:$0xf0] }
 0x148   :  { %2954 = vmatpush.bf16.msrb.mxu1 %v5088_v23  ;;  %2941 = vmatpush.bf16.msrb.mxu0 %v4960_v30  ;;  %v4644_v23 = vor.u32 %v5885_v19, %v4641_v20  ;;  %v5881_v30 = vld [vmem:[#allocation8 + $0x1a4] sm:$0xf]  ;;  %v6063_v15 = vld [vmem:[#allocation8 + $0x74c] sm:$0xf0]  ;;  %v4577_v20 = vld [vmem:[#allocation8 + $0x150] sm:$0xf0] }
 0x149   :  { %v4628_v38 = vor.u32 %v5881_v30, %v4625_v31  ;;  %v5344_v19 = vor.u32 %v6063_v15, %v5343_v14  ;;  %v4580_v24 = vor.u32 %v5869_v28, %v4577_v20  ;;  %v6023_v30 = vld [vmem:[#allocation8 + $0x60c] sm:$0xf0]  ;;  %v4897_v14 = vld [vmem:[#allocation8 + $0x3d0] sm:$0xf0]  ;;  %v5909_v28 = vld [vmem:[#allocation8 + $0x284] sm:$0xf] }
 0x14a   :  { %v5184_v36 = vor.u32 %v6023_v30, %v5183_v25  ;;  %v4881_v20 = vld [vmem:[#allocation8 + $0x3b0] sm:$0xf0]  ;;  %v5941_v25 = vld [vmem:[#allocation8 + $0x384] sm:$0xf] }
 0x14b   :  { %2976 = vmatpush.bf16.msrb.mxu3 %v5408_v32  ;;  %2965 = vmatpush.bf16.msrb.mxu2 %v5248_v29  ;;  %v1285_v32 = vperm.slane %v6454_v37, 3  ;;  %v5833_v29 = vld [vmem:[#allocation8 + $0x24] sm:$0xf]  ;;  %v4705_v30 = vld [vmem:[#allocation8 + $0x250] sm:$0xf0] }
 0x14c   :  { %2955 = vmatpush.bf16.msrb.mxu1 %v5072_v46  ;;  %2942 = vmatpush.bf16.msrb.mxu0 %v4944_v51  ;;  %v6071_v46 = vld [vmem:[#allocation8 + $0x78c] sm:$0xf0]  ;;  %v4612_v51 = vor.u32 %v5877_v47, %v4609_v50  ;;  %v4561_v47 = vld [vmem:[#allocation8 + $0x130] sm:$0xf0]  ;;  %v5829_v50 = vld [vmem:[#allocation8 + $0x4] sm:$0xf] }
 0x14d   :  { %v5376_v49 = vor.u32 %v6071_v46, %v5375_v45  ;;  %v6059_v45 = vld [vmem:[#allocation8 + $0x72c] sm:$0xf0]  ;;  %v5865_v46 = vld [vmem:[#allocation8 + $0x124] sm:$0xf] }
 0x14e   :  { %v4564_v52 = vor.u32 %v5865_v46, %v4561_v47  ;;  %v5933_v47 = vld [vmem:[#allocation8 + $0x344] sm:$0xf] }
 0x14f   :  { %2977 = vmatpush.bf16.msrb.mxu3 %v5392_v35  ;;  %2966 = vmatpush.bf16.msrb.mxu2 %v5232_v44 }
 0x150   :  { %2956 = vmatpush.bf16.msrb.mxu1 %v5056_v0  ;;  %2943 = vmatpush.bf16.msrb.mxu0 %v4928_v5  ;;  %v1133_v54 = vpop.f32.mrf.mxu0  ;;  %v1146_v59 = vpop.f32.mrf.mxu1  ;;  %v5360_v0 = vor.u32 %v6067_v62, %v5359_v61  ;;  %v4596_v5 = vor.u32 %v5873_v1, %v4593_v2  ;;  %v4545_v1 = vld [vmem:[#allocation8 + $0x110] sm:$0xf0]  ;;  %v5953_v2 = vld [vmem:[#allocation8 + $0x3e4] sm:$0xf] }
 0x151   :  { %v1134_v48 = vadd.f32 %v1133_v54, %v6439_v17  ;;  %v4769_v54 = vld [vmem:[#allocation8 + $0x2d0] sm:$0xf0] }
 0x153   :  { %2978 = vmatpush.bf16.msrb.mxu3 %v5376_v49  ;;  %v1147_v3 = vadd.f32 %v1146_v59, %v1134_v48  ;;  %2967 = vmatpush.bf16.msrb.mxu2 %v5216_v58  ;;  %v4436_v49 = vor.u32 %v5833_v29, %v4433_v6  ;;  %v4772_v58 = vor.u32 %v5917_v53, %v4769_v54  ;;  %v5311_v48 = vld [vmem:[#allocation8 + $0x700] sm:$0xf]  ;;  %v6055_v59 = vld [vmem:[#allocation8 + $0x70c] sm:$0xf0]  ;;  %v5901_v29 = vld [vmem:[#allocation8 + $0x244] sm:$0xf] }
 0x154   :  { %3001 = vmatpush.bf16.msra.mxu1 %v4660_v10  ;;  %2988 = vmatpush.bf16.msra.mxu0 %v4532_v13  ;;  %v4468_v10 = vor.u32 %v5841_v57, %v4465_v60  ;;  %v5200_v13 = vor.u32 %v6027_v7, %v5199_v4  ;;  %v5861_v60 = vld [vmem:[#allocation8 + $0x104] sm:$0xf]  ;;  %v4849_v6 = vld [vmem:[#allocation8 + $0x370] sm:$0xf0] }
 0x155   :  { %v1300_v17 = vadd.f32 %v1284_v55, %v1147_v3  ;;  %v4913_v3 = vld [vmem:[#allocation8 + $0x3f0] sm:$0xf0]  ;;  %v4548_v7 = vor.u32 %v5861_v60, %v4545_v1 }
 0x156   :  { %v5041_v53 = vld [vmem:[#allocation8 + $0x4f0] sm:$0xf0] }
 0x157   :  { %2979 = vmatpush.bf16.msrb.mxu3 %v5360_v0  ;;  %vm1308_vm5 = vcmp.gt.f32.partialorder %v1300_v17, 0.0  ;;  %v1316_v21 = vmul.f32 0.2, %v1300_v17  ;;  %2968 = vmatpush.bf16.msrb.mxu2 %v5200_v13  ;;  %v5312_v0 = vor.u32 %v6055_v59, %v5311_v48  ;;  %v4756_v13 = vor.u32 %v5913_v11, %v4753_v12 }
 0x158   :  { %3002 = vmatpush.bf16.msra.mxu1 %v4644_v23  ;;  %2989 = vmatpush.bf16.msra.mxu0 %v4516_v26  ;;  %v1135_v26 = vpop.f32.mrf.mxu0  ;;  %v1148_v35 = vpop.f32.mrf.mxu1  ;;  %v1287_v48 = vperm.slane %v6454_v37, 5 }
 0x159   :  { %v1159_v16 = vpop.f32.mrf.mxu2  ;;  %v1172_v23 = vpop.f32.mrf.mxu3  ;;  %v1324_v31 = vsel %vm1308_vm5, %v1300_v17, %v1316_v21  ;;  %v5949_v17 = vld [vmem:[#allocation8 + $0x3c4] sm:$0xf]  ;;  %v4865_v26 = vld [vmem:[#allocation8 + $0x390] sm:$0xf0] }
 0x15a   :  { %v1160_v22 = vadd.f32 %v1159_v16, %v6441_v18  ;;  %v6470_v42 = vpack.c.bf16 %v1324_v31, %v1324_v31  ;;  %v4900_v15 = vor.u32 %v5949_v17, %v4897_v14  ;;  %v4737_v16 = vld [vmem:[#allocation8 + $0x290] sm:$0xf0]  ;;  %v5937_v35 = vld [vmem:[#allocation8 + $0x364] sm:$0xf] }
 0x15b   :  { %2980 = vmatpush.bf16.msrb.mxu3 %v5344_v19  ;;  %2969 = vmatpush.bf16.msrb.mxu2 %v5184_v36  ;;  %v5945_v19 = vld [vmem:[#allocation8 + $0x3a4] sm:$0xf]  ;;  %v4801_v14 = vld [vmem:[#allocation8 + $0x310] sm:$0xf0] }
 0x15c   :  { %3003 = vmatpush.bf16.msra.mxu1 %v4628_v38  ;;  %2990 = vmatpush.bf16.msra.mxu0 %v4500_v39  ;;  %v1173_v33 = vadd.f32 %v1172_v23, %v1160_v22  ;;  %v5921_v38 = vld [vmem:[#allocation8 + $0x2e4] sm:$0xf]  ;;  %v4785_v39 = vld [vmem:[#allocation8 + $0x2f0] sm:$0xf0]  ;;  %v4884_v21 = vor.u32 %v5945_v19, %v4881_v20 }
 0x15d   :  { %v4788_v18 = vor.u32 %v5921_v38, %v4785_v39  ;;  %2918 = vmatmul.bf16.vlgmr.msra.gmra.mxu2 %v6470_v42  ;;  %v5905_v22 = vld [vmem:[#allocation8 + $0x264] sm:$0xf]  ;;  %v4721_v23 = vld [vmem:[#allocation8 + $0x270] sm:$0xf0]  ;;  %v1286_v39 = vperm.slane %v6454_v37, 4 }
 0x15e   :  { %v1301_v44 = vadd.f32 %v1285_v32, %v1173_v33  ;;  %v4740_v32 = vor.u32 %v5909_v28, %v4737_v16  ;;  %v4708_v33 = vor.u32 %v5901_v29, %v4705_v30  ;;  %v5925_v17 = vld [vmem:[#allocation8 + $0x304] sm:$0xf]  ;;  %v5009_v19 = vld [vmem:[#allocation8 + $0x4b0] sm:$0xf0] }
 0x15f   :  { %3014 = vmatpush.bf16.msra.mxu2 %v4788_v18  ;;  %v4852_v18 = vor.u32 %v5937_v35, %v4849_v6  ;;  %v4804_v20 = vor.u32 %v5925_v17, %v4801_v14  ;;  %v5973_v29 = vld [vmem:[#allocation8 + $0x484] sm:$0xf]  ;;  %v4993_v30 = vld [vmem:[#allocation8 + $0x490] sm:$0xf0]  ;;  %v1289_v14 = vperm.slane %v6454_v37, 7 }
 0x160   :  { %3004 = vmatpush.bf16.msra.mxu1 %v4612_v51  ;;  %2991 = vmatpush.bf16.msra.mxu0 %v4484_v56  ;;  %v5328_v51 = vor.u32 %v6059_v45, %v5327_v43  ;;  %vm1309_vm6 = vcmp.gt.f32.partialorder %v1301_v44, 0.0  ;;  %v1317_v55 = vmul.f32 0.2, %v1301_v44  ;;  %v4417_v56 = vld [vmem:[#allocation8 + $0x10] sm:$0xf0]  ;;  %v4996_v6 = vor.u32 %v5973_v29, %v4993_v30 }
 0x161   :  { %v1161_v57 = vpop.f32.mrf.mxu2  ;;  %v1174_v62 = vpop.f32.mrf.mxu3  ;;  %v4420_v4 = vor.u32 %v5829_v50, %v4417_v56  ;;  %v5897_v43 = vld [vmem:[#allocation8 + $0x224] sm:$0xf]  ;;  %v5137_v35 = vld [vmem:[#allocation8 + $0x5b0] sm:$0xf0]  ;;  %v5856_v29 = vld [vmem:[#allocation8 + $0xd4] sm:$0xf0] }
 0x162   :  { %2981 = vmatpush.bf16.msrb.mxu3 %v5328_v51  ;;  %v1325_v61 = vsel %vm1309_vm6, %v1301_v44, %v1317_v55  ;;  %v4689_v44 = vld [vmem:[#allocation8 + $0x230] sm:$0xf0]  ;;  %v5985_v51 = vld [vmem:[#allocation8 + $0x4e4] sm:$0xf] }
 0x163   :  { %3015 = vmatpush.bf16.msra.mxu2 %v4772_v58  ;;  %v4692_v46 = vor.u32 %v5897_v43, %v4689_v44  ;;  %v5893_v55 = vld [vmem:[#allocation8 + $0x204] sm:$0xf]  ;;  %v5121_v43 = vld [vmem:[#allocation8 + $0x590] sm:$0xf0] }
 0x164   :  { %3005 = vmatpush.bf16.msra.mxu1 %v4596_v5  ;;  %2992 = vmatpush.bf16.msra.mxu0 %v4468_v10  ;;  %v6473_v5 = vpack.c.bf16 %v1325_v61, %v1325_v61  ;;  %v4916_v10 = vor.u32 %v5953_v2, %v4913_v3  ;;  %v5929_v2 = vld [vmem:[#allocation8 + $0x324] sm:$0xf]  ;;  %v4817_v3 = vld [vmem:[#allocation8 + $0x330] sm:$0xf0] }
 0x165   :  { %v4820_v11 = vor.u32 %v5929_v2, %v4817_v3  ;;  %v5297_v2 = vld [vmem:[#allocation8 + $0x6f0] sm:$0xf0]  ;;  %v4535_v3 = vld [vmem:[#allocation8 + $0xe8] sm:$0xf]  ;;  %v5989_v30 = vld [vmem:[#allocation8 + $0x504] sm:$0xf] }
 0x166   :  { %2931 = vmatmul.bf16.vlgmr.msra.gmra.mxu3 %v6473_v5 }
 0x167   :  { %2982 = vmatpush.bf16.msrb.mxu3 %v5312_v0  ;;  %3016 = vmatpush.bf16.msra.mxu2 %v4756_v13  ;;  %v5044_v0 = vor.u32 %v5985_v51, %v5041_v53  ;;  %v5169_v13 = vld [vmem:[#allocation8 + $0x5f0] sm:$0xf0] }
 0x168   :  { %3006 = vmatpush.bf16.msra.mxu1 %v4580_v24  ;;  %2993 = vmatpush.bf16.msra.mxu0 %v4452_v27  ;;  %v4724_v24 = vor.u32 %v5905_v22, %v4721_v23  ;;  %v4868_v27 = vor.u32 %v5941_v25, %v4865_v26  ;;  %v6013_v25 = vld [vmem:[#allocation8 + $0x5c4] sm:$0xf]  ;;  %v5153_v26 = vld [vmem:[#allocation8 + $0x5d0] sm:$0xf0] }
 0x16b   :  { %3027 = vmatpush.bf16.msra.mxu3 %v4916_v10  ;;  %3017 = vmatpush.bf16.msra.mxu2 %v4740_v32  ;;  %v5025_v10 = vld [vmem:[#allocation8 + $0x4d0] sm:$0xf0]  ;;  %v5977_v32 = vld [vmem:[#allocation8 + $0x4a4] sm:$0xf] }
 0x16c   :  { %3007 = vmatpush.bf16.msra.mxu1 %v4564_v52  ;;  %2994 = vmatpush.bf16.msra.mxu0 %v4436_v49  ;;  %v4833_v49 = vld [vmem:[#allocation8 + $0x350] sm:$0xf0] }
 0x16d   :  { %v4836_v54 = vor.u32 %v5933_v47, %v4833_v49  ;;  %v6001_v49 = vld [vmem:[#allocation8 + $0x564] sm:$0xf] }
 0x16f   :  { %3028 = vmatpush.bf16.msra.mxu3 %v4900_v15  ;;  %3018 = vmatpush.bf16.msra.mxu2 %v4724_v24 }
 0x170   :  { %3008 = vmatpush.bf16.msra.mxu1 %v4548_v7  ;;  %2995 = vmatpush.bf16.msra.mxu0 %v4420_v4  ;;  %v1185_v31 = vpop.f32.mrf.mxu0  ;;  %v1198_v38 = vpop.f32.mrf.mxu1  ;;  %v5981_v7 = vld [vmem:[#allocation8 + $0x4c4] sm:$0xf] }
 0x171   :  { %v1186_v36 = vadd.f32 %v1185_v31, %v6443_v40  ;;  %v4673_v40 = vld [vmem:[#allocation8 + $0x210] sm:$0xf0]  ;;  %v5028_v28 = vor.u32 %v5981_v7, %v5025_v10  ;;  %v5156_v31 = vor.u32 %v6013_v25, %v5153_v26  ;;  %v5860_v7 = vld [vmem:[#allocation8 + $0xf4] sm:$0xf0]  ;;  %v5993_v10 = vld [vmem:[#allocation8 + $0x524] sm:$0xf] }
 0x172   :  { %v4676_v60 = vor.u32 %v5893_v55, %v4673_v40  ;;  %v1288_v55 = vperm.slane %v6454_v37, 6  ;;  %v5961_v40 = vld [vmem:[#allocation8 + $0x424] sm:$0xf]  ;;  %v5281_v26 = vld [vmem:[#allocation8 + $0x6d0] sm:$0xf0] }
 0x173   :  { %3029 = vmatpush.bf16.msra.mxu3 %v4884_v21  ;;  %v1199_v45 = vadd.f32 %v1198_v38, %v1186_v36  ;;  %3019 = vmatpush.bf16.msra.mxu2 %v4708_v33  ;;  %v6009_v33 = vld [vmem:[#allocation8 + $0x5a4] sm:$0xf]  ;;  %v4977_v38 = vld [vmem:[#allocation8 + $0x470] sm:$0xf0] }
 0x174   :  { %v5969_v36 = vld [vmem:[#allocation8 + $0x464] sm:$0xf] }
 0x175   :  { %v1302_v50 = vadd.f32 %v1286_v39, %v1199_v45  ;;  %v5140_v39 = vor.u32 %v6009_v33, %v5137_v35  ;;  %v4980_v44 = vor.u32 %v5969_v36, %v4977_v38  ;;  %v5965_v45 = vld [vmem:[#allocation8 + $0x444] sm:$0xf]  ;;  %v5425_v33 = vld [vmem:[#allocation8 + $0x7f0] sm:$0xf0]  ;;  %v4663_v35 = vld [vmem:[#allocation8 + $0x1e8] sm:$0xf] }
 0x177   :  { %3030 = vmatpush.bf16.msra.mxu3 %v4868_v27  ;;  %vm1310_vm7 = vcmp.gt.f32.partialorder %v1302_v50, 0.0  ;;  %v1318_v56 = vmul.f32 0.2, %v1302_v50  ;;  %3020 = vmatpush.bf16.msra.mxu2 %v4692_v46  ;;  %v5012_v27 = vor.u32 %v5977_v32, %v5009_v19  ;;  %v4961_v46 = vld [vmem:[#allocation8 + $0x450] sm:$0xf0] }
 0x178   :  { %v1187_v59 = vpop.f32.mrf.mxu0  ;;  %v1200_v1 = vpop.f32.mrf.mxu1  ;;  %v4964_v53 = vor.u32 %v5965_v45, %v4961_v46  ;;  %v5852_v46 = vld [vmem:[#allocation8 + $0xb4] sm:$0xf0] }
 0x179   :  { %v1211_v52 = vpop.f32.mrf.mxu2  ;;  %v1224_v58 = vpop.f32.mrf.mxu3  ;;  %v1326_v61 = vsel %vm1310_vm7, %v1302_v50, %v1318_v56  ;;  %v5105_v50 = vld [vmem:[#allocation8 + $0x570] sm:$0xf0]  ;;  %v6049_v1 = vld [vmem:[#allocation8 + $0x6e4] sm:$0xf] }
 0x17a   :  { %v1212_v57 = vadd.f32 %v1211_v52, %v6445_v41  ;;  %v6480_v4 = vpack.c.bf16 %v1326_v61, %v1326_v61  ;;  %v6017_v41 = vld [vmem:[#allocation8 + $0x5e4] sm:$0xf]  ;;  %v4945_v56 = vld [vmem:[#allocation8 + $0x430] sm:$0xf0]  ;;  %v5300_v19 = vor.u32 %v6049_v1, %v5297_v2  ;;  %v4631_v1 = vld [vmem:[#allocation8 + $0x1a8] sm:$0xf] }
 0x17b   :  { %3031 = vmatpush.bf16.msra.mxu3 %v4852_v18  ;;  %3021 = vmatpush.bf16.msra.mxu2 %v4676_v60  ;;  %v5172_v22 = vor.u32 %v6017_v41, %v5169_v13  ;;  %v6005_v18 = vld [vmem:[#allocation8 + $0x584] sm:$0xf]  ;;  %v5089_v59 = vld [vmem:[#allocation8 + $0x550] sm:$0xf0]  ;;  %v4948_v60 = vor.u32 %v5961_v40, %v4945_v56  ;;  %v5884_v2 = vld [vmem:[#allocation8 + $0x1b4] sm:$0xf0] }
 0x17c   :  { %v1225_v62 = vadd.f32 %v1224_v58, %v1212_v57  ;;  %2944 = vmatmul.bf16.vlgmr.msrb.gmra.mxu0 %v6480_v4  ;;  %v5124_v47 = vor.u32 %v6005_v18, %v5121_v43  ;;  %v5108_v57 = vor.u32 %v6001_v49, %v5105_v50  ;;  %v5957_v61 = vld [vmem:[#allocation8 + $0x404] sm:$0xf]  ;;  %v5073_v13 = vld [vmem:[#allocation8 + $0x530] sm:$0xf0]  ;;  %v4503_v43 = vld [vmem:[#allocation8 + $0xa8] sm:$0xf] }
 0x17d   :  { %3040 = vmatpush.bf16.msrb.mxu0 %v5044_v0  ;;  %v4929_v0 = vld [vmem:[#allocation8 + $0x410] sm:$0xf0]  ;;  %v5076_v25 = vor.u32 %v5993_v10, %v5073_v13  ;;  %v4504_v56 = vor.u32 %v5852_v46, %v4503_v43  ;;  %v5844_v13 = vld [vmem:[#allocation8 + $0x74] sm:$0xf0] }
 0x17e   :  { %v1303_v12 = vadd.f32 %v1287_v48, %v1225_v62  ;;  %v5997_v48 = vld [vmem:[#allocation8 + $0x544] sm:$0xf]  ;;  %v5265_v18 = vld [vmem:[#allocation8 + $0x6b0] sm:$0xf0]  ;;  %v5872_v46 = vld [vmem:[#allocation8 + $0x154] sm:$0xf0] }
 0x17f   :  { %3032 = vmatpush.bf16.msra.mxu3 %v4836_v54  ;;  %v5393_v10 = vld [vmem:[#allocation8 + $0x7b0] sm:$0xf0] }
 0x180   :  { %vm1311_vm8 = vcmp.gt.f32.partialorder %v1303_v12, 0.0  ;;  %v1319_v15 = vmul.f32 0.2, %v1303_v12 }
 0x181   :  { %v1213_v16 = vpop.f32.mrf.mxu2  ;;  %v1226_v23 = vpop.f32.mrf.mxu3  ;;  %3041 = vmatpush.bf16.msrb.mxu0 %v5028_v28 }
 0x182   :  { %v1327_v21 = vsel %vm1311_vm8, %v1303_v12, %v1319_v15  ;;  %v4932_v16 = vor.u32 %v5957_v61, %v4929_v0  ;;  %v5848_v61 = vld [vmem:[#allocation8 + $0x94] sm:$0xf0] }
 0x183   :  { %3033 = vmatpush.bf16.msra.mxu3 %v4820_v11  ;;  %v6483_v24 = vpack.c.bf16 %v1327_v21, %v1327_v21  ;;  %v6045_v21 = vld [vmem:[#allocation8 + $0x6c4] sm:$0xf] }
 0x184   :  { %v5284_v36 = vor.u32 %v6045_v21, %v5281_v26  ;;  %v6029_v21 = vld [vmem:[#allocation8 + $0x644] sm:$0xf]  ;;  %v5840_v26 = vld [vmem:[#allocation8 + $0x54] sm:$0xf0] }
 0x185   :  { %2957 = vmatmul.bf16.vlgmr.msrb.gmra.mxu1 %v6483_v24  ;;  %3042 = vmatpush.bf16.msrb.mxu0 %v5012_v27  ;;  %v4519_v27 = vld [vmem:[#allocation8 + $0xc8] sm:$0xf] }
 0x186   :  { %3053 = vmatpush.bf16.msrb.mxu1 %v5172_v22  ;;  %v4520_v38 = vor.u32 %v5856_v29, %v4519_v27 }
 0x187   :  { %3034 = vmatpush.bf16.msra.mxu3 %v4804_v20  ;;  %v4536_v20 = vor.u32 %v5860_v7, %v4535_v3  ;;  %v6073_v7 = vld [vmem:[#allocation8 + $0x7a4] sm:$0xf] }
 0x189   :  { %3043 = vmatpush.bf16.msrb.mxu0 %v4996_v6  ;;  %v5892_v6 = vld [vmem:[#allocation8 + $0x1f4] sm:$0xf0] }
 0x18a   :  { %3054 = vmatpush.bf16.msrb.mxu1 %v5156_v31  ;;  %v6081_v31 = vld [vmem:[#allocation8 + $0x7e4] sm:$0xf]  ;;  %v4664_v50 = vor.u32 %v5892_v6, %v4663_v35  ;;  %v5361_v35 = vld [vmem:[#allocation8 + $0x770] sm:$0xf0] }
 0x18b   :  { %v6025_v6 = vld [vmem:[#allocation8 + $0x624] sm:$0xf] }
 0x18c   :  { %2996 = vmatmul.bf16.vlgmr.msra.gmra.mxu0 %v6460_v34 }
 0x18d   :  { %3044 = vmatpush.bf16.msrb.mxu0 %v4980_v44 }
 0x18e   :  { %3055 = vmatpush.bf16.msrb.mxu1 %v5140_v39  ;;  %v6041_v39 = vld [vmem:[#allocation8 + $0x6a4] sm:$0xf] }
 0x18f   :  { %v5268_v40 = vor.u32 %v6041_v39, %v5265_v18  ;;  %v5836_v39 = vld [vmem:[#allocation8 + $0x34] sm:$0xf0] }
 0x190   :  { %v1237_v51 = vpop.f32.mrf.mxu0  ;;  %v1250_v52 = vpop.f32.mrf.mxu1 }
 0x191   :  { %v1238_v54 = vadd.f32 %v1237_v51, %v6447_v8  ;;  %3045 = vmatpush.bf16.msrb.mxu0 %v4964_v53  ;;  %v5092_v8 = vor.u32 %v5997_v48, %v5089_v59  ;;  %v4647_v53 = vld [vmem:[#allocation8 + $0x1c8] sm:$0xf]  ;;  %v6037_v48 = vld [vmem:[#allocation8 + $0x684] sm:$0xf]  ;;  %v5249_v59 = vld [vmem:[#allocation8 + $0x690] sm:$0xf0] }
 0x192   :  { %3056 = vmatpush.bf16.msrb.mxu1 %v5124_v47 }
 0x193   :  { %v1251_v58 = vadd.f32 %v1250_v52, %v1238_v54  ;;  %v5428_v52 = vor.u32 %v6081_v31, %v5425_v33  ;;  %v5888_v54 = vld [vmem:[#allocation8 + $0x1d4] sm:$0xf0]  ;;  %v6065_v33 = vld [vmem:[#allocation8 + $0x764] sm:$0xf] }
 0x194   :  { %v5364_v43 = vor.u32 %v6065_v33, %v5361_v35  ;;  %v5159_v33 = vld [vmem:[#allocation8 + $0x5c8] sm:$0xf]  ;;  %v6016_v35 = vld [vmem:[#allocation8 + $0x5d4] sm:$0xf0] }
 0x195   :  { %v1304_v62 = vadd.f32 %v1288_v55, %v1251_v58  ;;  %3009 = vmatmul.bf16.vlgmr.msra.gmra.mxu1 %v6463_v63  ;;  %3046 = vmatpush.bf16.msrb.mxu0 %v4948_v60  ;;  %v5409_v58 = vld [vmem:[#allocation8 + $0x7d0] sm:$0xf0]  ;;  %v4487_v60 = vld [vmem:[#allocation8 + $0x88] sm:$0xf] }
 0x196   :  { %3057 = vmatpush.bf16.msrb.mxu1 %v5108_v57  ;;  %v6077_v57 = vld [vmem:[#allocation8 + $0x7c4] sm:$0xf]  ;;  %v4488_v3 = vor.u32 %v5848_v61, %v4487_v60  ;;  %v4567_v60 = vld [vmem:[#allocation8 + $0x128] sm:$0xf]  ;;  %v5868_v61 = vld [vmem:[#allocation8 + $0x134] sm:$0xf0] }
 0x197   :  { %vm1312_vm9 = vcmp.gt.f32.partialorder %v1304_v62, 0.0  ;;  %v1320_v11 = vmul.f32 0.2, %v1304_v62  ;;  %v5412_v0 = vor.u32 %v6077_v57, %v5409_v58  ;;  %v5924_v57 = vld [vmem:[#allocation8 + $0x2f4] sm:$0xf0] }
 0x198   :  { %v1263_v12 = vpop.f32.mrf.mxu2  ;;  %v1276_v41 = vpop.f32.mrf.mxu3  ;;  %v5047_v58 = vld [vmem:[#allocation8 + $0x4e8] sm:$0xf] }
 0x199   :  { %v1264_v17 = vadd.f32 %v1263_v12, %v6449_v9  ;;  %v1239_v15 = vpop.f32.mrf.mxu0  ;;  %v1252_v28 = vpop.f32.mrf.mxu1  ;;  %v1328_v32 = vsel %vm1312_vm9, %v1304_v62, %v1320_v11  ;;  %v5057_v9 = vld [vmem:[#allocation8 + $0x510] sm:$0xf0]  ;;  %3047 = vmatpush.bf16.msrb.mxu0 %v4932_v16  ;;  %v4648_v62 = vor.u32 %v5888_v54, %v4647_v53  ;;  %v6033_v11 = vld [vmem:[#allocation8 + $0x664] sm:$0xf]  ;;  %v4423_v53 = vld [vmem:[#allocation8 + $0x8] sm:$0xf] }
 0x19a   :  { %v6492_v22 = vpack.c.bf16 %v1328_v32, %v1328_v32  ;;  %3058 = vmatpush.bf16.msrb.mxu1 %v5092_v8  ;;  %v5060_v45 = vor.u32 %v5989_v30, %v5057_v9  ;;  %v5252_v8 = vor.u32 %v6037_v48, %v5249_v59  ;;  %v5233_v12 = vld [vmem:[#allocation8 + $0x670] sm:$0xf0]  ;;  %v4615_v15 = vld [vmem:[#allocation8 + $0x188] sm:$0xf]  ;;  %v5880_v28 = vld [vmem:[#allocation8 + $0x194] sm:$0xf0] }
 0x19b   :  { %v1277_v23 = vadd.f32 %v1276_v41, %v1264_v17  ;;  %v4471_v41 = vld [vmem:[#allocation8 + $0x68] sm:$0xf]  ;;  %v4632_v17 = vor.u32 %v5884_v2, %v4631_v1  ;;  %v5236_v16 = vor.u32 %v6033_v11, %v5233_v12  ;;  %v4616_v27 = vor.u32 %v5880_v28, %v4615_v15  ;;  %v5876_v9 = vld [vmem:[#allocation8 + $0x174] sm:$0xf0]  ;;  %v6057_v1 = vld [vmem:[#allocation8 + $0x724] sm:$0xf] }
 0x19c   :  { %2970 = vmatmul.bf16.vlgmr.msrb.gmra.mxu2 %v6492_v22  ;;  %3048 = vmatmul.bf16.vlgmr.msrb.gmra.mxu0 %v6480_v4  ;;  %v4472_v32 = vor.u32 %v5844_v13, %v4471_v41  ;;  %v4599_v30 = vld [vmem:[#allocation8 + $0x168] sm:$0xf]  ;;  %v5832_v54 = vld [vmem:[#allocation8 + $0x14] sm:$0xf0]  ;;  %v5329_v2 = vld [vmem:[#allocation8 + $0x730] sm:$0xf0] }
 0x19d   :  { %v1305_v37 = vadd.f32 %v1289_v14, %v1277_v23  ;;  %3066 = vmatpush.bf16.msrb.mxu2 %v5300_v19  ;;  %3092 = vmatpush.bf16.msra.mxu0 %v4536_v20  ;;  %v5396_v14 = vor.u32 %v6073_v7, %v5393_v10  ;;  %v6069_v19 = vld [vmem:[#allocation8 + $0x784] sm:$0xf]  ;;  %v5377_v20 = vld [vmem:[#allocation8 + $0x790] sm:$0xf0]  ;;  %v4600_v18 = vor.u32 %v5876_v9, %v4599_v30  ;;  %v5988_v48 = vld [vmem:[#allocation8 + $0x4f4] sm:$0xf0] }
 0x19e   :  { %3059 = vmatpush.bf16.msrb.mxu1 %v5076_v25  ;;  %v5217_v23 = vld [vmem:[#allocation8 + $0x650] sm:$0xf0]  ;;  %v4455_v25 = vld [vmem:[#allocation8 + $0x48] sm:$0xf]  ;;  %v5380_v29 = vor.u32 %v6069_v19, %v5377_v20  ;;  %v4568_v10 = vor.u32 %v5868_v61, %v4567_v60  ;;  %v5920_v11 = vld [vmem:[#allocation8 + $0x2d4] sm:$0xf0]  ;;  %v5332_v13 = vor.u32 %v6057_v1, %v5329_v2 }
 0x19f   :  { %vm1313_vm10 = vcmp.gt.f32.partialorder %v1305_v37, 0.0  ;;  %v1321_v44 = vmul.f32 0.2, %v1305_v37  ;;  %v5220_v31 = vor.u32 %v6029_v21, %v5217_v23  ;;  %v4775_v7 = vld [vmem:[#allocation8 + $0x2c8] sm:$0xf] }
 0x1a0   :  { %v1265_v47 = vpop.f32.mrf.mxu2  ;;  %v1278_v49 = vpop.f32.mrf.mxu3  ;;  %v5031_v12 = vld [vmem:[#allocation8 + $0x4c8] sm:$0xf]  ;;  %v5984_v41 = vld [vmem:[#allocation8 + $0x4d4] sm:$0xf0]  ;;  %v5313_v28 = vld [vmem:[#allocation8 + $0x710] sm:$0xf0]  ;;  %v4776_v19 = vor.u32 %v5920_v11, %v4775_v7 }
 0x1a1   :  { %v1329_v51 = vsel %vm1313_vm10, %v1305_v37, %v1321_v44  ;;  %3067 = vmatpush.bf16.msrb.mxu2 %v5284_v36  ;;  %3093 = vmatpush.bf16.msra.mxu0 %v4520_v38  ;;  %v4456_v37 = vor.u32 %v5840_v26, %v4455_v25  ;;  %v5201_v36 = vld [vmem:[#allocation8 + $0x630] sm:$0xf0]  ;;  %v4439_v38 = vld [vmem:[#allocation8 + $0x28] sm:$0xf]  ;;  %v6061_v44 = vld [vmem:[#allocation8 + $0x744] sm:$0xf]  ;;  %v5032_v20 = vor.u32 %v5984_v41, %v5031_v12 }
 0x1a2   :  { %v6496_v55 = vpack.c.bf16 %v1329_v51, %v1329_v51  ;;  %3060 = vmatpush.bf16.msrb.mxu1 %v5060_v45  ;;  %v4583_v45 = vld [vmem:[#allocation8 + $0x148] sm:$0xf]  ;;  %v5204_v47 = vor.u32 %v6025_v6, %v5201_v36  ;;  %v4440_v49 = vor.u32 %v5836_v39, %v4439_v38  ;;  %v6021_v51 = vld [vmem:[#allocation8 + $0x604] sm:$0xf]  ;;  %v5864_v15 = vld [vmem:[#allocation8 + $0x114] sm:$0xf0] }
 0x1a3   :  { %v4919_v21 = vld [vmem:[#allocation8 + $0x3e8] sm:$0xf]  ;;  %v5956_v23 = vld [vmem:[#allocation8 + $0x3f4] sm:$0xf0]  ;;  %v1594_v36 = vld [vmem:[%s6589_s6] sm:$0xf] }
 0x1a4   :  { %2983 = vmatmul.bf16.vlgmr.msrb.gmra.mxu3 %v6496_v55  ;;  %v4759_v26 = vld [vmem:[#allocation8 + $0x2a8] sm:$0xf]  ;;  %v5952_v39 = vld [vmem:[#allocation8 + $0x3d4] sm:$0xf0] }
 0x1a5   :  { %3079 = vmatpush.bf16.msrb.mxu3 %v5428_v52  ;;  %3068 = vmatpush.bf16.msrb.mxu2 %v5268_v40  ;;  %v5185_v52 = vld [vmem:[#allocation8 + $0x610] sm:$0xf0]  ;;  %v4791_v40 = vld [vmem:[#allocation8 + $0x2e8] sm:$0xf]  ;;  %v5972_v61 = vld [vmem:[#allocation8 + $0x474] sm:$0xf0] }
 0x1a6   :  { %3105 = vmatpush.bf16.msra.mxu1 %v4664_v50  ;;  %3094 = vmatpush.bf16.msra.mxu0 %v4504_v56  ;;  %v5345_v50 = vld [vmem:[#allocation8 + $0x750] sm:$0xf0]  ;;  %v4584_v56 = vor.u32 %v5872_v46, %v4583_v45  ;;  %v5015_v9 = vld [vmem:[#allocation8 + $0x4a8] sm:$0xf]  ;;  %v5160_v46 = vor.u32 %v6016_v35, %v5159_v33  ;;  %v6008_v2 = vld [vmem:[#allocation8 + $0x594] sm:$0xf0] }
 0x1a7   :  { %3061 = vmatmul.bf16.vlgmr.msrb.gmra.mxu1 %v6483_v24  ;;  %v5348_v59 = vor.u32 %v6061_v44, %v5345_v50  ;;  %v4903_v38 = vld [vmem:[#allocation8 + $0x3c8] sm:$0xf]  ;;  %v5912_v44 = vld [vmem:[#allocation8 + $0x294] sm:$0xf0]  ;;  %v1596_v50 = vperm.slane %v1594_v36, 0 }
 0x1a8   :  { %v4983_v60 = vld [vmem:[#allocation8 + $0x468] sm:$0xf]  ;;  %v6000_v33 = vld [vmem:[#allocation8 + $0x554] sm:$0xf0] }
 0x1a9   :  { %3080 = vmatpush.bf16.msrb.mxu3 %v5412_v0  ;;  %3069 = vmatpush.bf16.msrb.mxu2 %v5252_v8  ;;  %v4424_v0 = vor.u32 %v5832_v54, %v4423_v53  ;;  %v4792_v8 = vor.u32 %v5924_v57, %v4791_v40  ;;  %v6012_v53 = vld [vmem:[#allocation8 + $0x5b4] sm:$0xf0]  ;;  %v4887_v40 = vld [vmem:[#allocation8 + $0x3a8] sm:$0xf]  ;;  %v4984_v12 = vor.u32 %v5972_v61, %v4983_v60 }
 0x1aa   :  { %3106 = vmatpush.bf16.msra.mxu1 %v4648_v62  ;;  %3095 = vmatpush.bf16.msra.mxu0 %v4488_v3  ;;  %v5188_v62 = vor.u32 %v6021_v51, %v5185_v52  ;;  %v5048_v3 = vor.u32 %v5988_v48, %v5047_v58  ;;  %v4904_v51 = vor.u32 %v5952_v39, %v4903_v38  ;;  %v5143_v52 = vld [vmem:[#allocation8 + $0x5a8] sm:$0xf]  ;;  %v5908_v48 = vld [vmem:[#allocation8 + $0x274] sm:$0xf0] }
 0x1ab   :  { %v4727_v58 = vld [vmem:[#allocation8 + $0x268] sm:$0xf]  ;;  %v5936_v38 = vld [vmem:[#allocation8 + $0x354] sm:$0xf0] }
 0x1ac   :  { %3022 = vmatmul.bf16.vlgmr.msra.gmra.mxu2 %v6470_v42  ;;  %v5127_v1 = vld [vmem:[#allocation8 + $0x588] sm:$0xf] }
 0x1ad   :  { %3081 = vmatpush.bf16.msrb.mxu3 %v5396_v14  ;;  %3070 = vmatpush.bf16.msrb.mxu2 %v5236_v16  ;;  %v4551_v14 = vld [vmem:[#allocation8 + $0x108] sm:$0xf] }
 0x1ae   :  { %3107 = vmatpush.bf16.msra.mxu1 %v4632_v17  ;;  %3096 = vmatpush.bf16.msra.mxu0 %v4472_v32  ;;  %v6053_v17 = vld [vmem:[#allocation8 + $0x704] sm:$0xf]  ;;  %v5175_v16 = vld [vmem:[#allocation8 + $0x5e8] sm:$0xf]  ;;  %v6020_v32 = vld [vmem:[#allocation8 + $0x5f4] sm:$0xf0]  ;;  %v4552_v25 = vor.u32 %v5864_v15, %v4551_v14  ;;  %v5128_v14 = vor.u32 %v6008_v2, %v5127_v1 }
 0x1af   :  { %v5176_v30 = vor.u32 %v6020_v32, %v5175_v16  ;;  %v4871_v7 = vld [vmem:[#allocation8 + $0x388] sm:$0xf]  ;;  %v4521_v1 = vld [vmem:[#allocation8 + $0xd8] sm:$0xf0] }
 0x1b0   :  { %v4711_v41 = vld [vmem:[#allocation8 + $0x248] sm:$0xf] }
 0x1b1   :  { %3082 = vmatpush.bf16.msrb.mxu3 %v5380_v29  ;;  %3071 = vmatpush.bf16.msrb.mxu2 %v5220_v31  ;;  %v5316_v29 = vor.u32 %v6053_v17, %v5313_v28  ;;  %v5980_v31 = vld [vmem:[#allocation8 + $0x4b4] sm:$0xf0]  ;;  %v4967_v15 = vld [vmem:[#allocation8 + $0x448] sm:$0xf] }
 0x1b2   :  { %3108 = vmatpush.bf16.msra.mxu1 %v4616_v27  ;;  %3097 = vmatpush.bf16.msra.mxu0 %v4456_v37  ;;  %v5916_v27 = vld [vmem:[#allocation8 + $0x2b4] sm:$0xf0]  ;;  %v4920_v37 = vor.u32 %v5956_v23, %v4919_v21  ;;  %v5111_v32 = vld [vmem:[#allocation8 + $0x568] sm:$0xf] }
 0x1b3   :  { %v4760_v6 = vor.u32 %v5916_v27, %v4759_v26  ;;  %v5968_v28 = vld [vmem:[#allocation8 + $0x454] sm:$0xf0]  ;;  %v4855_v21 = vld [vmem:[#allocation8 + $0x368] sm:$0xf] }
 0x1b4   :  { %3035 = vmatmul.bf16.vlgmr.msra.gmra.mxu3 %v6473_v5  ;;  %v5940_v23 = vld [vmem:[#allocation8 + $0x374] sm:$0xf0]  ;;  %v4695_v26 = vld [vmem:[#allocation8 + $0x228] sm:$0xf] }
 0x1b5   :  { %3083 = vmatpush.bf16.msrb.mxu3 %v5364_v43  ;;  %3072 = vmatpush.bf16.msrb.mxu2 %v5204_v47  ;;  %v4743_v43 = vld [vmem:[#allocation8 + $0x288] sm:$0xf]  ;;  %v5900_v27 = vld [vmem:[#allocation8 + $0x234] sm:$0xf0] }
 0x1b6   :  { %3109 = vmatpush.bf16.msra.mxu1 %v4600_v18  ;;  %3098 = vmatpush.bf16.msra.mxu0 %v4440_v49  ;;  %v5016_v18 = vor.u32 %v5980_v31, %v5015_v9  ;;  %v4999_v47 = vld [vmem:[#allocation8 + $0x488] sm:$0xf]  ;;  %v5976_v49 = vld [vmem:[#allocation8 + $0x494] sm:$0xf0]  ;;  %v4744_v54 = vor.u32 %v5912_v44, %v4743_v43  ;;  %v4856_v31 = vor.u32 %v5940_v23, %v4855_v21  ;;  %v5850_v21 = vld [vmem:[#allocation8 + $0xac] sm:$0xf] }
 0x1b7   :  { %v5000_v57 = vor.u32 %v5976_v49, %v4999_v47  ;;  %v5964_v9 = vld [vmem:[#allocation8 + $0x434] sm:$0xf0]  ;;  %v4839_v36 = vld [vmem:[#allocation8 + $0x348] sm:$0xf]  ;;  %v4505_v23 = vld [vmem:[#allocation8 + $0xb8] sm:$0xf0] }
 0x1b8   :  { %v4679_v39 = vld [vmem:[#allocation8 + $0x208] sm:$0xf]  ;;  %v5896_v43 = vld [vmem:[#allocation8 + $0x214] sm:$0xf0] }
 0x1b9   :  { %3084 = vmatpush.bf16.msrb.mxu3 %v5348_v59  ;;  %3073 = vmatpush.bf16.msrb.mxu2 %v5188_v62  ;;  %v5144_v59 = vor.u32 %v6012_v53, %v5143_v52  ;;  %v4935_v44 = vld [vmem:[#allocation8 + $0x408] sm:$0xf]  ;;  %v6052_v49 = vld [vmem:[#allocation8 + $0x6f4] sm:$0xf0]  ;;  %v4537_v52 = vld [vmem:[#allocation8 + $0xf8] sm:$0xf0] }
 0x1ba   :  { %3110 = vmatpush.bf16.msra.mxu1 %v4584_v56  ;;  %3099 = vmatpush.bf16.msra.mxu0 %v4424_v0  ;;  %v5948_v56 = vld [vmem:[#allocation8 + $0x3b4] sm:$0xf0]  ;;  %v5303_v47 = vld [vmem:[#allocation8 + $0x6e8] sm:$0xf] }
 0x1bb   :  { %v2893_v45 = vpop.f32.mrf.mxu0  ;;  %v4888_v0 = vor.u32 %v5948_v56, %v4887_v40  ;;  %v5079_v53 = vld [vmem:[#allocation8 + $0x528] sm:$0xf]  ;;  %v4680_v40 = vor.u32 %v5896_v43, %v4679_v39  ;;  %v5882_v39 = vld [vmem:[#allocation8 + $0x1ac] sm:$0xf] }
 0x1bc   :  { %3074 = vmatmul.bf16.vlgmr.msrb.gmra.mxu2 %v6492_v22  ;;  %v2894_v62 = vadd.f32 %v2893_v45, %v1596_v50  ;;  %v5960_v45 = vld [vmem:[#allocation8 + $0x414] sm:$0xf0]  ;;  %v5858_v50 = vld [vmem:[#allocation8 + $0xec] sm:$0xf]  ;;  %v4823_v56 = vld [vmem:[#allocation8 + $0x328] sm:$0xf] }
 0x1bd   :  { %3118 = vmatpush.bf16.msra.mxu2 %v4792_v8  ;;  %3085 = vmatpush.bf16.msrb.mxu3 %v5332_v13  ;;  %v5904_v13 = vld [vmem:[#allocation8 + $0x254] sm:$0xf0]  ;;  %v4540_v60 = vor.u32 %v5858_v50, %v4537_v52  ;;  %v4473_v52 = vld [vmem:[#allocation8 + $0x78] sm:$0xf0] }
 0x1be   :  { %3144 = vmatpush.bf16.msrb.mxu0 %v5048_v3  ;;  %3111 = vmatpush.bf16.msra.mxu1 %v4568_v10  ;;  %v4728_v3 = vor.u32 %v5908_v48, %v4727_v58  ;;  %v5944_v10 = vld [vmem:[#allocation8 + $0x394] sm:$0xf0]  ;;  %v4936_v58 = vor.u32 %v5960_v45, %v4935_v44  ;;  %v5304_v48 = vor.u32 %v6052_v49, %v5303_v47  ;;  %v5399_v44 = vld [vmem:[#allocation8 + $0x7a8] sm:$0xf] }
 0x1bf   :  { %3100 = vmatmul.bf16.vlgmr.msra.gmra.mxu0 %v6460_v34  ;;  %v4872_v16 = vor.u32 %v5944_v10, %v4871_v7  ;;  %v5992_v7 = vld [vmem:[#allocation8 + $0x514] sm:$0xf0]  ;;  %v5239_v47 = vld [vmem:[#allocation8 + $0x668] sm:$0xf] }
 0x1c0   :  { %v5928_v10 = vld [vmem:[#allocation8 + $0x314] sm:$0xf0] }
 0x1c1   :  { %3119 = vmatpush.bf16.msra.mxu2 %v4776_v19  ;;  %3086 = vmatpush.bf16.msrb.mxu3 %v5316_v29  ;;  %v6004_v19 = vld [vmem:[#allocation8 + $0x574] sm:$0xf0] }
 0x1c2   :  { %3145 = vmatpush.bf16.msrb.mxu0 %v5032_v20  ;;  %3112 = vmatpush.bf16.msra.mxu1 %v4552_v25  ;;  %v2906_v8 = vpop.f32.mrf.mxu1  ;;  %v4712_v20 = vor.u32 %v5904_v13, %v4711_v41  ;;  %v4968_v25 = vor.u32 %v5968_v28, %v4967_v15  ;;  %v5112_v29 = vor.u32 %v6004_v19, %v5111_v32  ;;  %v4665_v41 = vld [vmem:[#allocation8 + $0x1f8] sm:$0xf0]  ;;  %v6044_v32 = vld [vmem:[#allocation8 + $0x6b4] sm:$0xf0] }
 0x1c3   :  { %v6509_v11 = vadd.f32 %v2906_v8, %v2894_v62  ;;  %v2895_v17 = vpop.f32.mrf.mxu0  ;;  %v6048_v62 = vld [vmem:[#allocation8 + $0x6d4] sm:$0xf0]  ;;  %v4807_v8 = vld [vmem:[#allocation8 + $0x308] sm:$0xf] }
 0x1c4   :  { %3087 = vmatmul.bf16.vlgmr.msrb.gmra.mxu3 %v6496_v55  ;;  %v5431_v17 = vld [vmem:[#allocation8 + $0x7e8] sm:$0xf]  ;;  %v4808_v19 = vor.u32 %v5928_v10, %v4807_v8  ;;  %v6076_v45 = vld [vmem:[#allocation8 + $0x7b4] sm:$0xf0]  ;;  %v5874_v8 = vld [vmem:[#allocation8 + $0x16c] sm:$0xf] }
 0x1c5   :  { %3131 = vmatpush.bf16.msra.mxu3 %v4920_v37  ;;  %3113 = vmatmul.bf16.vlgmr.msra.gmra.mxu1 %v6463_v63  ;;  %v5095_v37 = vld [vmem:[#allocation8 + $0x548] sm:$0xf]  ;;  %v6036_v49 = vld [vmem:[#allocation8 + $0x674] sm:$0xf0] }
 0x1c6   :  { %3157 = vmatpush.bf16.msrb.mxu1 %v5176_v30  ;;  %3120 = vmatpush.bf16.msra.mxu2 %v4760_v6  ;;  %v4951_v30 = vld [vmem:[#allocation8 + $0x428] sm:$0xf]  ;;  %v4696_v6 = vor.u32 %v5900_v27, %v4695_v26  ;;  %v5886_v26 = vld [vmem:[#allocation8 + $0x1cc] sm:$0xf]  ;;  %v4649_v27 = vld [vmem:[#allocation8 + $0x1d8] sm:$0xf0] }
 0x1c7   :  { %3146 = vmatpush.bf16.msrb.mxu0 %v5016_v18  ;;  %v4952_v18 = vor.u32 %v5964_v9, %v4951_v30  ;;  %v5415_v30 = vld [vmem:[#allocation8 + $0x7c8] sm:$0xf]  ;;  %v6080_v9 = vld [vmem:[#allocation8 + $0x7d4] sm:$0xf0] }
 0x1c8   :  { %v5367_v10 = vld [vmem:[#allocation8 + $0x768] sm:$0xf] }
 0x1c9   :  { %3132 = vmatpush.bf16.msra.mxu3 %v4904_v51  ;;  %v4840_v51 = vor.u32 %v5936_v38, %v4839_v36  ;;  %v4489_v36 = vld [vmem:[#allocation8 + $0x98] sm:$0xf0]  ;;  %v5416_v38 = vor.u32 %v6080_v9, %v5415_v30  ;;  %v6024_v30 = vld [vmem:[#allocation8 + $0x614] sm:$0xf0]  ;;  %v5830_v9 = vld [vmem:[#allocation8 + $0xc] sm:$0xf] }
 0x1ca   :  { %3158 = vmatpush.bf16.msrb.mxu1 %v5160_v46  ;;  %3121 = vmatpush.bf16.msra.mxu2 %v4744_v54  ;;  %v2908_v35 = vpop.f32.mrf.mxu1  ;;  %v5096_v46 = vor.u32 %v6000_v33, %v5095_v37  ;;  %v5996_v54 = vld [vmem:[#allocation8 + $0x534] sm:$0xf0]  ;;  %v5255_v37 = vld [vmem:[#allocation8 + $0x688] sm:$0xf] }
 0x1cb   :  { %3147 = vmatpush.bf16.msrb.mxu0 %v5000_v57  ;;  %v5932_v57 = vld [vmem:[#allocation8 + $0x334] sm:$0xf0]  ;;  %v5080_v61 = vor.u32 %v5996_v54, %v5079_v53  ;;  %v4652_v35 = vor.u32 %v5886_v26, %v4649_v27  ;;  %v5400_v53 = vor.u32 %v6076_v45, %v5399_v44  ;;  %v5878_v54 = vld [vmem:[#allocation8 + $0x18c] sm:$0xf]  ;;  %v5191_v26 = vld [vmem:[#allocation8 + $0x608] sm:$0xf] }
 0x1cc   :  { %v4824_v2 = vor.u32 %v5932_v57, %v4823_v56  ;;  %v6040_v33 = vld [vmem:[#allocation8 + $0x694] sm:$0xf0]  ;;  %v5240_v56 = vor.u32 %v6036_v49, %v5239_v47  ;;  %v5383_v57 = vld [vmem:[#allocation8 + $0x788] sm:$0xf]  ;;  %v5918_v49 = vld [vmem:[#allocation8 + $0x2cc] sm:$0xf] }
 0x1cd   :  { %3133 = vmatpush.bf16.msra.mxu3 %v4888_v0  ;;  %v5854_v0 = vld [vmem:[#allocation8 + $0xcc] sm:$0xf]  ;;  %v5256_v43 = vor.u32 %v6040_v33, %v5255_v37  ;;  %v5335_v44 = vld [vmem:[#allocation8 + $0x728] sm:$0xf]  ;;  %v6060_v45 = vld [vmem:[#allocation8 + $0x734] sm:$0xf0] }
 0x1ce   :  { %3159 = vmatpush.bf16.msrb.mxu1 %v5144_v59  ;;  %3122 = vmatpush.bf16.msra.mxu2 %v4728_v3  ;;  %v5287_v59 = vld [vmem:[#allocation8 + $0x6c8] sm:$0xf]  ;;  %v4524_v15 = vor.u32 %v5854_v0, %v4521_v1  ;;  %v5838_v0 = vld [vmem:[#allocation8 + $0x4c] sm:$0xf]  ;;  %v4457_v1 = vld [vmem:[#allocation8 + $0x58] sm:$0xf0] }
 0x1cf   :  { %3148 = vmatpush.bf16.msrb.mxu0 %v4984_v12  ;;  %v5063_v3 = vld [vmem:[#allocation8 + $0x508] sm:$0xf]  ;;  %v5890_v12 = vld [vmem:[#allocation8 + $0x1ec] sm:$0xf]  ;;  %v5288_v13 = vor.u32 %v6048_v62, %v5287_v59 }
 0x1d0   :  { %v5064_v28 = vor.u32 %v5992_v7, %v5063_v3  ;;  %v4601_v3 = vld [vmem:[#allocation8 + $0x178] sm:$0xf0]  ;;  %v5922_v33 = vld [vmem:[#allocation8 + $0x2ec] sm:$0xf] }
 0x1d1   :  { %3134 = vmatpush.bf16.msra.mxu3 %v4872_v16  ;;  %v5271_v16 = vld [vmem:[#allocation8 + $0x6a8] sm:$0xf] }
 0x1d2   :  { %3160 = vmatpush.bf16.msrb.mxu1 %v5128_v14  ;;  %3123 = vmatpush.bf16.msra.mxu2 %v4712_v20  ;;  %v6084_v14 = vld [vmem:[#allocation8 + $0x7f4] sm:$0xf0]  ;;  %v4668_v20 = vor.u32 %v5890_v12, %v4665_v41  ;;  %v4460_v41 = vor.u32 %v5838_v0, %v4457_v1  ;;  %v5954_v1 = vld [vmem:[#allocation8 + $0x3ec] sm:$0xf] }
 0x1d3   :  { %3149 = vmatpush.bf16.msrb.mxu0 %v4968_v25  ;;  %v5432_v25 = vor.u32 %v6084_v14, %v5431_v17  ;;  %v6068_v12 = vld [vmem:[#allocation8 + $0x774] sm:$0xf0]  ;;  %v4604_v14 = vor.u32 %v5874_v8, %v4601_v3 }
 0x1d4   :  { %v6028_v17 = vld [vmem:[#allocation8 + $0x634] sm:$0xf0] }
 0x1d5   :  { %3135 = vmatpush.bf16.msra.mxu3 %v4856_v31  ;;  %v4508_v31 = vor.u32 %v5850_v21, %v4505_v23  ;;  %v5351_v23 = vld [vmem:[#allocation8 + $0x748] sm:$0xf] }
 0x1d6   :  { %3161 = vmatpush.bf16.msrb.mxu1 %v5112_v29  ;;  %3124 = vmatpush.bf16.msra.mxu2 %v4696_v6  ;;  %v5272_v29 = vor.u32 %v6044_v32, %v5271_v16  ;;  %v5846_v6 = vld [vmem:[#allocation8 + $0x8c] sm:$0xf]  ;;  %v5368_v32 = vor.u32 %v6068_v12, %v5367_v10  ;;  %v4761_v10 = vld [vmem:[#allocation8 + $0x2b8] sm:$0xf0] }
 0x1d7   :  { %3150 = vmatpush.bf16.msrb.mxu0 %v4952_v18  ;;  %v4633_v18 = vld [vmem:[#allocation8 + $0x1b8] sm:$0xf0] }
 0x1d8   :  { %v4636_v50 = vor.u32 %v5882_v39, %v4633_v18  ;;  %v5866_v39 = vld [vmem:[#allocation8 + $0x12c] sm:$0xf]  ;;  %v4569_v18 = vld [vmem:[#allocation8 + $0x138] sm:$0xf0] }
 0x1d9   :  { %3136 = vmatpush.bf16.msra.mxu3 %v4840_v51  ;;  %v5842_v51 = vld [vmem:[#allocation8 + $0x6c] sm:$0xf] }
 0x1da   :  { %3162 = vmatpush.bf16.msrb.mxu1 %v5096_v46  ;;  %3125 = vmatpush.bf16.msra.mxu2 %v4680_v40  ;;  %v4492_v46 = vor.u32 %v5846_v6, %v4489_v36  ;;  %v4617_v40 = vld [vmem:[#allocation8 + $0x198] sm:$0xf0]  ;;  %v4476_v59 = vor.u32 %v5842_v51, %v4473_v52  ;;  %v5986_v6 = vld [vmem:[#allocation8 + $0x4ec] sm:$0xf]  ;;  %v4572_v51 = vor.u32 %v5866_v39, %v4569_v18 }
 0x1db   :  { %3151 = vmatpush.bf16.msrb.mxu0 %v4936_v58  ;;  %v6072_v58 = vld [vmem:[#allocation8 + $0x794] sm:$0xf0]  ;;  %v4620_v62 = vor.u32 %v5878_v54, %v4617_v40  ;;  %v4777_v52 = vld [vmem:[#allocation8 + $0x2d8] sm:$0xf0]  ;;  %v5970_v18 = vld [vmem:[#allocation8 + $0x46c] sm:$0xf] }
 0x1dc   :  { %v5033_v54 = vld [vmem:[#allocation8 + $0x4d8] sm:$0xf0]  ;;  %v4780_v0 = vor.u32 %v5918_v49, %v4777_v52 }
 0x1dd   :  { %3137 = vmatpush.bf16.msra.mxu3 %v4824_v2  ;;  %3126 = vmatmul.bf16.vlgmr.msra.gmra.mxu2 %v6470_v42  ;;  %v5384_v2 = vor.u32 %v6072_v58, %v5383_v57  ;;  %v5319_v57 = vld [vmem:[#allocation8 + $0x708] sm:$0xf]  ;;  %v5862_v58 = vld [vmem:[#allocation8 + $0x10c] sm:$0xf]  ;;  %v4873_v49 = vld [vmem:[#allocation8 + $0x398] sm:$0xf0] }
 0x1de   :  { %3170 = vmatpush.bf16.msrb.mxu2 %v5304_v48  ;;  %3163 = vmatpush.bf16.msrb.mxu1 %v5080_v61  ;;  %v6032_v61 = vld [vmem:[#allocation8 + $0x654] sm:$0xf0]  ;;  %v4713_v52 = vld [vmem:[#allocation8 + $0x258] sm:$0xf0] }
 0x1df   :  { %3196 = vmatpush.bf16.msra.mxu0 %v4540_v60  ;;  %v5223_v60 = vld [vmem:[#allocation8 + $0x648] sm:$0xf] }
 0x1e0   :  { %3152 = vmatmul.bf16.vlgmr.msrb.gmra.mxu0 %v6480_v4  ;;  %v6515_v48 = vpop.f32.mrf.mxu2  ;;  %v5224_v7 = vor.u32 %v6032_v61, %v5223_v60  ;;  %v6056_v60 = vld [vmem:[#allocation8 + $0x714] sm:$0xf0]  ;;  %v6018_v61 = vld [vmem:[#allocation8 + $0x5ec] sm:$0xf] }
 0x1e1   :  { %3138 = vmatpush.bf16.msra.mxu3 %v4808_v19  ;;  %v5870_v19 = vld [vmem:[#allocation8 + $0x14c] sm:$0xf]  ;;  %v5320_v12 = vor.u32 %v6056_v60, %v5319_v57 }
 0x1e2   :  { %3171 = vmatpush.bf16.msrb.mxu2 %v5288_v13  ;;  %3164 = vmatpush.bf16.msrb.mxu1 %v5064_v28  ;;  %v5207_v13 = vld [vmem:[#allocation8 + $0x628] sm:$0xf]  ;;  %v4441_v28 = vld [vmem:[#allocation8 + $0x38] sm:$0xf0] }
 0x1e3   :  { %3197 = vmatpush.bf16.msra.mxu0 %v4524_v15  ;;  %v5834_v15 = vld [vmem:[#allocation8 + $0x2c] sm:$0xf]  ;;  %v5208_v21 = vor.u32 %v6028_v17, %v5207_v13  ;;  %v5017_v17 = vld [vmem:[#allocation8 + $0x4b8] sm:$0xf0] }
 0x1e4   :  { %3139 = vmatmul.bf16.vlgmr.msra.gmra.mxu3 %v6473_v5  ;;  %v5978_v13 = vld [vmem:[#allocation8 + $0x4ac] sm:$0xf] }
 0x1e5   :  { %3183 = vmatpush.bf16.msrb.mxu3 %v5432_v25  ;;  %3165 = vmatmul.bf16.vlgmr.msrb.gmra.mxu1 %v6483_v24  ;;  %v6064_v25 = vld [vmem:[#allocation8 + $0x754] sm:$0xf0] }
 0x1e6   :  { %3209 = vmatpush.bf16.msra.mxu1 %v4668_v20  ;;  %3172 = vmatpush.bf16.msrb.mxu2 %v5272_v29  ;;  %v4585_v20 = vld [vmem:[#allocation8 + $0x158] sm:$0xf0]  ;;  %v4444_v29 = vor.u32 %v5834_v15, %v4441_v28  ;;  %v5352_v36 = vor.u32 %v6064_v25, %v5351_v23  ;;  %v6014_v15 = vld [vmem:[#allocation8 + $0x5cc] sm:$0xf] }
 0x1e7   :  { %3198 = vmatpush.bf16.msra.mxu0 %v4508_v31  ;;  %v4425_v31 = vld [vmem:[#allocation8 + $0x18] sm:$0xf0]  ;;  %v4588_v37 = vor.u32 %v5870_v19, %v4585_v20  ;;  %v5950_v19 = vld [vmem:[#allocation8 + $0x3cc] sm:$0xf] }
 0x1e8   :  { %v2921_v27 = vpop.f32.mrf.mxu2  ;;  %v5161_v28 = vld [vmem:[#allocation8 + $0x5d8] sm:$0xf0]  ;;  %v5910_v23 = vld [vmem:[#allocation8 + $0x28c] sm:$0xf] }
 0x1e9   :  { %3184 = vmatpush.bf16.msrb.mxu3 %v5416_v38  ;;  %v6517_v16 = vpop.f32.mrf.mxu3  ;;  %v5049_v38 = vld [vmem:[#allocation8 + $0x4f8] sm:$0xf0]  ;;  %v5974_v27 = vld [vmem:[#allocation8 + $0x48c] sm:$0xf] }
 0x1ea   :  { %3210 = vmatpush.bf16.msra.mxu1 %v4652_v35  ;;  %3173 = vmatpush.bf16.msrb.mxu2 %v5256_v43  ;;  %v4793_v35 = vld [vmem:[#allocation8 + $0x2f8] sm:$0xf0]  ;;  %v5192_v43 = vor.u32 %v6024_v30, %v5191_v26  ;;  %v5164_v26 = vor.u32 %v6014_v15, %v5161_v28  ;;  %v5894_v28 = vld [vmem:[#allocation8 + $0x20c] sm:$0xf] }
 0x1eb   :  { %3199 = vmatpush.bf16.msra.mxu0 %v4492_v46  ;;  %v4428_v46 = vor.u32 %v5830_v9, %v4425_v31  ;;  %v4796_v47 = vor.u32 %v5922_v33, %v4793_v35  ;;  %v4905_v20 = vld [vmem:[#allocation8 + $0x3d8] sm:$0xf0]  ;;  %v5946_v33 = vld [vmem:[#allocation8 + $0x3ac] sm:$0xf] }
 0x1ec   :  { %v4745_v25 = vld [vmem:[#allocation8 + $0x298] sm:$0xf0]  ;;  %v4908_v30 = vor.u32 %v5950_v19, %v4905_v20  ;;  %v5958_v20 = vld [vmem:[#allocation8 + $0x40c] sm:$0xf] }
 0x1ed   :  { %3185 = vmatpush.bf16.msrb.mxu3 %v5400_v53  ;;  %v5982_v53 = vld [vmem:[#allocation8 + $0x4cc] sm:$0xf]  ;;  %v5145_v9 = vld [vmem:[#allocation8 + $0x5b8] sm:$0xf0] }
 0x1ee   :  { %3211 = vmatpush.bf16.msra.mxu1 %v4636_v50  ;;  %3174 = vmatpush.bf16.msrb.mxu2 %v5240_v56  ;;  %v5052_v50 = vor.u32 %v5986_v6, %v5049_v38  ;;  %v5336_v56 = vor.u32 %v6060_v45, %v5335_v44  ;;  %v5036_v8 = vor.u32 %v5982_v53, %v5033_v54  ;;  %v4889_v35 = vld [vmem:[#allocation8 + $0x3b8] sm:$0xf0]  ;;  %v6006_v45 = vld [vmem:[#allocation8 + $0x58c] sm:$0xf] }
 0x1ef   :  { %3200 = vmatpush.bf16.msra.mxu0 %v4476_v59  ;;  %v4553_v59 = vld [vmem:[#allocation8 + $0x118] sm:$0xf0]  ;;  %v4892_v44 = vor.u32 %v5946_v33, %v4889_v35 }
 0x1f0   :  { %v4556_v3 = vor.u32 %v5862_v58, %v4553_v59  ;;  %v4729_v38 = vld [vmem:[#allocation8 + $0x278] sm:$0xf0]  ;;  %v6002_v58 = vld [vmem:[#allocation8 + $0x56c] sm:$0xf] }
 0x1f1   :  { %3186 = vmatpush.bf16.msrb.mxu3 %v5384_v2  ;;  %v2934_v40 = vpop.f32.mrf.mxu3  ;;  %v4921_v2 = vld [vmem:[#allocation8 + $0x3f8] sm:$0xf0] }
 0x1f2   :  { %3212 = vmatpush.bf16.msra.mxu1 %v4620_v62  ;;  %3175 = vmatpush.bf16.msrb.mxu2 %v5224_v7  ;;  %v5177_v62 = vld [vmem:[#allocation8 + $0x5f8] sm:$0xf0]  ;;  %v5914_v7 = vld [vmem:[#allocation8 + $0x2ac] sm:$0xf] }
 0x1f3   :  { %3201 = vmatpush.bf16.msra.mxu0 %v4460_v41  ;;  %v5180_v41 = vor.u32 %v6018_v61, %v5177_v62  ;;  %v5966_v40 = vld [vmem:[#allocation8 + $0x44c] sm:$0xf]  ;;  %v5113_v59 = vld [vmem:[#allocation8 + $0x578] sm:$0xf0] }
 0x1f4   :  { %v5938_v62 = vld [vmem:[#allocation8 + $0x36c] sm:$0xf]  ;;  %v4841_v15 = vld [vmem:[#allocation8 + $0x358] sm:$0xf0] }
 0x1f5   :  { %3187 = vmatpush.bf16.msrb.mxu3 %v5368_v32  ;;  %v4764_v32 = vor.u32 %v5914_v7, %v4761_v10  ;;  %v5962_v7 = vld [vmem:[#allocation8 + $0x42c] sm:$0xf]  ;;  %v4953_v10 = vld [vmem:[#allocation8 + $0x438] sm:$0xf0] }
 0x1f6   :  { %3213 = vmatpush.bf16.msra.mxu1 %v4604_v14  ;;  %3176 = vmatpush.bf16.msrb.mxu2 %v5208_v21  ;;  %v4924_v14 = vor.u32 %v5954_v1, %v4921_v2  ;;  %v5020_v21 = vor.u32 %v5978_v13, %v5017_v17  ;;  %v5898_v2 = vld [vmem:[#allocation8 + $0x22c] sm:$0xf]  ;;  %v5097_v13 = vld [vmem:[#allocation8 + $0x558] sm:$0xf0] }
 0x1f7   :  { %3202 = vmatpush.bf16.msra.mxu0 %v4444_v29  ;;  %v5001_v29 = vld [vmem:[#allocation8 + $0x498] sm:$0xf0] }
 0x1f8   :  { %v5004_v6 = vor.u32 %v5974_v27, %v5001_v29  ;;  %v4681_v19 = vld [vmem:[#allocation8 + $0x218] sm:$0xf0]  ;;  %v5495_v29 = vld [vmem:[#allocation10 + $0x70] sm:$0xf] }
 0x1f9   :  { %3188 = vmatpush.bf16.msrb.mxu3 %v5352_v36  ;;  %v6522_v31 = vpop.f32.mrf.mxu0  ;;  %v5906_v36 = vld [vmem:[#allocation8 + $0x26c] sm:$0xf]  ;;  %v5305_v27 = vld [vmem:[#allocation8 + $0x6f8] sm:$0xf0]  ;;  %v4684_v35 = vor.u32 %v5894_v28, %v4681_v19  ;;  %v6094_v19 = vld [vmem:[#allocation10 + $0x44] sm:$0xf0] }
 0x1fa   :  { %3214 = vmatpush.bf16.msra.mxu1 %v4588_v37  ;;  %3177 = vmatpush.bf16.msrb.mxu2 %v5192_v43  ;;  %v4748_v37 = vor.u32 %v5910_v23, %v4745_v25  ;;  %v4985_v43 = vld [vmem:[#allocation8 + $0x478] sm:$0xf0]  ;;  %v6038_v28 = vld [vmem:[#allocation8 + $0x68c] sm:$0xf] }
 0x1fb   :  { %3203 = vmatpush.bf16.msra.mxu0 %v4428_v46  ;;  %v4732_v46 = vor.u32 %v5906_v36, %v4729_v38  ;;  %v4825_v36 = vld [vmem:[#allocation8 + $0x338] sm:$0xf0] }
 0x1fd   :  { %3189 = vmatpush.bf16.msrb.mxu3 %v5336_v56  ;;  %3178 = vmatmul.bf16.vlgmr.msrb.gmra.mxu2 %v6492_v22  ;;  %v4969_v56 = vld [vmem:[#allocation8 + $0x458] sm:$0xf0] }
 0x1fe   :  { %3222 = vmatpush.bf16.msra.mxu2 %v4796_v47  ;;  %3215 = vmatpush.bf16.msra.mxu1 %v4572_v51  ;;  %v5942_v47 = vld [vmem:[#allocation8 + $0x38c] sm:$0xf]  ;;  %v4972_v1 = vor.u32 %v5966_v40, %v4969_v56  ;;  %v6116_v40 = vld [vmem:[#allocation10 + $0xf4] sm:$0xf0] }
 0x1ff   :  { %3248 = vmatpush.bf16.msrb.mxu0 %v5052_v50  ;;  %v4988_v50 = vor.u32 %v5970_v18, %v4985_v43  ;;  %v5902_v51 = vld [vmem:[#allocation8 + $0x24c] sm:$0xf]  ;;  %v4876_v57 = vor.u32 %v5942_v47, %v4873_v49 }
 0x200   :  { %3204 = vmatmul.bf16.vlgmr.msra.gmra.mxu0 %v6460_v34  ;;  %v6010_v34 = vld [vmem:[#allocation8 + $0x5ac] sm:$0xf]  ;;  %v4716_v61 = vor.u32 %v5902_v51, %v4713_v52  ;;  %v5065_v51 = vld [vmem:[#allocation8 + $0x518] sm:$0xf0] }
 0x201   :  { %3190 = vmatpush.bf16.msrb.mxu3 %v5320_v12  ;;  %v5148_v39 = vor.u32 %v6010_v34, %v5145_v9  ;;  %v2947_v60 = vpop.f32.mrf.mxu0  ;;  %v6100_v34 = vld [vmem:[#allocation10 + $0x74] sm:$0xf0]  ;;  %v5994_v9 = vld [vmem:[#allocation8 + $0x52c] sm:$0xf]  ;;  %v4809_v52 = vld [vmem:[#allocation8 + $0x318] sm:$0xf0] }
 0x202   :  { %3223 = vmatpush.bf16.msra.mxu2 %v4780_v0  ;;  %3216 = vmatpush.bf16.msra.mxu1 %v4556_v3  ;;  %v6525_v53 = vpop.f32.mrf.mxu1  ;;  %v4857_v0 = vld [vmem:[#allocation8 + $0x378] sm:$0xf0]  ;;  %v5116_v3 = vor.u32 %v6002_v58, %v5113_v59  ;;  %v6046_v18 = vld [vmem:[#allocation8 + $0x6cc] sm:$0xf]  ;;  %v5496_v43 = vor.u32 %v6100_v34, %v5495_v29 }
 0x203   :  { %3249 = vmatpush.bf16.msrb.mxu0 %v5036_v8  ;;  %v4697_v8 = vld [vmem:[#allocation8 + $0x238] sm:$0xf0]  ;;  %v4860_v12 = vor.u32 %v5938_v62, %v4857_v0  ;;  %v5926_v49 = vld [vmem:[#allocation8 + $0x30c] sm:$0xf] }
 0x204   :  { %3191 = vmatmul.bf16.vlgmr.msrb.gmra.mxu3 %v6496_v55  ;;  %v4700_v17 = vor.u32 %v5898_v2, %v4697_v8  ;;  %v5433_v58 = vld [vmem:[#allocation8 + $0x7f8] sm:$0xf0]  ;;  %v6042_v62 = vld [vmem:[#allocation8 + $0x6ac] sm:$0xf]  ;;  %v5479_v2 = vld [vmem:[#allocation10 + $0x50] sm:$0xf] }
 0x205   :  { %3235 = vmatpush.bf16.msra.mxu3 %v4924_v14  ;;  %3217 = vmatmul.bf16.vlgmr.msra.gmra.mxu1 %v6463_v63  ;;  %v5129_v63 = vld [vmem:[#allocation8 + $0x598] sm:$0xf0]  ;;  %v5934_v14 = vld [vmem:[#allocation8 + $0x34c] sm:$0xf]  ;;  %v6096_v8 = vld [vmem:[#allocation10 + $0x54] sm:$0xf0] }
 0x206   :  { %3261 = vmatpush.bf16.msrb.mxu1 %v5180_v41  ;;  %3224 = vmatpush.bf16.msra.mxu2 %v4764_v32  ;;  %v5132_v54 = vor.u32 %v6006_v45, %v5129_v63  ;;  %v5998_v41 = vld [vmem:[#allocation8 + $0x54c] sm:$0xf]  ;;  %v4956_v32 = vor.u32 %v5962_v7, %v4953_v10  ;;  %v5289_v45 = vld [vmem:[#allocation8 + $0x6d8] sm:$0xf0]  ;;  %v5487_v63 = vld [vmem:[#allocation10 + $0x60] sm:$0xf] }
 0x207   :  { %3250 = vmatpush.bf16.msrb.mxu0 %v5020_v21  ;;  %v4937_v21 = vld [vmem:[#allocation8 + $0x418] sm:$0xf0]  ;;  %v5100_v25 = vor.u32 %v5998_v41, %v5097_v13  ;;  %v5292_v56 = vor.u32 %v6046_v18, %v5289_v45  ;;  %v6114_v41 = vld [vmem:[#allocation10 + $0xe4] sm:$0xf0]  ;;  %v6034_v34 = vld [vmem:[#allocation8 + $0x66c] sm:$0xf]  ;;  %v2920_v18 = vadd.f32 %v6515_v48, %v6509_v11 }
 0x208   :  { %v4940_v38 = vor.u32 %v5958_v20, %v4937_v21  ;;  %v5273_v0 = vld [vmem:[#allocation8 + $0x6b8] sm:$0xf0]  ;;  %v5543_v21 = vld [vmem:[#allocation10 + $0xd0] sm:$0xf] }
 0x209   :  { %3236 = vmatpush.bf16.msra.mxu3 %v4908_v30  ;;  %v4844_v30 = vor.u32 %v5934_v14, %v4841_v15  ;;  %v6527_v33 = vpop.f32.mrf.mxu0  ;;  %v5276_v13 = vor.u32 %v6042_v62, %v5273_v0  ;;  %v5417_v14 = vld [vmem:[#allocation8 + $0x7d8] sm:$0xf0]  ;;  %v5480_v15 = vor.u32 %v6096_v8, %v5479_v2  ;;  %v6088_v2 = vld [vmem:[#allocation10 + $0x14] sm:$0xf0] }
 0x20a   :  { %3262 = vmatpush.bf16.msrb.mxu1 %v5164_v26  ;;  %3225 = vmatpush.bf16.msra.mxu2 %v4748_v37  ;;  %v2960_v23 = vpop.f32.mrf.mxu1  ;;  %v6050_v26 = vld [vmem:[#allocation8 + $0x6ec] sm:$0xf]  ;;  %v5081_v37 = vld [vmem:[#allocation8 + $0x538] sm:$0xf0] }
 0x20b   :  { %3251 = vmatpush.bf16.msrb.mxu0 %v5004_v6  ;;  %v5930_v6 = vld [vmem:[#allocation8 + $0x32c] sm:$0xf]  ;;  %v6112_v23 = vld [vmem:[#allocation10 + $0xd4] sm:$0xf0]  ;;  %v5209_v62 = vld [vmem:[#allocation8 + $0x638] sm:$0xf0] }
 0x20c   :  { %v4828_v47 = vor.u32 %v5930_v6, %v4825_v36  ;;  %v5544_v6 = vor.u32 %v6112_v23, %v5543_v21  ;;  %v5497_v21 = vld [vmem:[#allocation10 + $0x78] sm:$0xf0] }
 0x20d   :  { %3237 = vmatpush.bf16.msra.mxu3 %v4892_v44  ;;  %v5084_v44 = vor.u32 %v5994_v9, %v5081_v37  ;;  %v5241_v9 = vld [vmem:[#allocation8 + $0x678] sm:$0xf0]  ;;  %v5463_v37 = vld [vmem:[#allocation10 + $0x30] sm:$0xf] }
 0x20e   :  { %3263 = vmatpush.bf16.msrb.mxu1 %v5148_v39  ;;  %3226 = vmatpush.bf16.msra.mxu2 %v4732_v46  ;;  %v5308_v39 = vor.u32 %v6050_v26, %v5305_v27  ;;  %v6098_v46 = vld [vmem:[#allocation10 + $0x64] sm:$0xf0]  ;;  %v6074_v26 = vld [vmem:[#allocation8 + $0x7ac] sm:$0xf]  ;;  %v5401_v27 = vld [vmem:[#allocation8 + $0x7b8] sm:$0xf0] }
 0x20f   :  { %3252 = vmatpush.bf16.msrb.mxu0 %v4988_v50  ;;  %v5990_v50 = vld [vmem:[#allocation8 + $0x50c] sm:$0xf]  ;;  %v5488_v60 = vor.u32 %v6098_v46, %v5487_v63  ;;  %v5225_v46 = vld [vmem:[#allocation8 + $0x658] sm:$0xf0] }
 0x210   :  { %v6030_v63 = vld [vmem:[#allocation8 + $0x64c] sm:$0xf] }
 0x211   :  { %3238 = vmatpush.bf16.msra.mxu3 %v4876_v57  ;;  %v6082_v57 = vld [vmem:[#allocation8 + $0x7ec] sm:$0xf]  ;;  %v2999_v7 = vpop.f32.mrf.mxu0  ;;  %v5228_v48 = vor.u32 %v6030_v63, %v5225_v46  ;;  %v5321_v63 = vld [vmem:[#allocation8 + $0x718] sm:$0xf0]  ;;  %v6115_v46 = vld [vmem:[#allocation10 + $0xf4] sm:$0xf] }
 0x212   :  { %3264 = vmatpush.bf16.msrb.mxu1 %v5132_v54  ;;  %3227 = vmatpush.bf16.msra.mxu2 %v4716_v61  ;;  %v5559_v54 = vld [vmem:[#allocation10 + $0xf0] sm:$0xf]  ;;  %v6529_v59 = vpop.f32.mrf.mxu1  ;;  %v5068_v61 = vor.u32 %v5990_v50, %v5065_v51  ;;  %v5436_v10 = vor.u32 %v6082_v57, %v5433_v58  ;;  %v5455_v50 = vld [vmem:[#allocation10 + $0x20] sm:$0xf]  ;;  %v6090_v51 = vld [vmem:[#allocation10 + $0x24] sm:$0xf0] }
 0x213   :  { %3253 = vmatpush.bf16.msrb.mxu0 %v4972_v1  ;;  %v4812_v1 = vor.u32 %v5926_v49, %v4809_v52  ;;  %v6066_v57 = vld [vmem:[#allocation8 + $0x76c] sm:$0xf]  ;;  %v5369_v58 = vld [vmem:[#allocation8 + $0x778] sm:$0xf0] }
 0x214   :  { %v5372_v7 = vor.u32 %v6066_v57, %v5369_v58  ;;  %v6550_v57 = vld [vmem:[%s6589_s6] sm:$0xf] }
 0x215   :  { %3239 = vmatpush.bf16.msra.mxu3 %v4860_v12  ;;  %v5551_v12 = vld [vmem:[#allocation10 + $0xe0] sm:$0xf]  ;;  %v1597_v58 = vperm.slane %v6550_v57, 1 }
 0x216   :  { %3265 = vmatpush.bf16.msrb.mxu1 %v5116_v3  ;;  %3228 = vmatpush.bf16.msra.mxu2 %v4700_v17  ;;  %v5560_v3 = vor.u32 %v6116_v40, %v5559_v54  ;;  %v6078_v17 = vld [vmem:[#allocation8 + $0x7cc] sm:$0xf]  ;;  %v5552_v20 = vor.u32 %v6114_v41, %v5551_v12  ;;  %v5527_v40 = vld [vmem:[#allocation10 + $0xb0] sm:$0xf] }
 0x217   :  { %3254 = vmatpush.bf16.msrb.mxu0 %v4956_v32  ;;  %v5257_v32 = vld [vmem:[#allocation8 + $0x698] sm:$0xf0] }
 0x219   :  { %3240 = vmatpush.bf16.msra.mxu3 %v4844_v30  ;;  %v6535_v36 = vpop.f32.mrf.mxu0 }
 0x21a   :  { %3266 = vmatpush.bf16.msrb.mxu1 %v5100_v25  ;;  %3229 = vmatpush.bf16.msra.mxu2 %v4684_v35  ;;  %v5260_v25 = vor.u32 %v6038_v28, %v5257_v32  ;;  %v3012_v29 = vpop.f32.mrf.mxu1  ;;  %v6092_v35 = vld [vmem:[#allocation10 + $0x34] sm:$0xf0]  ;;  %v5193_v28 = vld [vmem:[#allocation8 + $0x618] sm:$0xf0]  ;;  %v5439_v32 = vld [vmem:[#allocation10] sm:$0xf] }
 0x21b   :  { %3255 = vmatpush.bf16.msrb.mxu0 %v4940_v38  ;;  %v5404_v38 = vor.u32 %v6074_v26, %v5401_v27  ;;  %v5464_v45 = vor.u32 %v6092_v35, %v5463_v37  ;;  %v6058_v26 = vld [vmem:[#allocation8 + $0x72c] sm:$0xf]  ;;  %v5511_v27 = vld [vmem:[#allocation10 + $0x90] sm:$0xf]  ;;  %v6104_v29 = vld [vmem:[#allocation10 + $0x94] sm:$0xf0] }
 0x21d   :  { %3241 = vmatpush.bf16.msra.mxu3 %v4828_v47  ;;  %3230 = vmatmul.bf16.vlgmr.msra.gmra.mxu2 %v6470_v42  ;;  %v5471_v42 = vld [vmem:[#allocation10 + $0x40] sm:$0xf]  ;;  %v2933_v47 = vadd.f32 %v6517_v16, %v2920_v18 }
 0x21e   :  { %3274 = vmatpush.bf16.msrb.mxu2 %v5308_v39  ;;  %3267 = vmatpush.bf16.msrb.mxu1 %v5084_v44  ;;  %v5472_v30 = vor.u32 %v6094_v19, %v5471_v42  ;;  %v6110_v39 = vld [vmem:[#allocation10 + $0xc4] sm:$0xf0]  ;;  %v5385_v44 = vld [vmem:[#allocation8 + $0x798] sm:$0xf0] }
 0x21f   :  { %3706 = vmatpush.bf16.msra.mxu0 %v5496_v43  ;;  %v6070_v43 = vld [vmem:[#allocation8 + $0x78c] sm:$0xf]  ;;  %v2971_v49 = vpop.f32.mrf.mxu2  ;;  %v2946_v11 = vadd.f32 %v6522_v31, %v2933_v47  ;;  %v5519_v31 = vld [vmem:[#allocation10 + $0xa0] sm:$0xf]  ;;  %v5561_v47 = vld [vmem:[#allocation10 + $0xf8] sm:$0xf0] }
 0x220   :  { %3256 = vmatmul.bf16.vlgmr.msrb.gmra.mxu0 %v6480_v4  ;;  %v5420_v4 = vor.u32 %v6078_v17, %v5417_v14  ;;  %v5388_v54 = vor.u32 %v6070_v43, %v5385_v44  ;;  %v5353_v17 = vld [vmem:[#allocation8 + $0x758] sm:$0xf0]  ;;  %v6054_v43 = vld [vmem:[#allocation8 + $0x70c] sm:$0xf]  ;;  %v5503_v44 = vld [vmem:[#allocation10 + $0x80] sm:$0xf] }
 0x221   :  { %3242 = vmatpush.bf16.msra.mxu3 %v4812_v1  ;;  %v2959_v16 = vadd.f32 %v6525_v53, %v2946_v11  ;;  %v5447_v1 = vld [vmem:[#allocation10 + $0x10] sm:$0xf]  ;;  %v6022_v53 = vld [vmem:[#allocation8 + $0x60c] sm:$0xf]  ;;  %v5481_v11 = vld [vmem:[#allocation10 + $0x58] sm:$0xf0] }
 0x222   :  { %3275 = vmatpush.bf16.msrb.mxu2 %v5292_v56  ;;  %3268 = vmatpush.bf16.msrb.mxu1 %v5068_v61  ;;  %v6108_v56 = vld [vmem:[#allocation10 + $0xb4] sm:$0xf0]  ;;  %v6026_v61 = vld [vmem:[#allocation8 + $0x62c] sm:$0xf] }
 0x223   :  { %3707 = vmatpush.bf16.msra.mxu0 %v5488_v60  ;;  %v5456_v60 = vor.u32 %v6090_v51, %v5455_v50  ;;  %v5528_v8 = vor.u32 %v6108_v56, %v5527_v40  ;;  %v2972_v12 = vadd.f32 %v2971_v49, %v2959_v16  ;;  %v5212_v41 = vor.u32 %v6026_v61, %v5209_v62  ;;  %v6095_v56 = vld [vmem:[#allocation10 + $0x54] sm:$0xf]  ;;  %v5553_v61 = vld [vmem:[#allocation10 + $0xe8] sm:$0xf0] }
 0x224   :  { %3243 = vmatmul.bf16.vlgmr.msra.gmra.mxu3 %v6473_v5  ;;  %v5244_v5 = vor.u32 %v6034_v34, %v5241_v9  ;;  %v6542_v0 = vpop.f32.mrf.mxu1  ;;  %v5196_v34 = vor.u32 %v6022_v53, %v5193_v28  ;;  %v5337_v9 = vld [vmem:[#allocation8 + $0x738] sm:$0xf0]  ;;  %v5324_v40 = vor.u32 %v6054_v43, %v5321_v63  ;;  %v5484_v62 = vor.u32 %v6095_v56, %v5481_v11  ;;  %v5473_v16 = vld [vmem:[#allocation10 + $0x48] sm:$0xf0]  ;;  %v6128_v43 = vld [vmem:[#allocation10 + $0x154] sm:$0xf0] }
 0x225   :  { %3287 = vmatpush.bf16.msrb.mxu3 %v5436_v10  ;;  %3269 = vmatmul.bf16.vlgmr.msrb.gmra.mxu1 %v6483_v24  ;;  %v5535_v24 = vld [vmem:[#allocation10 + $0xc0] sm:$0xf]  ;;  %v6106_v10 = vld [vmem:[#allocation10 + $0xa4] sm:$0xf0]  ;;  %v6085_v63 = vld [vmem:[#allocation10 + $0x4] sm:$0xf] }
 0x226   :  { %3719 = vmatpush.bf16.msra.mxu1 %v5560_v3  ;;  %3276 = vmatpush.bf16.msrb.mxu2 %v5276_v13  ;;  %v5536_v52 = vor.u32 %v6110_v39, %v5535_v24  ;;  %v3051_v3 = vpop.f32.mrf.mxu0  ;;  %v6062_v13 = vld [vmem:[#allocation8 + $0x74c] sm:$0xf]  ;;  %v5520_v23 = vor.u32 %v6106_v10, %v5519_v31  ;;  %v5512_v39 = vor.u32 %v6104_v29, %v5511_v27 }
 0x227   :  { %3708 = vmatpush.bf16.msra.mxu0 %v5480_v15  ;;  %v2984_v14 = vpop.f32.mrf.mxu3  ;;  %v5448_v15 = vor.u32 %v6088_v2, %v5447_v1  ;;  %v2973_v19 = vpop.f32.mrf.mxu2  ;;  %v5489_v24 = vld [vmem:[#allocation10 + $0x68] sm:$0xf0]  ;;  %v2998_v2 = vadd.f32 %v6527_v33, %v1597_v58  ;;  %v5545_v3 = vld [vmem:[#allocation10 + $0xd8] sm:$0xf0]  ;;  %v6109_v33 = vld [vmem:[#allocation10 + $0xc4] sm:$0xf] }
 0x228   :  { %v2985_v42 = vadd.f32 %v2984_v14, %v2972_v12  ;;  %v5465_v14 = vld [vmem:[#allocation10 + $0x38] sm:$0xf0] }
 0x229   :  { %3288 = vmatpush.bf16.msrb.mxu3 %v5420_v4  ;;  %v6099_v4 = vld [vmem:[#allocation10 + $0x74] sm:$0xf]  ;;  %v3011_v31 = vadd.f32 %v6529_v59, %v2998_v2  ;;  %v6124_v2 = vld [vmem:[#allocation10 + $0x134] sm:$0xf0] }
 0x22a   :  { %3720 = vmatpush.bf16.msra.mxu1 %v5552_v20  ;;  %3277 = vmatpush.bf16.msrb.mxu2 %v5260_v25  ;;  %v6086_v20 = vld [vmem:[#allocation10 + $0x4] sm:$0xf0]  ;;  %v5356_v25 = vor.u32 %v6062_v13, %v5353_v17  ;;  %vm3300_vm11 = vcmp.gt.f32.partialorder %v2985_v42, 0.0  ;;  %v6132_v13 = vld [vmem:[#allocation10 + $0x174] sm:$0xf0] }
 0x22b   :  { %3709 = vmatpush.bf16.msra.mxu0 %v5472_v30  ;;  %v3304_v30 = vmul.f32 0.2, %v2985_v42  ;;  %v5440_v37 = vor.u32 %v6086_v20, %v5439_v32  ;;  %v6091_v17 = vld [vmem:[#allocation10 + $0x34] sm:$0xf]  ;;  %v5457_v20 = vld [vmem:[#allocation10 + $0x28] sm:$0xf0] }
 0x22c   :  { %v3064_v35 = vpop.f32.mrf.mxu1  ;;  %v5468_v59 = vor.u32 %v6091_v17, %v5465_v14  ;;  %v5575_v17 = vld [vmem:[#allocation10 + $0x110] sm:$0xf]  ;;  %v6120_v14 = vld [vmem:[#allocation10 + $0x114] sm:$0xf0] }
 0x22d   :  { %3289 = vmatpush.bf16.msrb.mxu3 %v5404_v38  ;;  %v6097_v38 = vld [vmem:[#allocation10 + $0x64] sm:$0xf]  ;;  %v3308_v18 = vsel %vm3300_vm11, %v2985_v42, %v3304_v30  ;;  %v5537_v42 = vld [vmem:[#allocation10 + $0xc8] sm:$0xf0]  ;;  %v6087_v35 = vld [vmem:[#allocation10 + $0x14] sm:$0xf] }
 0x22e   :  { %3721 = vmatpush.bf16.msra.mxu1 %v5544_v6  ;;  %3278 = vmatpush.bf16.msrb.mxu2 %v5244_v5  ;;  %v5500_v6 = vor.u32 %v6099_v4, %v5497_v21  ;;  %v5340_v5 = vor.u32 %v6058_v26, %v5337_v9  ;;  %v6544_v50 = vpack.c.bf16 %v3308_v18, %v3308_v18  ;;  %v6107_v21 = vld [vmem:[#allocation10 + $0xb4] sm:$0xf]  ;;  %v6130_v26 = vld [vmem:[#allocation10 + $0x164] sm:$0xf0]  ;;  %v5521_v18 = vld [vmem:[#allocation10 + $0xa8] sm:$0xf0] }
 0x22f   :  { %3710 = vmatpush.bf16.msra.mxu0 %v5464_v45  ;;  %v6102_v45 = vld [vmem:[#allocation10 + $0x84] sm:$0xf0]  ;;  %v2986_v49 = vpop.f32.mrf.mxu3  ;;  %v3023_v51 = vpop.f32.mrf.mxu2  ;;  %v5540_v4 = vor.u32 %v6109_v33, %v5537_v42  ;;  %v6131_v33 = vld [vmem:[#allocation10 + $0x174] sm:$0xf] }
 0x230   :  { %v3024_v28 = vadd.f32 %v3023_v51, %v3011_v31  ;;  %v6103_v49 = vld [vmem:[#allocation10 + $0x94] sm:$0xf]  ;;  %v6122_v31 = vld [vmem:[#allocation10 + $0x124] sm:$0xf0] }
 0x231   :  { %3290 = vmatpush.bf16.msrb.mxu3 %v5388_v54  ;;  %v5504_v54 = vor.u32 %v6102_v45, %v5503_v44 }
 0x232   :  { %3722 = vmatpush.bf16.msra.mxu1 %v5536_v52  ;;  %3279 = vmatpush.bf16.msrb.mxu2 %v5228_v48  ;;  %v5492_v52 = vor.u32 %v6097_v38, %v5489_v24  ;;  %v5564_v48 = vor.u32 %v6115_v46, %v5561_v47  ;;  %v6105_v24 = vld [vmem:[#allocation10 + $0xa4] sm:$0xf]  ;;  %v5441_v46 = vld [vmem:[#allocation10 + $0x8] sm:$0xf0] }
 0x233   :  { %3711 = vmatpush.bf16.msra.mxu0 %v5456_v60  ;;  %v6113_v60 = vld [vmem:[#allocation10 + $0xe4] sm:$0xf]  ;;  %v5524_v47 = vor.u32 %v6105_v24, %v5521_v18  ;;  %v6123_v24 = vld [vmem:[#allocation10 + $0x134] sm:$0xf] }
 0x234   :  { %v5556_v1 = vor.u32 %v6113_v60, %v5553_v61  ;;  %v5444_v60 = vor.u32 %v6085_v63, %v5441_v46  ;;  %v6119_v63 = vld [vmem:[#allocation10 + $0x114] sm:$0xf]  ;;  %v5577_v46 = vld [vmem:[#allocation10 + $0x118] sm:$0xf0] }
 0x235   :  { %3291 = vmatpush.bf16.msrb.mxu3 %v5372_v7 }
 0x236   :  { %3723 = vmatpush.bf16.msra.mxu1 %v5528_v8  ;;  %3280 = vmatpush.bf16.msrb.mxu2 %v5212_v41  ;;  %v6111_v8 = vld [vmem:[#allocation10 + $0xd4] sm:$0xf]  ;;  %v5623_v41 = vld [vmem:[#allocation10 + $0x170] sm:$0xf] }
 0x237   :  { %3712 = vmatpush.bf16.msra.mxu0 %v5448_v15  ;;  %v3036_v7 = vpop.f32.mrf.mxu3  ;;  %v3025_v10 = vpop.f32.mrf.mxu2  ;;  %v5548_v15 = vor.u32 %v6111_v8, %v5545_v3  ;;  %v5624_v53 = vor.u32 %v6132_v13, %v5623_v41 }
 0x238   :  { %v3037_v19 = vadd.f32 %v3036_v7, %v3024_v28  ;;  %v5583_v7 = vld [vmem:[#allocation10 + $0x120] sm:$0xf]  ;;  %v6118_v28 = vld [vmem:[#allocation10 + $0x104] sm:$0xf0] }
 0x239   :  { %3292 = vmatpush.bf16.msrb.mxu3 %v5356_v25  ;;  %v5615_v25 = vld [vmem:[#allocation10 + $0x160] sm:$0xf]  ;;  %v5584_v41 = vor.u32 %v6122_v31, %v5583_v7 }
 0x23a   :  { %3724 = vmatpush.bf16.msra.mxu1 %v5520_v23  ;;  %3281 = vmatpush.bf16.msrb.mxu2 %v5196_v34  ;;  %v5529_v23 = vld [vmem:[#allocation10 + $0xb8] sm:$0xf0]  ;;  %v5616_v29 = vor.u32 %v6130_v26, %v5615_v25  ;;  %v3050_v30 = vadd.f32 %v6535_v36, %v3037_v19  ;;  %v6127_v25 = vld [vmem:[#allocation10 + $0x154] sm:$0xf] }
 0x23b   :  { %3713 = vmatpush.bf16.msra.mxu0 %v5440_v37  ;;  %v5532_v38 = vor.u32 %v6107_v21, %v5529_v23  ;;  %v5625_v19 = vld [vmem:[#allocation10 + $0x178] sm:$0xf0] }
 0x23c   :  { %v6557_v32 = vpop.f32.mrf.mxu0  ;;  %v3063_v45 = vadd.f32 %v6542_v0, %v3050_v30  ;;  %v5609_v26 = vld [vmem:[#allocation10 + $0x158] sm:$0xf0]  ;;  %v6125_v30 = vld [vmem:[#allocation10 + $0x144] sm:$0xf] }
 0x23d   :  { %3293 = vmatpush.bf16.msrb.mxu3 %v5340_v5  ;;  %3282 = vmatmul.bf16.vlgmr.msrb.gmra.mxu2 %v6492_v22  ;;  %v6093_v22 = vld [vmem:[#allocation10 + $0x44] sm:$0xf]  ;;  %v5607_v5 = vld [vmem:[#allocation10 + $0x150] sm:$0xf] }
 0x23e   :  { %3725 = vmatpush.bf16.msra.mxu1 %v5512_v39  ;;  %3714 = vmatmul.bf16.vlgmr.msra.gmra.mxu0 %v6544_v50  ;;  %v5476_v12 = vor.u32 %v6093_v22, %v5473_v16  ;;  %v5608_v44 = vor.u32 %v6128_v43, %v5607_v5  ;;  %v5505_v22 = vld [vmem:[#allocation10 + $0x88] sm:$0xf0]  ;;  %v6121_v5 = vld [vmem:[#allocation10 + $0x124] sm:$0xf] }
 0x23f   :  { %3758 = vmatpush.bf16.msrb.mxu0 %v5500_v6  ;;  %3732 = vmatpush.bf16.msra.mxu2 %v5624_v53  ;;  %v3038_v27 = vpop.f32.mrf.mxu3  ;;  %v3075_v37 = vpop.f32.mrf.mxu2  ;;  %v5449_v6 = vld [vmem:[#allocation10 + $0x18] sm:$0xf0]  ;;  %v5567_v53 = vld [vmem:[#allocation10 + $0x100] sm:$0xf]  ;;  %v5585_v43 = vld [vmem:[#allocation10 + $0x128] sm:$0xf0] }
 0x240   :  { %v5452_v36 = vor.u32 %v6087_v35, %v5449_v6  ;;  %v3076_v51 = vadd.f32 %v3075_v37, %v3063_v45  ;;  %v5568_v42 = vor.u32 %v6118_v28, %v5567_v53  ;;  %v1598_v45 = vperm.slane %v6550_v57, 2  ;;  %v5655_v28 = vld [vmem:[#allocation10 + $0x1b0] sm:$0xf] }
 0x241   :  { %3294 = vmatpush.bf16.msrb.mxu3 %v5324_v40  ;;  %v6126_v40 = vld [vmem:[#allocation10 + $0x144] sm:$0xf0] }
 0x242   :  { %3726 = vmatpush.bf16.msra.mxu1 %v5504_v54  ;;  %v6560_v34 = vpop.f32.mrf.mxu1  ;;  %v5599_v54 = vld [vmem:[#allocation10 + $0x140] sm:$0xf] }
 0x243   :  { %3759 = vmatpush.bf16.msrb.mxu0 %v5492_v52  ;;  %3733 = vmatpush.bf16.msra.mxu2 %v5616_v29  ;;  %v5513_v52 = vld [vmem:[#allocation10 + $0x98] sm:$0xf0]  ;;  %v5600_v11 = vor.u32 %v6126_v40, %v5599_v54  ;;  %v5612_v29 = vor.u32 %v6127_v25, %v5609_v26  ;;  %v5569_v54 = vld [vmem:[#allocation10 + $0x108] sm:$0xf0]  ;;  %v5687_v40 = vld [vmem:[#allocation10 + $0x1f0] sm:$0xf] }
 0x244   :  { %3295 = vmatmul.bf16.vlgmr.msrb.gmra.mxu3 %v6496_v55  ;;  %v6089_v55 = vld [vmem:[#allocation10 + $0x24] sm:$0xf]  ;;  %v3103_v39 = vpop.f32.mrf.mxu0  ;;  %v5516_v0 = vor.u32 %v6103_v49, %v5513_v52  ;;  %v5580_v49 = vor.u32 %v6119_v63, %v5577_v46  ;;  %v5631_v26 = vld [vmem:[#allocation10 + $0x180] sm:$0xf]  ;;  %v5665_v63 = vld [vmem:[#allocation10 + $0x1c8] sm:$0xf0] }
 0x245   :  { %v5460_v9 = vor.u32 %v6089_v55, %v5457_v20  ;;  %v5628_v55 = vor.u32 %v6131_v33, %v5625_v19  ;;  %v6129_v20 = vld [vmem:[#allocation10 + $0x164] sm:$0xf]  ;;  %v5593_v39 = vld [vmem:[#allocation10 + $0x138] sm:$0xf0]  ;;  %v6140_v33 = vld [vmem:[#allocation10 + $0x1b4] sm:$0xf0] }
 0x246   :  { %3771 = vmatpush.bf16.msrb.mxu1 %v5564_v48  ;;  %v5596_v18 = vor.u32 %v6123_v24, %v5593_v39  ;;  %v6117_v52 = vld [vmem:[#allocation10 + $0x104] sm:$0xf]  ;;  %v5656_v19 = vor.u32 %v6140_v33, %v5655_v28  ;;  %v3380_v33 = vld [vmem:[%s6591_s8] sm:$0x3] }
 0x247   :  { %3760 = vmatpush.bf16.msrb.mxu0 %v5484_v62  ;;  %3734 = vmatpush.bf16.msra.mxu2 %v5608_v44  ;;  %v3088_v56 = vpop.f32.mrf.mxu3  ;;  %v3077_v61 = vpop.f32.mrf.mxu2  ;;  %v6101_v62 = vld [vmem:[#allocation10 + $0x84] sm:$0xf]  ;;  %v5588_v44 = vor.u32 %v6121_v5, %v5585_v43  ;;  %v6143_v5 = vld [vmem:[#allocation10 + $0x1d4] sm:$0xf]  ;;  %v5673_v43 = vld [vmem:[#allocation10 + $0x1d8] sm:$0xf0] }
 0x248   :  { %v3089_v48 = vadd.f32 %v3088_v56, %v3076_v51  ;;  %v5572_v56 = vor.u32 %v6117_v52, %v5569_v54  ;;  %v6139_v52 = vld [vmem:[#allocation10 + $0x1b4] sm:$0xf]  ;;  %v5657_v54 = vld [vmem:[#allocation10 + $0x1b8] sm:$0xf0] }
 0x24a   :  { %3772 = vmatpush.bf16.msrb.mxu1 %v5556_v1  ;;  %v3116_v58 = vpop.f32.mrf.mxu1  ;;  %vm3301_vm12 = vcmp.gt.f32.partialorder %v3089_v48, 0.0  ;;  %v3305_v16 = vmul.f32 0.2, %v3089_v48  ;;  %v5591_v1 = vld [vmem:[#allocation10 + $0x130] sm:$0xf] }
 0x24b   :  { %3761 = vmatpush.bf16.msrb.mxu0 %v5476_v12  ;;  %3735 = vmatpush.bf16.msra.mxu2 %v5600_v11  ;;  %v5592_v3 = vor.u32 %v6124_v2, %v5591_v1  ;;  %v5508_v12 = vor.u32 %v6101_v62, %v5505_v22  ;;  %v6148_v11 = vld [vmem:[#allocation10 + $0x1f4] sm:$0xf0]  ;;  %v6146_v62 = vld [vmem:[#allocation10 + $0x1e4] sm:$0xf0] }
 0x24c   :  { %v3309_v8 = vsel %vm3301_vm12, %v3089_v48, %v3305_v16  ;;  %v5688_v58 = vor.u32 %v6148_v11, %v5687_v40  ;;  %v6144_v2 = vld [vmem:[#allocation10 + $0x1d4] sm:$0xf0]  ;;  %v5660_v40 = vor.u32 %v6139_v52, %v5657_v54  ;;  %v5649_v11 = vld [vmem:[#allocation10 + $0x1a8] sm:$0xf0] }
 0x24d   :  { %v3313_v10 = vpack.c.bf16 %v3309_v8, %v3309_v8 }
 0x24e   :  { %3773 = vmatpush.bf16.msrb.mxu1 %v5548_v15  ;;  %v5576_v15 = vor.u32 %v6120_v14, %v5575_v17  ;;  %3745 = vmatpush.bf16.msra.mxu3 %v5688_v58  ;;  %v1599_v58 = vperm.slane %v6550_v57, 3 }
 0x24f   :  { %3762 = vmatpush.bf16.msrb.mxu0 %v5468_v59  ;;  %3736 = vmatpush.bf16.msra.mxu2 %v5592_v3  ;;  %v3090_v13 = vpop.f32.mrf.mxu3 }
 0x250   :  { %3727 = vmatmul.bf16.vlgmr.msra.gmra.mxu1 %v3313_v10 }
 0x252   :  { %3774 = vmatpush.bf16.msrb.mxu1 %v5540_v4  ;;  %v5617_v4 = vld [vmem:[#allocation10 + $0x168] sm:$0xf0] }
 0x253   :  { %3763 = vmatpush.bf16.msrb.mxu0 %v5460_v9  ;;  %3737 = vmatpush.bf16.msra.mxu2 %v5584_v41  ;;  %v5601_v9 = vld [vmem:[#allocation10 + $0x148] sm:$0xf0] }
 0x254   :  { %v5604_v35 = vor.u32 %v6125_v30, %v5601_v9  ;;  %v5689_v9 = vld [vmem:[#allocation10 + $0x1f8] sm:$0xf0] }
 0x256   :  { %3775 = vmatpush.bf16.msrb.mxu1 %v5532_v38 }
 0x257   :  { %3764 = vmatpush.bf16.msrb.mxu0 %v5452_v36  ;;  %3738 = vmatpush.bf16.msra.mxu2 %v5576_v15 }
 0x25a   :  { %3776 = vmatpush.bf16.msrb.mxu1 %v5524_v47  ;;  %v3102_v47 = vadd.f32 %v6557_v32, %v1598_v45  ;;  %v5676_v45 = vor.u32 %v6143_v5, %v5673_v43  ;;  %v3816_v5 = vld [vmem:[%s6592_s9] sm:$0x3] }
 0x25b   :  { %3765 = vmatpush.bf16.msrb.mxu0 %v5444_v60  ;;  %3739 = vmatpush.bf16.msra.mxu2 %v5568_v42 }
 0x25c   :  { %v3115_v51 = vadd.f32 %v6560_v34, %v3102_v47  ;;  %v5671_v34 = vld [vmem:[#allocation10 + $0x1d0] sm:$0xf] }
 0x25d   :  { %v3153_v59 = vpop.f32.mrf.mxu0  ;;  %v5672_v3 = vor.u32 %v6144_v2, %v5671_v34  ;;  %v6133_v34 = vld [vmem:[#allocation10 + $0x184] sm:$0xf]  ;;  %v5633_v2 = vld [vmem:[#allocation10 + $0x188] sm:$0xf0] }
 0x25e   :  { %3777 = vmatpush.bf16.msrb.mxu1 %v5516_v0  ;;  %3766 = vmatmul.bf16.vlgmr.msrb.gmra.mxu0 %v6544_v50  ;;  %v5620_v50 = vor.u32 %v6129_v20, %v5617_v4  ;;  %v5679_v0 = vld [vmem:[#allocation10 + $0x1e0] sm:$0xf] }
 0x25f   :  { %3784 = vmatpush.bf16.msrb.mxu2 %v5628_v55  ;;  %v5680_v22 = vor.u32 %v6146_v62, %v5679_v0  ;;  %v6138_v55 = vld [vmem:[#allocation10 + $0x1a4] sm:$0xf0]  ;;  %v6135_v0 = vld [vmem:[#allocation10 + $0x194] sm:$0xf]  ;;  %v5641_v62 = vld [vmem:[#allocation10 + $0x198] sm:$0xf0] }
 0x260   :  { %v3127_v21 = vpop.f32.mrf.mxu2 }
 0x261   :  { %v3128_v48 = vadd.f32 %v3127_v21, %v3115_v51  ;;  %3746 = vmatpush.bf16.msra.mxu3 %v5680_v22  ;;  %v5639_v21 = vld [vmem:[#allocation10 + $0x190] sm:$0xf] }
 0x262   :  { %3778 = vmatpush.bf16.msrb.mxu1 %v5508_v12  ;;  %v3166_v23 = vpop.f32.mrf.mxu1  ;;  %v6142_v12 = vld [vmem:[#allocation10 + $0x1c4] sm:$0xf0] }
 0x263   :  { %3785 = vmatpush.bf16.msrb.mxu2 %v5620_v50 }
 0x265   :  { %3779 = vmatmul.bf16.vlgmr.msrb.gmra.mxu1 %v3313_v10  ;;  %v3155_v27 = vpop.f32.mrf.mxu0  ;;  %3747 = vmatpush.bf16.msra.mxu3 %v5672_v3  ;;  %v5663_v10 = vld [vmem:[#allocation10 + $0x1c0] sm:$0xf]  ;;  %v5636_v3 = vor.u32 %v6133_v34, %v5633_v2 }
 0x266   :  { %v5664_v13 = vor.u32 %v6142_v12, %v5663_v10  ;;  %v6134_v27 = vld [vmem:[#allocation10 + $0x184] sm:$0xf0] }
 0x267   :  { %3786 = vmatpush.bf16.msrb.mxu2 %v5612_v29  ;;  %v3140_v37 = vpop.f32.mrf.mxu3  ;;  %v6147_v29 = vld [vmem:[#allocation10 + $0x1f4] sm:$0xf]  ;;  %v5632_v30 = vor.u32 %v6134_v27, %v5631_v26 }
 0x268   :  { %v3129_v6 = vpop.f32.mrf.mxu2  ;;  %v3141_v61 = vadd.f32 %v3140_v37, %v3128_v48 }
 0x269   :  { %3748 = vmatpush.bf16.msra.mxu3 %v5664_v13  ;;  %v6145_v6 = vld [vmem:[#allocation10 + $0x1e4] sm:$0xf] }
 0x26a   :  { %v3168_v38 = vpop.f32.mrf.mxu1  ;;  %v3154_v32 = vadd.f32 %v3153_v59, %v3141_v61  ;;  %v5647_v59 = vld [vmem:[#allocation10 + $0x1a0] sm:$0xf] }
 0x26b   :  { %3787 = vmatpush.bf16.msrb.mxu2 %v5604_v35  ;;  %v5648_v4 = vor.u32 %v6138_v55, %v5647_v59  ;;  %v5692_v35 = vor.u32 %v6147_v29, %v5689_v9  ;;  %v5681_v38 = vld [vmem:[#allocation10 + $0x1e8] sm:$0xf0] }
 0x26c   :  { %v3167_v7 = vadd.f32 %v3166_v23, %v3154_v32  ;;  %v6136_v23 = vld [vmem:[#allocation10 + $0x194] sm:$0xf0]  ;;  %v5684_v24 = vor.u32 %v6145_v6, %v5681_v38  ;;  %v5644_v32 = vor.u32 %v6135_v0, %v5641_v62 }
 0x26d   :  { %3749 = vmatpush.bf16.msra.mxu3 %v5656_v19  ;;  %v5640_v25 = vor.u32 %v6136_v23, %v5639_v21  ;;  %v3383_v21 = vperm.slane %v3380_v33, 1 }
 0x26f   :  { %3788 = vmatpush.bf16.msrb.mxu2 %v5596_v18  ;;  %v3142_v36 = vpop.f32.mrf.mxu3 }
 0x270   :  { %v6141_v36 = vld [vmem:[#allocation10 + $0x1c4] sm:$0xf] }
 0x271   :  { %3750 = vmatpush.bf16.msra.mxu3 %v5648_v4  ;;  %v5668_v47 = vor.u32 %v6141_v36, %v5665_v63  ;;  %v3819_v36 = vperm.slane %v3816_v5, 1 }
 0x273   :  { %3789 = vmatpush.bf16.msrb.mxu2 %v5588_v44 }
 0x275   :  { %3751 = vmatpush.bf16.msra.mxu3 %v5640_v25 }
 0x277   :  { %3790 = vmatpush.bf16.msrb.mxu2 %v5580_v49 }
 0x279   :  { %3752 = vmatpush.bf16.msra.mxu3 %v5632_v30 }
 0x27b   :  { %3791 = vmatpush.bf16.msrb.mxu2 %v5572_v56  ;;  %v6137_v56 = vld [vmem:[#allocation10 + $0x1a4] sm:$0xf] }
 0x27c   :  { %v5652_v48 = vor.u32 %v6137_v56, %v5649_v11 }
 0x27d   :  { %v6567_v60 = vpop.f32.mrf.mxu0  ;;  %3797 = vmatpush.bf16.msrb.mxu3 %v5692_v35 }
 0x27e   :  { %v3206_v22 = vadd.f32 %v6567_v60, %v1599_v58 }
 0x280   :  { %v3179_v16 = vpop.f32.mrf.mxu2 }
 0x281   :  { %v3180_v31 = vadd.f32 %v3179_v16, %v3167_v7  ;;  %3798 = vmatpush.bf16.msrb.mxu3 %v5684_v24 }
 0x282   :  { %v6569_v1 = vpop.f32.mrf.mxu1 }
 0x283   :  { %v3219_v16 = vadd.f32 %v6569_v1, %v3206_v22 }
 0x285   :  { %v3207_v8 = vpop.f32.mrf.mxu0  ;;  %3799 = vmatpush.bf16.msrb.mxu3 %v5676_v45  ;;  %v3818_v45 = vperm.slane %v3816_v5, 0 }
 0x287   :  { %v3192_v41 = vpop.f32.mrf.mxu3 }
 0x288   :  { %v3193_v17 = vadd.f32 %v3192_v41, %v3180_v31  ;;  %v3181_v14 = vpop.f32.mrf.mxu2 }
 0x289   :  { %3800 = vmatpush.bf16.msrb.mxu3 %v5668_v47 }
 0x28a   :  { %v3220_v15 = vpop.f32.mrf.mxu1  ;;  %vm3302_vm13 = vcmp.gt.f32.partialorder %v3193_v17, 0.0  ;;  %v3306_v53 = vmul.f32 0.2, %v3193_v17 }
 0x28c   :  { %v3310_v42 = vsel %vm3302_vm13, %v3193_v17, %v3306_v53 }
 0x28d   :  { %v3314_v20 = vpack.c.bf16 %v3310_v42, %v3310_v42  ;;  %3801 = vmatpush.bf16.msrb.mxu3 %v5660_v40  ;;  %v3382_v42 = vperm.slane %v3380_v33, 0  ;;  %v6163_v40 = vld [vmem:[#allocation2] ss:$0 sm:$0xff] }
 0x28f   :  { %v3194_v50 = vpop.f32.mrf.mxu3  ;;  %3740 = vmatmul.bf16.vlgmr.msra.gmra.mxu2 %v3314_v20 }
 0x291   :  { %3802 = vmatpush.bf16.msrb.mxu3 %v5652_v48 }
 0x295   :  { %3803 = vmatpush.bf16.msrb.mxu3 %v5644_v32 }
 0x299   :  { %3804 = vmatpush.bf16.msrb.mxu3 %v5636_v3 }
 0x29d   :  { %v3257_v37 = vpop.f32.mrf.mxu0 }
 0x29f   :  { %3792 = vmatmul.bf16.vlgmr.msrb.gmra.mxu2 %v3314_v20 }
 0x2a0   :  { %v3231_v39 = vpop.f32.mrf.mxu2 }
 0x2a1   :  { %v3232_v8 = vadd.f32 %v3231_v39, %v3219_v16 }
 0x2a2   :  { %v3270_v18 = vpop.f32.mrf.mxu1 }
 0x2a5   :  { %v3259_v44 = vpop.f32.mrf.mxu0 }
 0x2a7   :  { %v3244_v46 = vpop.f32.mrf.mxu3 }
 0x2a8   :  { %v3233_v49 = vpop.f32.mrf.mxu2  ;;  %v3245_v31 = vadd.f32 %v3244_v46, %v3232_v8 }
 0x2aa   :  { %v3272_v51 = vpop.f32.mrf.mxu1  ;;  %v3258_v10 = vadd.f32 %v3257_v37, %v3245_v31 }
 0x2ac   :  { %v3271_v41 = vadd.f32 %v3270_v18, %v3258_v10 }
 0x2af   :  { %v3246_v61 = vpop.f32.mrf.mxu3 }
 0x2bb   :  { %v3715_v7 = vpop.f32.mrf.mxu0 }
 0x2bc   :  { %v3716_v19 = vadd.f32 %v3715_v7, %v3382_v42 }
 0x2c0   :  { %v3283_v12 = vpop.f32.mrf.mxu2 }
 0x2c1   :  { %v3284_v13 = vadd.f32 %v3283_v12, %v3271_v41 }
 0x2c3   :  { %v3717_v57 = vpop.f32.mrf.mxu0 }
 0x2c7   :  { %v3296_v17 = vpop.f32.mrf.mxu3 }
 0x2c8   :  { %v3297_v14 = vadd.f32 %v3296_v17, %v3284_v13  ;;  %v3285_v15 = vpop.f32.mrf.mxu2 }
 0x2ca   :  { %vm3303_vm14 = vcmp.gt.f32.partialorder %v3297_v14, 0.0  ;;  %v3307_v60 = vmul.f32 0.2, %v3297_v14 }
 0x2cc   :  { %v3311_v53 = vsel %vm3303_vm14, %v3297_v14, %v3307_v60 }
 0x2cd   :  { %v3315_v1 = vpack.c.bf16 %v3311_v53, %v3311_v53  ;;  %v3728_v55 = vpop.f32.mrf.mxu1 }
 0x2ce   :  { %v3729_v20 = vadd.f32 %v3728_v55, %v3716_v19 }
 0x2cf   :  { %v3298_v28 = vpop.f32.mrf.mxu3  ;;  %3753 = vmatmul.bf16.vlgmr.msra.gmra.mxu3 %v3315_v1 }
 0x2d5   :  { %v3730_v50 = vpop.f32.mrf.mxu1 }
 0x2db   :  { %v3767_v59 = vpop.f32.mrf.mxu0 }
 0x2dc   :  { %v3768_v23 = vadd.f32 %v3767_v59, %v3383_v21 }
 0x2df   :  { %3805 = vmatmul.bf16.vlgmr.msrb.gmra.mxu3 %v3315_v1 }
 0x2e2   :  { %v3780_v25 = vpop.f32.mrf.mxu1 }
 0x2e3   :  { %v3769_v4 = vpop.f32.mrf.mxu0  ;;  %v3781_v26 = vadd.f32 %v3780_v25, %v3768_v23 }
 0x2ea   :  { %v3782_v27 = vpop.f32.mrf.mxu1 }
 0x312   :  { %v3741_v29 = vpop.f32.mrf.mxu2 }
 0x313   :  { %v3742_v30 = vadd.f32 %v3741_v29, %v3729_v20 }
 0x31a   :  { %v3743_v9 = vpop.f32.mrf.mxu2 }
 0x322   :  { %v3793_v37 = vpop.f32.mrf.mxu2 }
 0x323   :  { %v3794_v39 = vadd.f32 %v3793_v37, %v3781_v26 }
 0x32a   :  { %v3795_v35 = vpop.f32.mrf.mxu2 }
 0x352   :  { %v3754_v6 = vpop.f32.mrf.mxu3 }
 0x353   :  { %v3755_v24 = vadd.f32 %v3754_v6, %v3742_v30 }
 0x355   :  { %v3812_v18 = vmul.f32 0.2, %v3755_v24  ;;  %vm3810_vm15 = vcmp.gt.f32.partialorder %v3755_v24, 0.0 }
 0x357   :  { %v3814_v46 = vsel %vm3810_vm15, %v3755_v24, %v3812_v18 }
 0x358   :  { %v3822_v49 = vmul.f32 %v3818_v45, %v3814_v46 }
 0x35a   :  { %v3756_v38 = vpop.f32.mrf.mxu3 }
 0x362   :  { %v3806_v43 = vpop.f32.mrf.mxu3 }
 0x363   :  { %v3807_v44 = vadd.f32 %v3806_v43, %v3794_v39 }
 0x365   :  { %vm3811_vm0 = vcmp.gt.f32.partialorder %v3807_v44, 0.0  ;;  %v3813_v63 = vmul.f32 0.2, %v3807_v44 }
 0x367   :  { %v3815_v47 = vsel %vm3811_vm0, %v3807_v44, %v3813_v63 }
 0x368   :  { %v3823_v51 = vmul.f32 %v3819_v36, %v3815_v47 }
 0x36a   :  { %v3808_v52 = vpop.f32.mrf.mxu3  ;;  %v3824_v54 = vadd.f32 %v3823_v51, %v3822_v49 }
 0x36c   :  { %3825 = vadd.xlane.f32.xlu0 %v3824_v54 }
 0x3df   :  { %v3826_v56 = vpop.xlane.xlu0 %3825 }
 0x3e0   :  { %v3831_v11 = vadd.f32 %v6163_v40, %v3826_v56 }
 0x3e2   :  { %v3832_v48 = vsub.f32 0.0, %v3831_v11 }
 0x3e4   :  { %v3833_v58 = vmul.f32 1.442695, %v3832_v48 }
 0x3e6   :  { %6164 = vpow2.f32 %v3833_v58 }
 0x3ec   :  { %v6165_v61 = vpop.eup %6164 }
 0x3ed   :  { %v3835_v0 = vadd.f32 1.0, %v6165_v61 }
 0x3ef   :  { %6166 = vrcp.f32 %v3835_v0  ;;  %v3847_v16 = vand.u32 2147483648, %v3835_v0  ;;  %v3845_v2 = vand.u32 2147483647, %v3835_v0  ;;  %vm3841_vm2 = vweird.f32 %v3835_v0 }
 0x3f1   :  { %v3848_v3 = vor.u32 1.1754944e-38, %v3847_v16  ;;  %vm3846_vm5 = vcmp.eq.f32.partialorder %v3845_v2, 8.507059e+37 }
 0x3f5   :  { %v6167_v62 = vpop.eup %6166 }
 0x3f6   :  { %v3837_v22 = vmul.f32 %v6167_v62, %v3835_v0  ;;  %vm3842_vm1 = vweird.f32 %v6167_v62 }
 0x3f7   :  { %vm3843_vm4 = vmor %vm3841_vm2, %vm3842_vm1 }
 0x3f8   :  { %v3838_v32 = vsub.f32 1.0, %v3837_v22 }
 0x3fa   :  { %v3839_v34 = vmul.f32 %v6167_v62, %v3838_v32 }
 0x3fc   :  { %v3840_v8 = vadd.f32 %v6167_v62, %v3839_v34 }
 0x3fe   :  { %v3844_v7 = vsel %vm3843_vm4, %v6167_v62, %v3840_v8 }
 0x3ff   :  { %v3849_v31 = vsel %vm3846_vm5, %v3848_v3, %v3844_v7 }
 0x400   :  { %3852 = vst.msk [vmem:[%s6594_s11] sm:$0xff] %vm3851_vm3, %v3849_v31 }
 0x401   :  { %3857 = vsyncpa [#allocation4], 1 }
 0x402   :  { %3858 = vsyncpa [#allocation6], 1 }
 0x403   :  { %3859 = vsyncpa [#allocation9], 1 }

</bundles_post_ra>
